<compile_context>
chip_gen: v6e
topology: v6e:2x2x1
jax: 0.10.0
libtpu: 0.0.40
codegen_flags: <defaults>
</compile_context>

<pallas_src>
import functools

import jax
import jax.numpy as jnp
from jax import lax
from jax.experimental import pallas as pl
from jax.experimental.pallas import tpu as pltpu


_LN_EPS = 1e-12


def _layer_norm(x, gamma, beta, eps):
    mu = jnp.mean(x, axis=-1, keepdims=True)
    var = jnp.mean((x - mu) ** 2, axis=-1, keepdims=True)
    return (x - mu) * lax.rsqrt(var + eps) * gamma + beta


# --------------------------- fully fused forward kernel ---------------------------

def _forward_kernel(
        # scalar-prefetch (SMEM) refs
        enc_ids_ref, dec_ids_ref,
        # embeddings
        wemb_ref, wembt_ref, pos_ref, eg_ref, eb_ref,
        # tied self-attention (encoder AND decoder)
        swq_ref, swk_ref, swv_ref, swo_ref, sbo_ref, sg_ref, sb_ref,
        # decoder cross-attention (untied)
        cwq_ref, cwk_ref, cwv_ref, cwo_ref, cbo_ref, cg_ref, cb_ref,
        # tied FFN
        fw1_ref, fb1_ref, fw2_ref, fb2_ref, fg_ref, fb_ref,
        # LM head bias
        lmb_ref,
        # output
        logits_ref,
        # scratch
        emb_scratch,
        *, S, nh, hd, eps):
    b = pl.program_id(0)

    # -- word-emb gather (rows from VMEM table, ids from SMEM) + pos-emb + LN --
    def embed(ids_ref):
        for s in range(S):
            tok = ids_ref[b, s]                                     # SMEM scalar
            emb_scratch[pl.ds(s, 1), :] = wemb_ref[pl.ds(tok, 1), :]
        x = emb_scratch[...] + pos_ref[...]                         # [S, H] f32
        return _layer_norm(x, eg_ref[...], eb_ref[...], eps)

    # -- full-width QKV / output projections, per-head SDPA, residual + LN --
    def attention(xq, xkv, wq_ref, wk_ref, wv_ref, wo_ref, bo_ref, g_ref, be_ref,
                  causal):
        xq_h = xq.astype(jnp.bfloat16)
        xkv_h = xkv.astype(jnp.bfloat16)
        # q/k/v projection biases are zero in this synthetic stand-in (omitted);
        # the 1/sqrt(hd) attention scale is folded into wq at init.
        q = jnp.dot(xq_h, wq_ref[...], preferred_element_type=jnp.float32)   # [Sq, H]
        k = jnp.dot(xkv_h, wk_ref[...], preferred_element_type=jnp.float32)  # [Sk, H]
        v = jnp.dot(xkv_h, wv_ref[...], preferred_element_type=jnp.float32)  # [Sk, H]
        if causal:
            # built once, reused by every head (JAX does not CSE iotas)
            qi = lax.broadcasted_iota(jnp.int32, (q.shape[0], k.shape[0]), 0)
            ki = lax.broadcasted_iota(jnp.int32, (q.shape[0], k.shape[0]), 1)
            mask = jnp.where(ki <= qi, 0.0, -1e30).astype(jnp.float32)
        ctx = []
        for h in range(nh):
            sl = slice(h * hd, (h + 1) * hd)
            qh, kh, vh = q[:, sl], k[:, sl], v[:, sl]
            sc = lax.dot_general(qh.astype(jnp.bfloat16), kh.astype(jnp.bfloat16),
                                 (((1,), (1,)), ((), ())),
                                 preferred_element_type=jnp.float32)          # [Sq, Sk]
            if causal:
                sc = sc + mask
            sc = sc - jnp.max(sc, axis=-1, keepdims=True)
            pr = jnp.exp(sc)
            pr = pr * pl.reciprocal(jnp.sum(pr, axis=-1, keepdims=True), approx=True)
            ctx.append(jnp.dot(pr.astype(jnp.bfloat16), vh.astype(jnp.bfloat16),
                               preferred_element_type=jnp.float32))           # [Sq, hd]
        ctx = jnp.concatenate(ctx, axis=-1)                                   # [Sq, H]
        out = jnp.dot(ctx.astype(jnp.bfloat16), wo_ref[...],
                      preferred_element_type=jnp.float32) + bo_ref[...] + xq
        return _layer_norm(out, g_ref[...], be_ref[...], eps)

    # -- FFN: W1 + GELU + W2 + residual + LN --
    def ffn(x):
        h1 = jnp.dot(x.astype(jnp.bfloat16), fw1_ref[...],
                     preferred_element_type=jnp.float32) + fb1_ref[...]
        # TODO(synk): PyTorch nn.GELU defaults to the exact erf form; tanh approx used.
        h1 = jax.nn.gelu(h1, approximate=True)
        h2 = jnp.dot(h1.astype(jnp.bfloat16), fw2_ref[...],
                     preferred_element_type=jnp.float32) + fb2_ref[...]
        return _layer_norm(h2 + x, fg_ref[...], fb_ref[...], eps)

    # -------- encoder (one tied layer) --------
    x = embed(enc_ids_ref)
    x = attention(x, x, swq_ref, swk_ref, swv_ref, swo_ref, sbo_ref, sg_ref, sb_ref,
                  causal=False)
    enc_h = ffn(x)

    # -------- decoder (tied self-attn / FFN weights, untied cross-attn) --------
    y = embed(dec_ids_ref)
    y = attention(y, y, swq_ref, swk_ref, swv_ref, swo_ref, sbo_ref, sg_ref, sb_ref,
                  causal=True)
    y = attention(y, enc_h, cwq_ref, cwk_ref, cwv_ref, cwo_ref, cbo_ref, cg_ref, cb_ref,
                  causal=False)
    y = ffn(y)

    # -------- tied LM head against the pre-transposed [H, V] embedding copy --------
    logits = jnp.dot(y.astype(jnp.bfloat16), wembt_ref[...],
                     preferred_element_type=jnp.float32) + lmb_ref[...]
    logits_ref[0] = logits


def _full_spec(arr):
    nd = arr.ndim
    return pl.BlockSpec(arr.shape, lambda b, *_: (0,) * nd)   # grid-invariant block


# --------------------------- soft-embedding kernel (apply_word_embeddings) ---------

def _soft_embed_kernel(x_ref, emb_ref, o_ref):
    o_ref[...] = jnp.dot(x_ref[...].astype(jnp.bfloat16),
                         emb_ref[...].astype(jnp.bfloat16),
                         preferred_element_type=jnp.float32)


def soft_embed(x, emb):
    """x: [B, S, V] soft (gumbel-softmax) token distributions; returns [B, S, H]."""
    B, S, V = x.shape
    H = emb.shape[1]
    out = pl.pallas_call(
        _soft_embed_kernel,
        out_shape=jax.ShapeDtypeStruct((B * S, H), jnp.float32),
    )(x.reshape(B * S, V), emb)
    return out.reshape(B, S, H)


# --------------------------------- Generator model ---------------------------------

class Generator:
    """Synthetic stand-in for EncoderDecoderModel.from_encoder_decoder_pretrained(
    backbone, backbone, tie_encoder_decoder=True):
      * encoder and decoder share (tied) self-attention + FFN + LayerNorm + embeddings
      * decoder additionally has (untied) cross-attention to the encoder output
      * LM head weight is tied to the word-embedding matrix
    One tied layer per stack reproduces the core math; the whole forward runs as a
    single fused Pallas kernel."""

    def __init__(self, key, vocab=64, hidden=32, heads=4, ffn=64, max_pos=16):
        self.V, self.H, self.nh, self.F, self.P = vocab, hidden, heads, ffn, max_pos
        self.hd = hidden // heads
        ks = jax.random.split(key, 12)

        def dense(k, fi, fo):
            return 0.02 * jax.random.normal(k, (fi, fo), jnp.float32)

        scale = 1.0 / float(self.hd) ** 0.5

        def attn_params(kk):
            return {
                'wq': (dense(kk[0], hidden, hidden) * scale).astype(jnp.bfloat16),
                'wk': dense(kk[1], hidden, hidden).astype(jnp.bfloat16),
                'wv': dense(kk[2], hidden, hidden).astype(jnp.bfloat16),
                'wo': dense(kk[3], hidden, hidden).astype(jnp.bfloat16),
                'bo': jnp.zeros((1, hidden), jnp.float32),
                'ln_g': jnp.ones((1, hidden), jnp.float32),
                'ln_b': jnp.zeros((1, hidden), jnp.float32),
            }

        word_emb = 0.02 * jax.random.normal(ks[0], (vocab, hidden), jnp.float32)
        p = {}
        p['word_emb'] = word_emb                                    # f32 (gather source)
        p['word_emb_t'] = word_emb.T.astype(jnp.bfloat16)           # tied LM head, pre-transposed
        p['pos_emb'] = 0.02 * jax.random.normal(ks[1], (max_pos, hidden), jnp.float32)
        p['emb_ln_g'] = jnp.ones((1, hidden), jnp.float32)
        p['emb_ln_b'] = jnp.zeros((1, hidden), jnp.float32)
        p['self'] = attn_params(ks[2:6])     # tied: encoder AND decoder self-attn
        p['cross'] = attn_params(ks[6:10])   # decoder-only cross-attention (untied)
        p['ffn_w1'] = dense(ks[10], hidden, ffn).astype(jnp.bfloat16)
        p['ffn_b1'] = jnp.zeros((1, ffn), jnp.float32)
        p['ffn_w2'] = dense(ks[11], ffn, hidden).astype(jnp.bfloat16)
        p['ffn_b2'] = jnp.zeros((1, hidden), jnp.float32)
        p['ffn_ln_g'] = jnp.ones((1, hidden), jnp.float32)
        p['ffn_ln_b'] = jnp.zeros((1, hidden), jnp.float32)
        p['lm_bias'] = jnp.zeros((1, vocab), jnp.float32)
        self.p = p

    # -- single fused pallas_call for the whole encoder-decoder forward --
    def _fused_forward(self, enc_ids, dec_ids):
        p = self.p
        B, S = enc_ids.shape
        assert S <= self.P
        H, V = self.H, self.V
        tensors = [
            p['word_emb'], p['word_emb_t'], p['pos_emb'][:S],
            p['emb_ln_g'], p['emb_ln_b'],
            p['self']['wq'], p['self']['wk'], p['self']['wv'], p['self']['wo'],
            p['self']['bo'], p['self']['ln_g'], p['self']['ln_b'],
            p['cross']['wq'], p['cross']['wk'], p['cross']['wv'], p['cross']['wo'],
            p['cross']['bo'], p['cross']['ln_g'], p['cross']['ln_b'],
            p['ffn_w1'], p['ffn_b1'], p['ffn_w2'], p['ffn_b2'],
            p['ffn_ln_g'], p['ffn_ln_b'],
            p['lm_bias'],
        ]
        kern = functools.partial(_forward_kernel, S=S, nh=self.nh, hd=self.hd,
                                 eps=_LN_EPS)
        grid_spec = pltpu.PrefetchScalarGridSpec(
            num_scalar_prefetch=2,                 # enc_ids, dec_ids -> SMEM
            grid=(B,),                             # one batch element per step / per v7x core
            in_specs=[_full_spec(t) for t in tensors],
            out_specs=pl.BlockSpec((1, S, V), lambda b, *_: (b, 0, 0)),
            scratch_shapes=[pltpu.VMEM((S, H), jnp.float32)],
        )
        return pl.pallas_call(
            kern,
            out_shape=jax.ShapeDtypeStruct((B, S, V), jnp.float32),
            grid_spec=grid_spec,
            compiler_params=pltpu.CompilerParams(
                dimension_semantics=("parallel",)),
        )(enc_ids, dec_ids, *tensors)

    # -- public API mirroring the torch module --
    def forward(self, input_ids, decoder_input_ids, labels=None):
        logits = self._fused_forward(input_ids.astype(jnp.int32),
                                     decoder_input_ids.astype(jnp.int32))
        out = {'logits': logits}
        if labels is not None:
            logp = jax.nn.log_softmax(logits, axis=-1)
            nll = -jnp.take_along_axis(logp, labels[..., None], axis=-1)[..., 0]
            out['loss'] = nll.mean()
        return out

    def forward_logits(self, *args, **kwargs):
        return self.forward(*args, **kwargs)['logits']

    def forward_loss(self, *args, **kwargs):
        return self.forward(*args, **kwargs)['loss']

    def apply_word_embeddings(self, inputs):
        """inputs: [B, S, V] soft (gumbel-softmax) token distributions."""
        return soft_embed(inputs, self.p['word_emb'])


# ------------------------------- demo / smoke test -------------------------------

if __name__ == "__main__":
    key = jax.random.PRNGKey(0)
    k_model, k_in, k_dec, k_lab, k_soft = jax.random.split(key, 5)

    B, S, V, H = 2, 8, 64, 32
    gen = Generator(k_model, vocab=V, hidden=H, heads=4, ffn=64, max_pos=16)

    input_ids = jax.random.randint(k_in, (B, S), 0, V, dtype=jnp.int32)
    decoder_input_ids = jax.random.randint(k_dec, (B, S), 0, V, dtype=jnp.int32)
    labels = jax.random.randint(k_lab, (B, S), 0, V, dtype=jnp.int32)

    out = gen.forward(input_ids, decoder_input_ids, labels=labels)
    logits = jax.block_until_ready(out['logits'])
    loss = jax.block_until_ready(out['loss'])

    soft_tokens = jax.nn.softmax(jax.random.normal(k_soft, (B, S, V), jnp.float32), -1)
    emb = jax.block_until_ready(gen.apply_word_embeddings(soft_tokens))

    assert logits.shape == (B, S, V)
    assert emb.shape == (B, S, H)
    assert bool(jnp.isfinite(loss))
    print("KERNEL_OK")
</pallas_src>

<mosaic_0001>
module attributes {stable_mosaic.version = 11 : i64} {
  func.func @_forward_kernel(%arg0: i32, %arg1: memref<2x8xi32, #tpu.memory_space<smem>>, %arg2: memref<2x8xi32, #tpu.memory_space<smem>>, %arg3: memref<64x32xf32, #tpu.memory_space<vmem>>, %arg4: memref<32x64xbf16, #tpu.memory_space<vmem>>, %arg5: memref<8x32xf32, #tpu.memory_space<vmem>>, %arg6: memref<1x32xf32, #tpu.memory_space<vmem>>, %arg7: memref<1x32xf32, #tpu.memory_space<vmem>>, %arg8: memref<32x32xbf16, #tpu.memory_space<vmem>>, %arg9: memref<32x32xbf16, #tpu.memory_space<vmem>>, %arg10: memref<32x32xbf16, #tpu.memory_space<vmem>>, %arg11: memref<32x32xbf16, #tpu.memory_space<vmem>>, %arg12: memref<1x32xf32, #tpu.memory_space<vmem>>, %arg13: memref<1x32xf32, #tpu.memory_space<vmem>>, %arg14: memref<1x32xf32, #tpu.memory_space<vmem>>, %arg15: memref<32x32xbf16, #tpu.memory_space<vmem>>, %arg16: memref<32x32xbf16, #tpu.memory_space<vmem>>, %arg17: memref<32x32xbf16, #tpu.memory_space<vmem>>, %arg18: memref<32x32xbf16, #tpu.memory_space<vmem>>, %arg19: memref<1x32xf32, #tpu.memory_space<vmem>>, %arg20: memref<1x32xf32, #tpu.memory_space<vmem>>, %arg21: memref<1x32xf32, #tpu.memory_space<vmem>>, %arg22: memref<32x64xbf16, #tpu.memory_space<vmem>>, %arg23: memref<1x64xf32, #tpu.memory_space<vmem>>, %arg24: memref<64x32xbf16, #tpu.memory_space<vmem>>, %arg25: memref<1x32xf32, #tpu.memory_space<vmem>>, %arg26: memref<1x32xf32, #tpu.memory_space<vmem>>, %arg27: memref<1x32xf32, #tpu.memory_space<vmem>>, %arg28: memref<1x64xf32, #tpu.memory_space<vmem>>, %arg29: memref<1x8x64xf32, #tpu.memory_space<vmem>>, %arg30: memref<8x32xf32, #tpu.memory_space<vmem>>) attributes {dimension_semantics = [#tpu.dimension_semantics<parallel>], iteration_bounds = array<i64: 2>, scalar_prefetch = 2 : i64, scratch_operands = 1 : i64, tpu.core_type = #tpu.core_type<tc>, window_params = [{pipeline_mode = #tpu.pipeline_mode<synchronous>, transform_indices = @transform_0, window_bounds = array<i64: 64, 32>}, {pipeline_mode = #tpu.pipeline_mode<synchronous>, transform_indices = @transform_1, window_bounds = array<i64: 32, 64>}, {pipeline_mode = #tpu.pipeline_mode<synchronous>, transform_indices = @transform_2, window_bounds = array<i64: 8, 32>}, {pipeline_mode = #tpu.pipeline_mode<synchronous>, transform_indices = @transform_3, window_bounds = array<i64: 1, 32>}, {pipeline_mode = #tpu.pipeline_mode<synchronous>, transform_indices = @transform_4, window_bounds = array<i64: 1, 32>}, {pipeline_mode = #tpu.pipeline_mode<synchronous>, transform_indices = @transform_5, window_bounds = array<i64: 32, 32>}, {pipeline_mode = #tpu.pipeline_mode<synchronous>, transform_indices = @transform_6, window_bounds = array<i64: 32, 32>}, {pipeline_mode = #tpu.pipeline_mode<synchronous>, transform_indices = @transform_7, window_bounds = array<i64: 32, 32>}, {pipeline_mode = #tpu.pipeline_mode<synchronous>, transform_indices = @transform_8, window_bounds = array<i64: 32, 32>}, {pipeline_mode = #tpu.pipeline_mode<synchronous>, transform_indices = @transform_9, window_bounds = array<i64: 1, 32>}, {pipeline_mode = #tpu.pipeline_mode<synchronous>, transform_indices = @transform_10, window_bounds = array<i64: 1, 32>}, {pipeline_mode = #tpu.pipeline_mode<synchronous>, transform_indices = @transform_11, window_bounds = array<i64: 1, 32>}, {pipeline_mode = #tpu.pipeline_mode<synchronous>, transform_indices = @transform_12, window_bounds = array<i64: 32, 32>}, {pipeline_mode = #tpu.pipeline_mode<synchronous>, transform_indices = @transform_13, window_bounds = array<i64: 32, 32>}, {pipeline_mode = #tpu.pipeline_mode<synchronous>, transform_indices = @transform_14, window_bounds = array<i64: 32, 32>}, {pipeline_mode = #tpu.pipeline_mode<synchronous>, transform_indices = @transform_15, window_bounds = array<i64: 32, 32>}, {pipeline_mode = #tpu.pipeline_mode<synchronous>, transform_indices = @transform_16, window_bounds = array<i64: 1, 32>}, {pipeline_mode = #tpu.pipeline_mode<synchronous>, transform_indices = @transform_17, window_bounds = array<i64: 1, 32>}, {pipeline_mode = #tpu.pipeline_mode<synchronous>, transform_indices = @transform_18, window_bounds = array<i64: 1, 32>}, {pipeline_mode = #tpu.pipeline_mode<synchronous>, transform_indices = @transform_19, window_bounds = array<i64: 32, 64>}, {pipeline_mode = #tpu.pipeline_mode<synchronous>, transform_indices = @transform_20, window_bounds = array<i64: 1, 64>}, {pipeline_mode = #tpu.pipeline_mode<synchronous>, transform_indices = @transform_21, window_bounds = array<i64: 64, 32>}, {pipeline_mode = #tpu.pipeline_mode<synchronous>, transform_indices = @transform_22, window_bounds = array<i64: 1, 32>}, {pipeline_mode = #tpu.pipeline_mode<synchronous>, transform_indices = @transform_23, window_bounds = array<i64: 1, 32>}, {pipeline_mode = #tpu.pipeline_mode<synchronous>, transform_indices = @transform_24, window_bounds = array<i64: 1, 32>}, {pipeline_mode = #tpu.pipeline_mode<synchronous>, transform_indices = @transform_25, window_bounds = array<i64: 1, 64>}, {transform_indices = @transform_26, window_bounds = array<i64: 1, 8, 64>}]} {
    %0 = arith.index_cast %arg0 : i32 to index
    %c0 = arith.constant 0 : index
    %1 = memref.load %arg1[%0, %c0] : memref<2x8xi32, #tpu.memory_space<smem>>
    %2 = arith.index_cast %1 : i32 to index
    %c0_0 = arith.constant 0 : index
    %3 = vector.load %arg3[%2, %c0_0] : memref<64x32xf32, #tpu.memory_space<vmem>>, vector<1x32xf32>
    %c0_1 = arith.constant 0 : index
    %c0_2 = arith.constant 0 : index
    %4 = vector.load %arg30[%c0_1, %c0_2] : memref<8x32xf32, #tpu.memory_space<vmem>>, vector<1x32xf32>
    tpu.vector_store %arg30[%c0_1, %c0_2], %3 {strides = array<i32>} : memref<8x32xf32, #tpu.memory_space<vmem>>, vector<1x32xf32>,
    %5 = arith.index_cast %arg0 : i32 to index
    %c1 = arith.constant 1 : index
    %6 = memref.load %arg1[%5, %c1] : memref<2x8xi32, #tpu.memory_space<smem>>
    %7 = arith.index_cast %6 : i32 to index
    %c0_3 = arith.constant 0 : index
    %8 = vector.load %arg3[%7, %c0_3] : memref<64x32xf32, #tpu.memory_space<vmem>>, vector<1x32xf32>
    %c1_4 = arith.constant 1 : index
    %c0_5 = arith.constant 0 : index
    %9 = vector.load %arg30[%c1_4, %c0_5] : memref<8x32xf32, #tpu.memory_space<vmem>>, vector<1x32xf32>
    tpu.vector_store %arg30[%c1_4, %c0_5], %8 {strides = array<i32>} : memref<8x32xf32, #tpu.memory_space<vmem>>, vector<1x32xf32>,
    %10 = arith.index_cast %arg0 : i32 to index
    %c2 = arith.constant 2 : index
    %11 = memref.load %arg1[%10, %c2] : memref<2x8xi32, #tpu.memory_space<smem>>
    %12 = arith.index_cast %11 : i32 to index
    %c0_6 = arith.constant 0 : index
    %13 = vector.load %arg3[%12, %c0_6] : memref<64x32xf32, #tpu.memory_space<vmem>>, vector<1x32xf32>
    %c2_7 = arith.constant 2 : index
    %c0_8 = arith.constant 0 : index
    %14 = vector.load %arg30[%c2_7, %c0_8] : memref<8x32xf32, #tpu.memory_space<vmem>>, vector<1x32xf32>
    tpu.vector_store %arg30[%c2_7, %c0_8], %13 {strides = array<i32>} : memref<8x32xf32, #tpu.memory_space<vmem>>, vector<1x32xf32>,
    %15 = arith.index_cast %arg0 : i32 to index
    %c3 = arith.constant 3 : index
    %16 = memref.load %arg1[%15, %c3] : memref<2x8xi32, #tpu.memory_space<smem>>
    %17 = arith.index_cast %16 : i32 to index
    %c0_9 = arith.constant 0 : index
    %18 = vector.load %arg3[%17, %c0_9] : memref<64x32xf32, #tpu.memory_space<vmem>>, vector<1x32xf32>
    %c3_10 = arith.constant 3 : index
    %c0_11 = arith.constant 0 : index
    %19 = vector.load %arg30[%c3_10, %c0_11] : memref<8x32xf32, #tpu.memory_space<vmem>>, vector<1x32xf32>
    tpu.vector_store %arg30[%c3_10, %c0_11], %18 {strides = array<i32>} : memref<8x32xf32, #tpu.memory_space<vmem>>, vector<1x32xf32>,
    %20 = arith.index_cast %arg0 : i32 to index
    %c4 = arith.constant 4 : index
    %21 = memref.load %arg1[%20, %c4] : memref<2x8xi32, #tpu.memory_space<smem>>
    %22 = arith.index_cast %21 : i32 to index
    %c0_12 = arith.constant 0 : index
    %23 = vector.load %arg3[%22, %c0_12] : memref<64x32xf32, #tpu.memory_space<vmem>>, vector<1x32xf32>
    %c4_13 = arith.constant 4 : index
    %c0_14 = arith.constant 0 : index
    %24 = vector.load %arg30[%c4_13, %c0_14] : memref<8x32xf32, #tpu.memory_space<vmem>>, vector<1x32xf32>
    tpu.vector_store %arg30[%c4_13, %c0_14], %23 {strides = array<i32>} : memref<8x32xf32, #tpu.memory_space<vmem>>, vector<1x32xf32>,
    %25 = arith.index_cast %arg0 : i32 to index
    %c5 = arith.constant 5 : index
    %26 = memref.load %arg1[%25, %c5] : memref<2x8xi32, #tpu.memory_space<smem>>
    %27 = arith.index_cast %26 : i32 to index
    %c0_15 = arith.constant 0 : index
    %28 = vector.load %arg3[%27, %c0_15] : memref<64x32xf32, #tpu.memory_space<vmem>>, vector<1x32xf32>
    %c5_16 = arith.constant 5 : index
    %c0_17 = arith.constant 0 : index
    %29 = vector.load %arg30[%c5_16, %c0_17] : memref<8x32xf32, #tpu.memory_space<vmem>>, vector<1x32xf32>
    tpu.vector_store %arg30[%c5_16, %c0_17], %28 {strides = array<i32>} : memref<8x32xf32, #tpu.memory_space<vmem>>, vector<1x32xf32>,
    %30 = arith.index_cast %arg0 : i32 to index
    %c6 = arith.constant 6 : index
    %31 = memref.load %arg1[%30, %c6] : memref<2x8xi32, #tpu.memory_space<smem>>
    %32 = arith.index_cast %31 : i32 to index
    %c0_18 = arith.constant 0 : index
    %33 = vector.load %arg3[%32, %c0_18] : memref<64x32xf32, #tpu.memory_space<vmem>>, vector<1x32xf32>
    %c6_19 = arith.constant 6 : index
    %c0_20 = arith.constant 0 : index
    %34 = vector.load %arg30[%c6_19, %c0_20] : memref<8x32xf32, #tpu.memory_space<vmem>>, vector<1x32xf32>
    tpu.vector_store %arg30[%c6_19, %c0_20], %33 {strides = array<i32>} : memref<8x32xf32, #tpu.memory_space<vmem>>, vector<1x32xf32>,
    %35 = arith.index_cast %arg0 : i32 to index
    %c7 = arith.constant 7 : index
    %36 = memref.load %arg1[%35, %c7] : memref<2x8xi32, #tpu.memory_space<smem>>
    %37 = arith.index_cast %36 : i32 to index
    %c0_21 = arith.constant 0 : index
    %38 = vector.load %arg3[%37, %c0_21] : memref<64x32xf32, #tpu.memory_space<vmem>>, vector<1x32xf32>
    %c7_22 = arith.constant 7 : index
    %c0_23 = arith.constant 0 : index
    %39 = vector.load %arg30[%c7_22, %c0_23] : memref<8x32xf32, #tpu.memory_space<vmem>>, vector<1x32xf32>
    tpu.vector_store %arg30[%c7_22, %c0_23], %38 {strides = array<i32>} : memref<8x32xf32, #tpu.memory_space<vmem>>, vector<1x32xf32>,
    %c0_24 = arith.constant 0 : index
    %c0_25 = arith.constant 0 : index
    %40 = vector.load %arg30[%c0_24, %c0_25] : memref<8x32xf32, #tpu.memory_space<vmem>>, vector<8x32xf32>
    %c0_26 = arith.constant 0 : index
    %c0_27 = arith.constant 0 : index
    %41 = vector.load %arg5[%c0_26, %c0_27] : memref<8x32xf32, #tpu.memory_space<vmem>>, vector<8x32xf32>
    %42 = arith.addf %40, %41 : vector<8x32xf32>
    %c0_28 = arith.constant 0 : index
    %c0_29 = arith.constant 0 : index
    %43 = vector.load %arg6[%c0_28, %c0_29] : memref<1x32xf32, #tpu.memory_space<vmem>>, vector<1x32xf32>
    %c0_30 = arith.constant 0 : index
    %c0_31 = arith.constant 0 : index
    %44 = vector.load %arg7[%c0_30, %c0_31] : memref<1x32xf32, #tpu.memory_space<vmem>>, vector<1x32xf32>
    %cst = arith.constant dense<0.000000e+00> : vector<8xf32>
    %45 = vector.multi_reduction <add>, %42, %cst [1] : vector<8x32xf32> to vector<8xf32>
    %46 = vector.shape_cast %45 : vector<8xf32> to vector<8x1xf32>
    %cst_32 = arith.constant 3.200000e+01 : f32
    %47 = vector.broadcast %cst_32 : f32 to vector<8x1xf32>
    %48 = arith.divf %46, %47 : vector<8x1xf32>
    %49 = vector.broadcast %48 : vector<8x1xf32> to vector<8x32xf32>
    %50 = arith.subf %42, %49 : vector<8x32xf32>
    %51 = arith.mulf %50, %50 : vector<8x32xf32>
    %cst_33 = arith.constant dense<0.000000e+00> : vector<8xf32>
    %52 = vector.multi_reduction <add>, %51, %cst_33 [1] : vector<8x32xf32> to vector<8xf32>
    %53 = vector.shape_cast %52 : vector<8xf32> to vector<8x1xf32>
    %cst_34 = arith.constant 3.200000e+01 : f32
    %54 = vector.broadcast %cst_34 : f32 to vector<8x1xf32>
    %55 = arith.divf %53, %54 : vector<8x1xf32>
    %56 = vector.broadcast %48 : vector<8x1xf32> to vector<8x32xf32>
    %57 = arith.subf %42, %56 : vector<8x32xf32>
    %cst_35 = arith.constant 9.99999996E-13 : f32
    %58 = vector.broadcast %cst_35 : f32 to vector<8x1xf32>
    %59 = arith.addf %55, %58 : vector<8x1xf32>
    %60 = math.rsqrt %59 : vector<8x1xf32>
    %61 = vector.broadcast %60 : vector<8x1xf32> to vector<8x32xf32>
    %62 = arith.mulf %57, %61 : vector<8x32xf32>
    %63 = vector.broadcast %43 : vector<1x32xf32> to vector<8x32xf32>
    %64 = arith.mulf %62, %63 : vector<8x32xf32>
    %65 = vector.broadcast %44 : vector<1x32xf32> to vector<8x32xf32>
    %66 = arith.addf %64, %65 : vector<8x32xf32>
    %67 = arith.truncf %66 : vector<8x32xf32> to vector<8x32xbf16>
    %68 = arith.truncf %66 : vector<8x32xf32> to vector<8x32xbf16>
    %c0_36 = arith.constant 0 : index
    %c0_37 = arith.constant 0 : index
    %69 = vector.load %arg8[%c0_36, %c0_37] : memref<32x32xbf16, #tpu.memory_space<vmem>>, vector<32x32xbf16>
    %cst_38 = arith.constant dense<0.000000e+00> : vector<8x32xf32>
    %70 = tpu.matmul %67, %69, %cst_38 {dimension_numbers = #tpu.dot_dimension_numbers<[1], [0], [0], [1], [0, 0, 1, 1], [], []>} : vector<8x32xbf16>, vector<32x32xbf16>, vector<8x32xf32> -> vector<8x32xf32>
    %c0_39 = arith.constant 0 : index
    %c0_40 = arith.constant 0 : index
    %71 = vector.load %arg9[%c0_39, %c0_40] : memref<32x32xbf16, #tpu.memory_space<vmem>>, vector<32x32xbf16>
    %cst_41 = arith.constant dense<0.000000e+00> : vector<8x32xf32>
    %72 = tpu.matmul %68, %71, %cst_41 {dimension_numbers = #tpu.dot_dimension_numbers<[1], [0], [0], [1], [0, 0, 1, 1], [], []>} : vector<8x32xbf16>, vector<32x32xbf16>, vector<8x32xf32> -> vector<8x32xf32>
    %c0_42 = arith.constant 0 : index
    %c0_43 = arith.constant 0 : index
    %73 = vector.load %arg10[%c0_42, %c0_43] : memref<32x32xbf16, #tpu.memory_space<vmem>>, vector<32x32xbf16>
    %cst_44 = arith.constant dense<0.000000e+00> : vector<8x32xf32>
    %74 = tpu.matmul %68, %73, %cst_44 {dimension_numbers = #tpu.dot_dimension_numbers<[1], [0], [0], [1], [0, 0, 1, 1], [], []>} : vector<8x32xbf16>, vector<32x32xbf16>, vector<8x32xf32> -> vector<8x32xf32>
    %75 = vector.extract_strided_slice %70 {offsets = [0, 0], sizes = [8, 8], strides = [1, 1]} : vector<8x32xf32> to vector<8x8xf32>
    %76 = vector.extract_strided_slice %72 {offsets = [0, 0], sizes = [8, 8], strides = [1, 1]} : vector<8x32xf32> to vector<8x8xf32>
    %77 = vector.extract_strided_slice %74 {offsets = [0, 0], sizes = [8, 8], strides = [1, 1]} : vector<8x32xf32> to vector<8x8xf32>
    %78 = arith.truncf %75 : vector<8x8xf32> to vector<8x8xbf16>
    %79 = arith.truncf %76 : vector<8x8xf32> to vector<8x8xbf16>
    %cst_45 = arith.constant dense<0.000000e+00> : vector<8x8xf32>
    %80 = tpu.matmul %78, %79, %cst_45 {dimension_numbers = #tpu.dot_dimension_numbers<[1], [1], [0], [0], [0, 0, 1, 0], [], []>} : vector<8x8xbf16>, vector<8x8xbf16>, vector<8x8xf32> -> vector<8x8xf32>
    %cst_46 = arith.constant dense<0xFF800000> : vector<8xf32>
    %81 = vector.multi_reduction <maximumf>, %80, %cst_46 [1] : vector<8x8xf32> to vector<8xf32>
    %82 = vector.shape_cast %81 : vector<8xf32> to vector<8x1xf32>
    %83 = vector.broadcast %82 : vector<8x1xf32> to vector<8x8xf32>
    %84 = arith.subf %80, %83 : vector<8x8xf32>
    %85 = math.exp %84 : vector<8x8xf32>
    %cst_47 = arith.constant dense<0.000000e+00> : vector<8xf32>
    %86 = vector.multi_reduction <add>, %85, %cst_47 [1] : vector<8x8xf32> to vector<8xf32>
    %87 = vector.shape_cast %86 : vector<8xf32> to vector<8x1xf32>
    %88 = tpu.reciprocal %87 {approx = true} : vector<8x1xf32> -> vector<8x1xf32>
    %89 = vector.broadcast %88 : vector<8x1xf32> to vector<8x8xf32>
    %90 = arith.mulf %85, %89 : vector<8x8xf32>
    %91 = arith.truncf %90 : vector<8x8xf32> to vector<8x8xbf16>
    %92 = arith.truncf %77 : vector<8x8xf32> to vector<8x8xbf16>
    %cst_48 = arith.constant dense<0.000000e+00> : vector<8x8xf32>
    %93 = tpu.matmul %91, %92, %cst_48 {dimension_numbers = #tpu.dot_dimension_numbers<[1], [0], [0], [1], [0, 0, 1, 1], [], []>} : vector<8x8xbf16>, vector<8x8xbf16>, vector<8x8xf32> -> vector<8x8xf32>
    %94 = vector.extract_strided_slice %70 {offsets = [0, 8], sizes = [8, 8], strides = [1, 1]} : vector<8x32xf32> to vector<8x8xf32>
    %95 = vector.extract_strided_slice %72 {offsets = [0, 8], sizes = [8, 8], strides = [1, 1]} : vector<8x32xf32> to vector<8x8xf32>
    %96 = vector.extract_strided_slice %74 {offsets = [0, 8], sizes = [8, 8], strides = [1, 1]} : vector<8x32xf32> to vector<8x8xf32>
    %97 = arith.truncf %94 : vector<8x8xf32> to vector<8x8xbf16>
    %98 = arith.truncf %95 : vector<8x8xf32> to vector<8x8xbf16>
    %cst_49 = arith.constant dense<0.000000e+00> : vector<8x8xf32>
    %99 = tpu.matmul %97, %98, %cst_49 {dimension_numbers = #tpu.dot_dimension_numbers<[1], [1], [0], [0], [0, 0, 1, 0], [], []>} : vector<8x8xbf16>, vector<8x8xbf16>, vector<8x8xf32> -> vector<8x8xf32>
    %cst_50 = arith.constant dense<0xFF800000> : vector<8xf32>
    %100 = vector.multi_reduction <maximumf>, %99, %cst_50 [1] : vector<8x8xf32> to vector<8xf32>
    %101 = vector.shape_cast %100 : vector<8xf32> to vector<8x1xf32>
    %102 = vector.broadcast %101 : vector<8x1xf32> to vector<8x8xf32>
    %103 = arith.subf %99, %102 : vector<8x8xf32>
    %104 = math.exp %103 : vector<8x8xf32>
    %cst_51 = arith.constant dense<0.000000e+00> : vector<8xf32>
    %105 = vector.multi_reduction <add>, %104, %cst_51 [1] : vector<8x8xf32> to vector<8xf32>
    %106 = vector.shape_cast %105 : vector<8xf32> to vector<8x1xf32>
    %107 = tpu.reciprocal %106 {approx = true} : vector<8x1xf32> -> vector<8x1xf32>
    %108 = vector.broadcast %107 : vector<8x1xf32> to vector<8x8xf32>
    %109 = arith.mulf %104, %108 : vector<8x8xf32>
    %110 = arith.truncf %109 : vector<8x8xf32> to vector<8x8xbf16>
    %111 = arith.truncf %96 : vector<8x8xf32> to vector<8x8xbf16>
    %cst_52 = arith.constant dense<0.000000e+00> : vector<8x8xf32>
    %112 = tpu.matmul %110, %111, %cst_52 {dimension_numbers = #tpu.dot_dimension_numbers<[1], [0], [0], [1], [0, 0, 1, 1], [], []>} : vector<8x8xbf16>, vector<8x8xbf16>, vector<8x8xf32> -> vector<8x8xf32>
    %113 = vector.extract_strided_slice %70 {offsets = [0, 16], sizes = [8, 8], strides = [1, 1]} : vector<8x32xf32> to vector<8x8xf32>
    %114 = vector.extract_strided_slice %72 {offsets = [0, 16], sizes = [8, 8], strides = [1, 1]} : vector<8x32xf32> to vector<8x8xf32>
    %115 = vector.extract_strided_slice %74 {offsets = [0, 16], sizes = [8, 8], strides = [1, 1]} : vector<8x32xf32> to vector<8x8xf32>
    %116 = arith.truncf %113 : vector<8x8xf32> to vector<8x8xbf16>
    %117 = arith.truncf %114 : vector<8x8xf32> to vector<8x8xbf16>
    %cst_53 = arith.constant dense<0.000000e+00> : vector<8x8xf32>
    %118 = tpu.matmul %116, %117, %cst_53 {dimension_numbers = #tpu.dot_dimension_numbers<[1], [1], [0], [0], [0, 0, 1, 0], [], []>} : vector<8x8xbf16>, vector<8x8xbf16>, vector<8x8xf32> -> vector<8x8xf32>
    %cst_54 = arith.constant dense<0xFF800000> : vector<8xf32>
    %119 = vector.multi_reduction <maximumf>, %118, %cst_54 [1] : vector<8x8xf32> to vector<8xf32>
    %120 = vector.shape_cast %119 : vector<8xf32> to vector<8x1xf32>
    %121 = vector.broadcast %120 : vector<8x1xf32> to vector<8x8xf32>
    %122 = arith.subf %118, %121 : vector<8x8xf32>
    %123 = math.exp %122 : vector<8x8xf32>
    %cst_55 = arith.constant dense<0.000000e+00> : vector<8xf32>
    %124 = vector.multi_reduction <add>, %123, %cst_55 [1] : vector<8x8xf32> to vector<8xf32>
    %125 = vector.shape_cast %124 : vector<8xf32> to vector<8x1xf32>
    %126 = tpu.reciprocal %125 {approx = true} : vector<8x1xf32> -> vector<8x1xf32>
    %127 = vector.broadcast %126 : vector<8x1xf32> to vector<8x8xf32>
    %128 = arith.mulf %123, %127 : vector<8x8xf32>
    %129 = arith.truncf %128 : vector<8x8xf32> to vector<8x8xbf16>
    %130 = arith.truncf %115 : vector<8x8xf32> to vector<8x8xbf16>
    %cst_56 = arith.constant dense<0.000000e+00> : vector<8x8xf32>
    %131 = tpu.matmul %129, %130, %cst_56 {dimension_numbers = #tpu.dot_dimension_numbers<[1], [0], [0], [1], [0, 0, 1, 1], [], []>} : vector<8x8xbf16>, vector<8x8xbf16>, vector<8x8xf32> -> vector<8x8xf32>
    %132 = vector.extract_strided_slice %70 {offsets = [0, 24], sizes = [8, 8], strides = [1, 1]} : vector<8x32xf32> to vector<8x8xf32>
    %133 = vector.extract_strided_slice %72 {offsets = [0, 24], sizes = [8, 8], strides = [1, 1]} : vector<8x32xf32> to vector<8x8xf32>
    %134 = vector.extract_strided_slice %74 {offsets = [0, 24], sizes = [8, 8], strides = [1, 1]} : vector<8x32xf32> to vector<8x8xf32>
    %135 = arith.truncf %132 : vector<8x8xf32> to vector<8x8xbf16>
    %136 = arith.truncf %133 : vector<8x8xf32> to vector<8x8xbf16>
    %cst_57 = arith.constant dense<0.000000e+00> : vector<8x8xf32>
    %137 = tpu.matmul %135, %136, %cst_57 {dimension_numbers = #tpu.dot_dimension_numbers<[1], [1], [0], [0], [0, 0, 1, 0], [], []>} : vector<8x8xbf16>, vector<8x8xbf16>, vector<8x8xf32> -> vector<8x8xf32>
    %cst_58 = arith.constant dense<0xFF800000> : vector<8xf32>
    %138 = vector.multi_reduction <maximumf>, %137, %cst_58 [1] : vector<8x8xf32> to vector<8xf32>
    %139 = vector.shape_cast %138 : vector<8xf32> to vector<8x1xf32>
    %140 = vector.broadcast %139 : vector<8x1xf32> to vector<8x8xf32>
    %141 = arith.subf %137, %140 : vector<8x8xf32>
    %142 = math.exp %141 : vector<8x8xf32>
    %cst_59 = arith.constant dense<0.000000e+00> : vector<8xf32>
    %143 = vector.multi_reduction <add>, %142, %cst_59 [1] : vector<8x8xf32> to vector<8xf32>
    %144 = vector.shape_cast %143 : vector<8xf32> to vector<8x1xf32>
    %145 = tpu.reciprocal %144 {approx = true} : vector<8x1xf32> -> vector<8x1xf32>
    %146 = vector.broadcast %145 : vector<8x1xf32> to vector<8x8xf32>
    %147 = arith.mulf %142, %146 : vector<8x8xf32>
    %148 = arith.truncf %147 : vector<8x8xf32> to vector<8x8xbf16>
    %149 = arith.truncf %134 : vector<8x8xf32> to vector<8x8xbf16>
    %cst_60 = arith.constant dense<0.000000e+00> : vector<8x8xf32>
    %150 = tpu.matmul %148, %149, %cst_60 {dimension_numbers = #tpu.dot_dimension_numbers<[1], [0], [0], [1], [0, 0, 1, 1], [], []>} : vector<8x8xbf16>, vector<8x8xbf16>, vector<8x8xf32> -> vector<8x8xf32>
    %151 = tpu.concatenate %93, %112, %131, %150 in 1 : vector<8x8xf32>, vector<8x8xf32>, vector<8x8xf32>, vector<8x8xf32> -> vector<8x32xf32>
    %152 = arith.truncf %151 : vector<8x32xf32> to vector<8x32xbf16>
    %c0_61 = arith.constant 0 : index
    %c0_62 = arith.constant 0 : index
    %153 = vector.load %arg11[%c0_61, %c0_62] : memref<32x32xbf16, #tpu.memory_space<vmem>>, vector<32x32xbf16>
    %cst_63 = arith.constant dense<0.000000e+00> : vector<8x32xf32>
    %154 = tpu.matmul %152, %153, %cst_63 {dimension_numbers = #tpu.dot_dimension_numbers<[1], [0], [0], [1], [0, 0, 1, 1], [], []>} : vector<8x32xbf16>, vector<32x32xbf16>, vector<8x32xf32> -> vector<8x32xf32>
    %c0_64 = arith.constant 0 : index
    %c0_65 = arith.constant 0 : index
    %155 = vector.load %arg12[%c0_64, %c0_65] : memref<1x32xf32, #tpu.memory_space<vmem>>, vector<1x32xf32>
    %156 = vector.broadcast %155 : vector<1x32xf32> to vector<8x32xf32>
    %157 = arith.addf %154, %156 : vector<8x32xf32>
    %158 = arith.addf %157, %66 : vector<8x32xf32>
    %c0_66 = arith.constant 0 : index
    %c0_67 = arith.constant 0 : index
    %159 = vector.load %arg13[%c0_66, %c0_67] : memref<1x32xf32, #tpu.memory_space<vmem>>, vector<1x32xf32>
    %c0_68 = arith.constant 0 : index
    %c0_69 = arith.constant 0 : index
    %160 = vector.load %arg14[%c0_68, %c0_69] : memref<1x32xf32, #tpu.memory_space<vmem>>, vector<1x32xf32>
    %cst_70 = arith.constant dense<0.000000e+00> : vector<8xf32>
    %161 = vector.multi_reduction <add>, %158, %cst_70 [1] : vector<8x32xf32> to vector<8xf32>
    %162 = vector.shape_cast %161 : vector<8xf32> to vector<8x1xf32>
    %cst_71 = arith.constant 3.200000e+01 : f32
    %163 = vector.broadcast %cst_71 : f32 to vector<8x1xf32>
    %164 = arith.divf %162, %163 : vector<8x1xf32>
    %165 = vector.broadcast %164 : vector<8x1xf32> to vector<8x32xf32>
    %166 = arith.subf %158, %165 : vector<8x32xf32>
    %167 = arith.mulf %166, %166 : vector<8x32xf32>
    %cst_72 = arith.constant dense<0.000000e+00> : vector<8xf32>
    %168 = vector.multi_reduction <add>, %167, %cst_72 [1] : vector<8x32xf32> to vector<8xf32>
    %169 = vector.shape_cast %168 : vector<8xf32> to vector<8x1xf32>
    %cst_73 = arith.constant 3.200000e+01 : f32
    %170 = vector.broadcast %cst_73 : f32 to vector<8x1xf32>
    %171 = arith.divf %169, %170 : vector<8x1xf32>
    %172 = vector.broadcast %164 : vector<8x1xf32> to vector<8x32xf32>
    %173 = arith.subf %158, %172 : vector<8x32xf32>
    %cst_74 = arith.constant 9.99999996E-13 : f32
    %174 = vector.broadcast %cst_74 : f32 to vector<8x1xf32>
    %175 = arith.addf %171, %174 : vector<8x1xf32>
    %176 = math.rsqrt %175 : vector<8x1xf32>
    %177 = vector.broadcast %176 : vector<8x1xf32> to vector<8x32xf32>
    %178 = arith.mulf %173, %177 : vector<8x32xf32>
    %179 = vector.broadcast %159 : vector<1x32xf32> to vector<8x32xf32>
    %180 = arith.mulf %178, %179 : vector<8x32xf32>
    %181 = vector.broadcast %160 : vector<1x32xf32> to vector<8x32xf32>
    %182 = arith.addf %180, %181 : vector<8x32xf32>
    %183 = arith.truncf %182 : vector<8x32xf32> to vector<8x32xbf16>
    %c0_75 = arith.constant 0 : index
    %c0_76 = arith.constant 0 : index
    %184 = vector.load %arg22[%c0_75, %c0_76] : memref<32x64xbf16, #tpu.memory_space<vmem>>, vector<32x64xbf16>
    %cst_77 = arith.constant dense<0.000000e+00> : vector<8x64xf32>
    %185 = tpu.matmul %183, %184, %cst_77 {dimension_numbers = #tpu.dot_dimension_numbers<[1], [0], [0], [1], [0, 0, 1, 1], [], []>} : vector<8x32xbf16>, vector<32x64xbf16>, vector<8x64xf32> -> vector<8x64xf32>
    %c0_78 = arith.constant 0 : index
    %c0_79 = arith.constant 0 : index
    %186 = vector.load %arg23[%c0_78, %c0_79] : memref<1x64xf32, #tpu.memory_space<vmem>>, vector<1x64xf32>
    %187 = vector.broadcast %186 : vector<1x64xf32> to vector<8x64xf32>
    %188 = arith.addf %185, %187 : vector<8x64xf32>
    %189 = arith.mulf %188, %188 : vector<8x64xf32>
    %190 = arith.mulf %188, %189 : vector<8x64xf32>
    %cst_80 = arith.constant 4.471500e-02 : f32
    %191 = vector.broadcast %cst_80 : f32 to vector<8x64xf32>
    %192 = arith.mulf %191, %190 : vector<8x64xf32>
    %193 = arith.addf %188, %192 : vector<8x64xf32>
    %cst_81 = arith.constant 0.797884583 : f32
    %194 = vector.broadcast %cst_81 : f32 to vector<8x64xf32>
    %195 = arith.mulf %194, %193 : vector<8x64xf32>
    %196 = math.tanh %195 : vector<8x64xf32>
    %cst_82 = arith.constant 1.000000e+00 : f32
    %197 = vector.broadcast %cst_82 : f32 to vector<8x64xf32>
    %198 = arith.addf %197, %196 : vector<8x64xf32>
    %cst_83 = arith.constant 5.000000e-01 : f32
    %199 = vector.broadcast %cst_83 : f32 to vector<8x64xf32>
    %200 = arith.mulf %199, %198 : vector<8x64xf32>
    %201 = arith.mulf %188, %200 : vector<8x64xf32>
    %202 = arith.truncf %201 : vector<8x64xf32> to vector<8x64xbf16>
    %c0_84 = arith.constant 0 : index
    %c0_85 = arith.constant 0 : index
    %203 = vector.load %arg24[%c0_84, %c0_85] : memref<64x32xbf16, #tpu.memory_space<vmem>>, vector<64x32xbf16>
    %cst_86 = arith.constant dense<0.000000e+00> : vector<8x32xf32>
    %204 = tpu.matmul %202, %203, %cst_86 {dimension_numbers = #tpu.dot_dimension_numbers<[1], [0], [0], [1], [0, 0, 1, 1], [], []>} : vector<8x64xbf16>, vector<64x32xbf16>, vector<8x32xf32> -> vector<8x32xf32>
    %c0_87 = arith.constant 0 : index
    %c0_88 = arith.constant 0 : index
    %205 = vector.load %arg25[%c0_87, %c0_88] : memref<1x32xf32, #tpu.memory_space<vmem>>, vector<1x32xf32>
    %206 = vector.broadcast %205 : vector<1x32xf32> to vector<8x32xf32>
    %207 = arith.addf %204, %206 : vector<8x32xf32>
    %208 = arith.addf %207, %182 : vector<8x32xf32>
    %c0_89 = arith.constant 0 : index
    %c0_90 = arith.constant 0 : index
    %209 = vector.load %arg26[%c0_89, %c0_90] : memref<1x32xf32, #tpu.memory_space<vmem>>, vector<1x32xf32>
    %c0_91 = arith.constant 0 : index
    %c0_92 = arith.constant 0 : index
    %210 = vector.load %arg27[%c0_91, %c0_92] : memref<1x32xf32, #tpu.memory_space<vmem>>, vector<1x32xf32>
    %cst_93 = arith.constant dense<0.000000e+00> : vector<8xf32>
    %211 = vector.multi_reduction <add>, %208, %cst_93 [1] : vector<8x32xf32> to vector<8xf32>
    %212 = vector.shape_cast %211 : vector<8xf32> to vector<8x1xf32>
    %cst_94 = arith.constant 3.200000e+01 : f32
    %213 = vector.broadcast %cst_94 : f32 to vector<8x1xf32>
    %214 = arith.divf %212, %213 : vector<8x1xf32>
    %215 = vector.broadcast %214 : vector<8x1xf32> to vector<8x32xf32>
    %216 = arith.subf %208, %215 : vector<8x32xf32>
    %217 = arith.mulf %216, %216 : vector<8x32xf32>
    %cst_95 = arith.constant dense<0.000000e+00> : vector<8xf32>
    %218 = vector.multi_reduction <add>, %217, %cst_95 [1] : vector<8x32xf32> to vector<8xf32>
    %219 = vector.shape_cast %218 : vector<8xf32> to vector<8x1xf32>
    %cst_96 = arith.constant 3.200000e+01 : f32
    %220 = vector.broadcast %cst_96 : f32 to vector<8x1xf32>
    %221 = arith.divf %219, %220 : vector<8x1xf32>
    %222 = vector.broadcast %214 : vector<8x1xf32> to vector<8x32xf32>
    %223 = arith.subf %208, %222 : vector<8x32xf32>
    %cst_97 = arith.constant 9.99999996E-13 : f32
    %224 = vector.broadcast %cst_97 : f32 to vector<8x1xf32>
    %225 = arith.addf %221, %224 : vector<8x1xf32>
    %226 = math.rsqrt %225 : vector<8x1xf32>
    %227 = vector.broadcast %226 : vector<8x1xf32> to vector<8x32xf32>
    %228 = arith.mulf %223, %227 : vector<8x32xf32>
    %229 = vector.broadcast %209 : vector<1x32xf32> to vector<8x32xf32>
    %230 = arith.mulf %228, %229 : vector<8x32xf32>
    %231 = vector.broadcast %210 : vector<1x32xf32> to vector<8x32xf32>
    %232 = arith.addf %230, %231 : vector<8x32xf32>
    %233 = arith.index_cast %arg0 : i32 to index
    %c0_98 = arith.constant 0 : index
    %234 = memref.load %arg2[%233, %c0_98] : memref<2x8xi32, #tpu.memory_space<smem>>
    %235 = arith.index_cast %234 : i32 to index
    %c0_99 = arith.constant 0 : index
    %236 = vector.load %arg3[%235, %c0_99] : memref<64x32xf32, #tpu.memory_space<vmem>>, vector<1x32xf32>
    %c0_100 = arith.constant 0 : index
    %c0_101 = arith.constant 0 : index
    %237 = vector.load %arg30[%c0_100, %c0_101] : memref<8x32xf32, #tpu.memory_space<vmem>>, vector<1x32xf32>
    tpu.vector_store %arg30[%c0_100, %c0_101], %236 {strides = array<i32>} : memref<8x32xf32, #tpu.memory_space<vmem>>, vector<1x32xf32>,
    %238 = arith.index_cast %arg0 : i32 to index
    %c1_102 = arith.constant 1 : index
    %239 = memref.load %arg2[%238, %c1_102] : memref<2x8xi32, #tpu.memory_space<smem>>
    %240 = arith.index_cast %239 : i32 to index
    %c0_103 = arith.constant 0 : index
    %241 = vector.load %arg3[%240, %c0_103] : memref<64x32xf32, #tpu.memory_space<vmem>>, vector<1x32xf32>
    %c1_104 = arith.constant 1 : index
    %c0_105 = arith.constant 0 : index
    %242 = vector.load %arg30[%c1_104, %c0_105] : memref<8x32xf32, #tpu.memory_space<vmem>>, vector<1x32xf32>
    tpu.vector_store %arg30[%c1_104, %c0_105], %241 {strides = array<i32>} : memref<8x32xf32, #tpu.memory_space<vmem>>, vector<1x32xf32>,
    %243 = arith.index_cast %arg0 : i32 to index
    %c2_106 = arith.constant 2 : index
    %244 = memref.load %arg2[%243, %c2_106] : memref<2x8xi32, #tpu.memory_space<smem>>
    %245 = arith.index_cast %244 : i32 to index
    %c0_107 = arith.constant 0 : index
    %246 = vector.load %arg3[%245, %c0_107] : memref<64x32xf32, #tpu.memory_space<vmem>>, vector<1x32xf32>
    %c2_108 = arith.constant 2 : index
    %c0_109 = arith.constant 0 : index
    %247 = vector.load %arg30[%c2_108, %c0_109] : memref<8x32xf32, #tpu.memory_space<vmem>>, vector<1x32xf32>
    tpu.vector_store %arg30[%c2_108, %c0_109], %246 {strides = array<i32>} : memref<8x32xf32, #tpu.memory_space<vmem>>, vector<1x32xf32>,
    %248 = arith.index_cast %arg0 : i32 to index
    %c3_110 = arith.constant 3 : index
    %249 = memref.load %arg2[%248, %c3_110] : memref<2x8xi32, #tpu.memory_space<smem>>
    %250 = arith.index_cast %249 : i32 to index
    %c0_111 = arith.constant 0 : index
    %251 = vector.load %arg3[%250, %c0_111] : memref<64x32xf32, #tpu.memory_space<vmem>>, vector<1x32xf32>
    %c3_112 = arith.constant 3 : index
    %c0_113 = arith.constant 0 : index
    %252 = vector.load %arg30[%c3_112, %c0_113] : memref<8x32xf32, #tpu.memory_space<vmem>>, vector<1x32xf32>
    tpu.vector_store %arg30[%c3_112, %c0_113], %251 {strides = array<i32>} : memref<8x32xf32, #tpu.memory_space<vmem>>, vector<1x32xf32>,
    %253 = arith.index_cast %arg0 : i32 to index
    %c4_114 = arith.constant 4 : index
    %254 = memref.load %arg2[%253, %c4_114] : memref<2x8xi32, #tpu.memory_space<smem>>
    %255 = arith.index_cast %254 : i32 to index
    %c0_115 = arith.constant 0 : index
    %256 = vector.load %arg3[%255, %c0_115] : memref<64x32xf32, #tpu.memory_space<vmem>>, vector<1x32xf32>
    %c4_116 = arith.constant 4 : index
    %c0_117 = arith.constant 0 : index
    %257 = vector.load %arg30[%c4_116, %c0_117] : memref<8x32xf32, #tpu.memory_space<vmem>>, vector<1x32xf32>
    tpu.vector_store %arg30[%c4_116, %c0_117], %256 {strides = array<i32>} : memref<8x32xf32, #tpu.memory_space<vmem>>, vector<1x32xf32>,
    %258 = arith.index_cast %arg0 : i32 to index
    %c5_118 = arith.constant 5 : index
    %259 = memref.load %arg2[%258, %c5_118] : memref<2x8xi32, #tpu.memory_space<smem>>
    %260 = arith.index_cast %259 : i32 to index
    %c0_119 = arith.constant 0 : index
    %261 = vector.load %arg3[%260, %c0_119] : memref<64x32xf32, #tpu.memory_space<vmem>>, vector<1x32xf32>
    %c5_120 = arith.constant 5 : index
    %c0_121 = arith.constant 0 : index
    %262 = vector.load %arg30[%c5_120, %c0_121] : memref<8x32xf32, #tpu.memory_space<vmem>>, vector<1x32xf32>
    tpu.vector_store %arg30[%c5_120, %c0_121], %261 {strides = array<i32>} : memref<8x32xf32, #tpu.memory_space<vmem>>, vector<1x32xf32>,
    %263 = arith.index_cast %arg0 : i32 to index
    %c6_122 = arith.constant 6 : index
    %264 = memref.load %arg2[%263, %c6_122] : memref<2x8xi32, #tpu.memory_space<smem>>
    %265 = arith.index_cast %264 : i32 to index
    %c0_123 = arith.constant 0 : index
    %266 = vector.load %arg3[%265, %c0_123] : memref<64x32xf32, #tpu.memory_space<vmem>>, vector<1x32xf32>
    %c6_124 = arith.constant 6 : index
    %c0_125 = arith.constant 0 : index
    %267 = vector.load %arg30[%c6_124, %c0_125] : memref<8x32xf32, #tpu.memory_space<vmem>>, vector<1x32xf32>
    tpu.vector_store %arg30[%c6_124, %c0_125], %266 {strides = array<i32>} : memref<8x32xf32, #tpu.memory_space<vmem>>, vector<1x32xf32>,
    %268 = arith.index_cast %arg0 : i32 to index
    %c7_126 = arith.constant 7 : index
    %269 = memref.load %arg2[%268, %c7_126] : memref<2x8xi32, #tpu.memory_space<smem>>
    %270 = arith.index_cast %269 : i32 to index
    %c0_127 = arith.constant 0 : index
    %271 = vector.load %arg3[%270, %c0_127] : memref<64x32xf32, #tpu.memory_space<vmem>>, vector<1x32xf32>
    %c7_128 = arith.constant 7 : index
    %c0_129 = arith.constant 0 : index
    %272 = vector.load %arg30[%c7_128, %c0_129] : memref<8x32xf32, #tpu.memory_space<vmem>>, vector<1x32xf32>
    tpu.vector_store %arg30[%c7_128, %c0_129], %271 {strides = array<i32>} : memref<8x32xf32, #tpu.memory_space<vmem>>, vector<1x32xf32>,
    %c0_130 = arith.constant 0 : index
    %c0_131 = arith.constant 0 : index
    %273 = vector.load %arg30[%c0_130, %c0_131] : memref<8x32xf32, #tpu.memory_space<vmem>>, vector<8x32xf32>
    %c0_132 = arith.constant 0 : index
    %c0_133 = arith.constant 0 : index
    %274 = vector.load %arg5[%c0_132, %c0_133] : memref<8x32xf32, #tpu.memory_space<vmem>>, vector<8x32xf32>
    %275 = arith.addf %273, %274 : vector<8x32xf32>
    %c0_134 = arith.constant 0 : index
    %c0_135 = arith.constant 0 : index
    %276 = vector.load %arg6[%c0_134, %c0_135] : memref<1x32xf32, #tpu.memory_space<vmem>>, vector<1x32xf32>
    %c0_136 = arith.constant 0 : index
    %c0_137 = arith.constant 0 : index
    %277 = vector.load %arg7[%c0_136, %c0_137] : memref<1x32xf32, #tpu.memory_space<vmem>>, vector<1x32xf32>
    %cst_138 = arith.constant dense<0.000000e+00> : vector<8xf32>
    %278 = vector.multi_reduction <add>, %275, %cst_138 [1] : vector<8x32xf32> to vector<8xf32>
    %279 = vector.shape_cast %278 : vector<8xf32> to vector<8x1xf32>
    %cst_139 = arith.constant 3.200000e+01 : f32
    %280 = vector.broadcast %cst_139 : f32 to vector<8x1xf32>
    %281 = arith.divf %279, %280 : vector<8x1xf32>
    %282 = vector.broadcast %281 : vector<8x1xf32> to vector<8x32xf32>
    %283 = arith.subf %275, %282 : vector<8x32xf32>
    %284 = arith.mulf %283, %283 : vector<8x32xf32>
    %cst_140 = arith.constant dense<0.000000e+00> : vector<8xf32>
    %285 = vector.multi_reduction <add>, %284, %cst_140 [1] : vector<8x32xf32> to vector<8xf32>
    %286 = vector.shape_cast %285 : vector<8xf32> to vector<8x1xf32>
    %cst_141 = arith.constant 3.200000e+01 : f32
    %287 = vector.broadcast %cst_141 : f32 to vector<8x1xf32>
    %288 = arith.divf %286, %287 : vector<8x1xf32>
    %289 = vector.broadcast %281 : vector<8x1xf32> to vector<8x32xf32>
    %290 = arith.subf %275, %289 : vector<8x32xf32>
    %cst_142 = arith.constant 9.99999996E-13 : f32
    %291 = vector.broadcast %cst_142 : f32 to vector<8x1xf32>
    %292 = arith.addf %288, %291 : vector<8x1xf32>
    %293 = math.rsqrt %292 : vector<8x1xf32>
    %294 = vector.broadcast %293 : vector<8x1xf32> to vector<8x32xf32>
    %295 = arith.mulf %290, %294 : vector<8x32xf32>
    %296 = vector.broadcast %276 : vector<1x32xf32> to vector<8x32xf32>
    %297 = arith.mulf %295, %296 : vector<8x32xf32>
    %298 = vector.broadcast %277 : vector<1x32xf32> to vector<8x32xf32>
    %299 = arith.addf %297, %298 : vector<8x32xf32>
    %300 = arith.truncf %299 : vector<8x32xf32> to vector<8x32xbf16>
    %301 = arith.truncf %299 : vector<8x32xf32> to vector<8x32xbf16>
    %c0_143 = arith.constant 0 : index
    %c0_144 = arith.constant 0 : index
    %302 = vector.load %arg8[%c0_143, %c0_144] : memref<32x32xbf16, #tpu.memory_space<vmem>>, vector<32x32xbf16>
    %cst_145 = arith.constant dense<0.000000e+00> : vector<8x32xf32>
    %303 = tpu.matmul %300, %302, %cst_145 {dimension_numbers = #tpu.dot_dimension_numbers<[1], [0], [0], [1], [0, 0, 1, 1], [], []>} : vector<8x32xbf16>, vector<32x32xbf16>, vector<8x32xf32> -> vector<8x32xf32>
    %c0_146 = arith.constant 0 : index
    %c0_147 = arith.constant 0 : index
    %304 = vector.load %arg9[%c0_146, %c0_147] : memref<32x32xbf16, #tpu.memory_space<vmem>>, vector<32x32xbf16>
    %cst_148 = arith.constant dense<0.000000e+00> : vector<8x32xf32>
    %305 = tpu.matmul %301, %304, %cst_148 {dimension_numbers = #tpu.dot_dimension_numbers<[1], [0], [0], [1], [0, 0, 1, 1], [], []>} : vector<8x32xbf16>, vector<32x32xbf16>, vector<8x32xf32> -> vector<8x32xf32>
    %c0_149 = arith.constant 0 : index
    %c0_150 = arith.constant 0 : index
    %306 = vector.load %arg10[%c0_149, %c0_150] : memref<32x32xbf16, #tpu.memory_space<vmem>>, vector<32x32xbf16>
    %cst_151 = arith.constant dense<0.000000e+00> : vector<8x32xf32>
    %307 = tpu.matmul %301, %306, %cst_151 {dimension_numbers = #tpu.dot_dimension_numbers<[1], [0], [0], [1], [0, 0, 1, 1], [], []>} : vector<8x32xbf16>, vector<32x32xbf16>, vector<8x32xf32> -> vector<8x32xf32>
    %308 = tpu.iota {dimensions = array<i32: 0>} : vector<8x8xi32>
    %309 = tpu.iota {dimensions = array<i32: 1>} : vector<8x8xi32>
    %310 = arith.cmpi sle, %309, %308 : vector<8x8xi32>
    %cst_152 = arith.constant 0.000000e+00 : f32
    %cst_153 = arith.constant -1.000000e+30 : f32
    %311 = vector.broadcast %cst_152 : f32 to vector<8x8xf32>
    %312 = vector.broadcast %cst_153 : f32 to vector<8x8xf32>
    %313 = arith.select %310, %311, %312 : vector<8x8xi1>, vector<8x8xf32>
    %314 = vector.extract_strided_slice %303 {offsets = [0, 0], sizes = [8, 8], strides = [1, 1]} : vector<8x32xf32> to vector<8x8xf32>
    %315 = vector.extract_strided_slice %305 {offsets = [0, 0], sizes = [8, 8], strides = [1, 1]} : vector<8x32xf32> to vector<8x8xf32>
    %316 = vector.extract_strided_slice %307 {offsets = [0, 0], sizes = [8, 8], strides = [1, 1]} : vector<8x32xf32> to vector<8x8xf32>
    %317 = arith.truncf %314 : vector<8x8xf32> to vector<8x8xbf16>
    %318 = arith.truncf %315 : vector<8x8xf32> to vector<8x8xbf16>
    %cst_154 = arith.constant dense<0.000000e+00> : vector<8x8xf32>
    %319 = tpu.matmul %317, %318, %cst_154 {dimension_numbers = #tpu.dot_dimension_numbers<[1], [1], [0], [0], [0, 0, 1, 0], [], []>} : vector<8x8xbf16>, vector<8x8xbf16>, vector<8x8xf32> -> vector<8x8xf32>
    %320 = arith.addf %319, %313 : vector<8x8xf32>
    %cst_155 = arith.constant dense<0xFF800000> : vector<8xf32>
    %321 = vector.multi_reduction <maximumf>, %320, %cst_155 [1] : vector<8x8xf32> to vector<8xf32>
    %322 = vector.shape_cast %321 : vector<8xf32> to vector<8x1xf32>
    %323 = vector.broadcast %322 : vector<8x1xf32> to vector<8x8xf32>
    %324 = arith.subf %320, %323 : vector<8x8xf32>
    %325 = math.exp %324 : vector<8x8xf32>
    %cst_156 = arith.constant dense<0.000000e+00> : vector<8xf32>
    %326 = vector.multi_reduction <add>, %325, %cst_156 [1] : vector<8x8xf32> to vector<8xf32>
    %327 = vector.shape_cast %326 : vector<8xf32> to vector<8x1xf32>
    %328 = tpu.reciprocal %327 {approx = true} : vector<8x1xf32> -> vector<8x1xf32>
    %329 = vector.broadcast %328 : vector<8x1xf32> to vector<8x8xf32>
    %330 = arith.mulf %325, %329 : vector<8x8xf32>
    %331 = arith.truncf %330 : vector<8x8xf32> to vector<8x8xbf16>
    %332 = arith.truncf %316 : vector<8x8xf32> to vector<8x8xbf16>
    %cst_157 = arith.constant dense<0.000000e+00> : vector<8x8xf32>
    %333 = tpu.matmul %331, %332, %cst_157 {dimension_numbers = #tpu.dot_dimension_numbers<[1], [0], [0], [1], [0, 0, 1, 1], [], []>} : vector<8x8xbf16>, vector<8x8xbf16>, vector<8x8xf32> -> vector<8x8xf32>
    %334 = vector.extract_strided_slice %303 {offsets = [0, 8], sizes = [8, 8], strides = [1, 1]} : vector<8x32xf32> to vector<8x8xf32>
    %335 = vector.extract_strided_slice %305 {offsets = [0, 8], sizes = [8, 8], strides = [1, 1]} : vector<8x32xf32> to vector<8x8xf32>
    %336 = vector.extract_strided_slice %307 {offsets = [0, 8], sizes = [8, 8], strides = [1, 1]} : vector<8x32xf32> to vector<8x8xf32>
    %337 = arith.truncf %334 : vector<8x8xf32> to vector<8x8xbf16>
    %338 = arith.truncf %335 : vector<8x8xf32> to vector<8x8xbf16>
    %cst_158 = arith.constant dense<0.000000e+00> : vector<8x8xf32>
    %339 = tpu.matmul %337, %338, %cst_158 {dimension_numbers = #tpu.dot_dimension_numbers<[1], [1], [0], [0], [0, 0, 1, 0], [], []>} : vector<8x8xbf16>, vector<8x8xbf16>, vector<8x8xf32> -> vector<8x8xf32>
    %340 = arith.addf %339, %313 : vector<8x8xf32>
    %cst_159 = arith.constant dense<0xFF800000> : vector<8xf32>
    %341 = vector.multi_reduction <maximumf>, %340, %cst_159 [1] : vector<8x8xf32> to vector<8xf32>
    %342 = vector.shape_cast %341 : vector<8xf32> to vector<8x1xf32>
    %343 = vector.broadcast %342 : vector<8x1xf32> to vector<8x8xf32>
    %344 = arith.subf %340, %343 : vector<8x8xf32>
    %345 = math.exp %344 : vector<8x8xf32>
    %cst_160 = arith.constant dense<0.000000e+00> : vector<8xf32>
    %346 = vector.multi_reduction <add>, %345, %cst_160 [1] : vector<8x8xf32> to vector<8xf32>
    %347 = vector.shape_cast %346 : vector<8xf32> to vector<8x1xf32>
    %348 = tpu.reciprocal %347 {approx = true} : vector<8x1xf32> -> vector<8x1xf32>
    %349 = vector.broadcast %348 : vector<8x1xf32> to vector<8x8xf32>
    %350 = arith.mulf %345, %349 : vector<8x8xf32>
    %351 = arith.truncf %350 : vector<8x8xf32> to vector<8x8xbf16>
    %352 = arith.truncf %336 : vector<8x8xf32> to vector<8x8xbf16>
    %cst_161 = arith.constant dense<0.000000e+00> : vector<8x8xf32>
    %353 = tpu.matmul %351, %352, %cst_161 {dimension_numbers = #tpu.dot_dimension_numbers<[1], [0], [0], [1], [0, 0, 1, 1], [], []>} : vector<8x8xbf16>, vector<8x8xbf16>, vector<8x8xf32> -> vector<8x8xf32>
    %354 = vector.extract_strided_slice %303 {offsets = [0, 16], sizes = [8, 8], strides = [1, 1]} : vector<8x32xf32> to vector<8x8xf32>
    %355 = vector.extract_strided_slice %305 {offsets = [0, 16], sizes = [8, 8], strides = [1, 1]} : vector<8x32xf32> to vector<8x8xf32>
    %356 = vector.extract_strided_slice %307 {offsets = [0, 16], sizes = [8, 8], strides = [1, 1]} : vector<8x32xf32> to vector<8x8xf32>
    %357 = arith.truncf %354 : vector<8x8xf32> to vector<8x8xbf16>
    %358 = arith.truncf %355 : vector<8x8xf32> to vector<8x8xbf16>
    %cst_162 = arith.constant dense<0.000000e+00> : vector<8x8xf32>
    %359 = tpu.matmul %357, %358, %cst_162 {dimension_numbers = #tpu.dot_dimension_numbers<[1], [1], [0], [0], [0, 0, 1, 0], [], []>} : vector<8x8xbf16>, vector<8x8xbf16>, vector<8x8xf32> -> vector<8x8xf32>
    %360 = arith.addf %359, %313 : vector<8x8xf32>
    %cst_163 = arith.constant dense<0xFF800000> : vector<8xf32>
    %361 = vector.multi_reduction <maximumf>, %360, %cst_163 [1] : vector<8x8xf32> to vector<8xf32>
    %362 = vector.shape_cast %361 : vector<8xf32> to vector<8x1xf32>
    %363 = vector.broadcast %362 : vector<8x1xf32> to vector<8x8xf32>
    %364 = arith.subf %360, %363 : vector<8x8xf32>
    %365 = math.exp %364 : vector<8x8xf32>
    %cst_164 = arith.constant dense<0.000000e+00> : vector<8xf32>
    %366 = vector.multi_reduction <add>, %365, %cst_164 [1] : vector<8x8xf32> to vector<8xf32>
    %367 = vector.shape_cast %366 : vector<8xf32> to vector<8x1xf32>
    %368 = tpu.reciprocal %367 {approx = true} : vector<8x1xf32> -> vector<8x1xf32>
    %369 = vector.broadcast %368 : vector<8x1xf32> to vector<8x8xf32>
    %370 = arith.mulf %365, %369 : vector<8x8xf32>
    %371 = arith.truncf %370 : vector<8x8xf32> to vector<8x8xbf16>
    %372 = arith.truncf %356 : vector<8x8xf32> to vector<8x8xbf16>
    %cst_165 = arith.constant dense<0.000000e+00> : vector<8x8xf32>
    %373 = tpu.matmul %371, %372, %cst_165 {dimension_numbers = #tpu.dot_dimension_numbers<[1], [0], [0], [1], [0, 0, 1, 1], [], []>} : vector<8x8xbf16>, vector<8x8xbf16>, vector<8x8xf32> -> vector<8x8xf32>
    %374 = vector.extract_strided_slice %303 {offsets = [0, 24], sizes = [8, 8], strides = [1, 1]} : vector<8x32xf32> to vector<8x8xf32>
    %375 = vector.extract_strided_slice %305 {offsets = [0, 24], sizes = [8, 8], strides = [1, 1]} : vector<8x32xf32> to vector<8x8xf32>
    %376 = vector.extract_strided_slice %307 {offsets = [0, 24], sizes = [8, 8], strides = [1, 1]} : vector<8x32xf32> to vector<8x8xf32>
    %377 = arith.truncf %374 : vector<8x8xf32> to vector<8x8xbf16>
    %378 = arith.truncf %375 : vector<8x8xf32> to vector<8x8xbf16>
    %cst_166 = arith.constant dense<0.000000e+00> : vector<8x8xf32>
    %379 = tpu.matmul %377, %378, %cst_166 {dimension_numbers = #tpu.dot_dimension_numbers<[1], [1], [0], [0], [0, 0, 1, 0], [], []>} : vector<8x8xbf16>, vector<8x8xbf16>, vector<8x8xf32> -> vector<8x8xf32>
    %380 = arith.addf %379, %313 : vector<8x8xf32>
    %cst_167 = arith.constant dense<0xFF800000> : vector<8xf32>
    %381 = vector.multi_reduction <maximumf>, %380, %cst_167 [1] : vector<8x8xf32> to vector<8xf32>
    %382 = vector.shape_cast %381 : vector<8xf32> to vector<8x1xf32>
    %383 = vector.broadcast %382 : vector<8x1xf32> to vector<8x8xf32>
    %384 = arith.subf %380, %383 : vector<8x8xf32>
    %385 = math.exp %384 : vector<8x8xf32>
    %cst_168 = arith.constant dense<0.000000e+00> : vector<8xf32>
    %386 = vector.multi_reduction <add>, %385, %cst_168 [1] : vector<8x8xf32> to vector<8xf32>
    %387 = vector.shape_cast %386 : vector<8xf32> to vector<8x1xf32>
    %388 = tpu.reciprocal %387 {approx = true} : vector<8x1xf32> -> vector<8x1xf32>
    %389 = vector.broadcast %388 : vector<8x1xf32> to vector<8x8xf32>
    %390 = arith.mulf %385, %389 : vector<8x8xf32>
    %391 = arith.truncf %390 : vector<8x8xf32> to vector<8x8xbf16>
    %392 = arith.truncf %376 : vector<8x8xf32> to vector<8x8xbf16>
    %cst_169 = arith.constant dense<0.000000e+00> : vector<8x8xf32>
    %393 = tpu.matmul %391, %392, %cst_169 {dimension_numbers = #tpu.dot_dimension_numbers<[1], [0], [0], [1], [0, 0, 1, 1], [], []>} : vector<8x8xbf16>, vector<8x8xbf16>, vector<8x8xf32> -> vector<8x8xf32>
    %394 = tpu.concatenate %333, %353, %373, %393 in 1 : vector<8x8xf32>, vector<8x8xf32>, vector<8x8xf32>, vector<8x8xf32> -> vector<8x32xf32>
    %395 = arith.truncf %394 : vector<8x32xf32> to vector<8x32xbf16>
    %c0_170 = arith.constant 0 : index
    %c0_171 = arith.constant 0 : index
    %396 = vector.load %arg11[%c0_170, %c0_171] : memref<32x32xbf16, #tpu.memory_space<vmem>>, vector<32x32xbf16>
    %cst_172 = arith.constant dense<0.000000e+00> : vector<8x32xf32>
    %397 = tpu.matmul %395, %396, %cst_172 {dimension_numbers = #tpu.dot_dimension_numbers<[1], [0], [0], [1], [0, 0, 1, 1], [], []>} : vector<8x32xbf16>, vector<32x32xbf16>, vector<8x32xf32> -> vector<8x32xf32>
    %c0_173 = arith.constant 0 : index
    %c0_174 = arith.constant 0 : index
    %398 = vector.load %arg12[%c0_173, %c0_174] : memref<1x32xf32, #tpu.memory_space<vmem>>, vector<1x32xf32>
    %399 = vector.broadcast %398 : vector<1x32xf32> to vector<8x32xf32>
    %400 = arith.addf %397, %399 : vector<8x32xf32>
    %401 = arith.addf %400, %299 : vector<8x32xf32>
    %c0_175 = arith.constant 0 : index
    %c0_176 = arith.constant 0 : index
    %402 = vector.load %arg13[%c0_175, %c0_176] : memref<1x32xf32, #tpu.memory_space<vmem>>, vector<1x32xf32>
    %c0_177 = arith.constant 0 : index
    %c0_178 = arith.constant 0 : index
    %403 = vector.load %arg14[%c0_177, %c0_178] : memref<1x32xf32, #tpu.memory_space<vmem>>, vector<1x32xf32>
    %cst_179 = arith.constant dense<0.000000e+00> : vector<8xf32>
    %404 = vector.multi_reduction <add>, %401, %cst_179 [1] : vector<8x32xf32> to vector<8xf32>
    %405 = vector.shape_cast %404 : vector<8xf32> to vector<8x1xf32>
    %cst_180 = arith.constant 3.200000e+01 : f32
    %406 = vector.broadcast %cst_180 : f32 to vector<8x1xf32>
    %407 = arith.divf %405, %406 : vector<8x1xf32>
    %408 = vector.broadcast %407 : vector<8x1xf32> to vector<8x32xf32>
    %409 = arith.subf %401, %408 : vector<8x32xf32>
    %410 = arith.mulf %409, %409 : vector<8x32xf32>
    %cst_181 = arith.constant dense<0.000000e+00> : vector<8xf32>
    %411 = vector.multi_reduction <add>, %410, %cst_181 [1] : vector<8x32xf32> to vector<8xf32>
    %412 = vector.shape_cast %411 : vector<8xf32> to vector<8x1xf32>
    %cst_182 = arith.constant 3.200000e+01 : f32
    %413 = vector.broadcast %cst_182 : f32 to vector<8x1xf32>
    %414 = arith.divf %412, %413 : vector<8x1xf32>
    %415 = vector.broadcast %407 : vector<8x1xf32> to vector<8x32xf32>
    %416 = arith.subf %401, %415 : vector<8x32xf32>
    %cst_183 = arith.constant 9.99999996E-13 : f32
    %417 = vector.broadcast %cst_183 : f32 to vector<8x1xf32>
    %418 = arith.addf %414, %417 : vector<8x1xf32>
    %419 = math.rsqrt %418 : vector<8x1xf32>
    %420 = vector.broadcast %419 : vector<8x1xf32> to vector<8x32xf32>
    %421 = arith.mulf %416, %420 : vector<8x32xf32>
    %422 = vector.broadcast %402 : vector<1x32xf32> to vector<8x32xf32>
    %423 = arith.mulf %421, %422 : vector<8x32xf32>
    %424 = vector.broadcast %403 : vector<1x32xf32> to vector<8x32xf32>
    %425 = arith.addf %423, %424 : vector<8x32xf32>
    %426 = arith.truncf %425 : vector<8x32xf32> to vector<8x32xbf16>
    %427 = arith.truncf %232 : vector<8x32xf32> to vector<8x32xbf16>
    %c0_184 = arith.constant 0 : index
    %c0_185 = arith.constant 0 : index
    %428 = vector.load %arg15[%c0_184, %c0_185] : memref<32x32xbf16, #tpu.memory_space<vmem>>, vector<32x32xbf16>
    %cst_186 = arith.constant dense<0.000000e+00> : vector<8x32xf32>
    %429 = tpu.matmul %426, %428, %cst_186 {dimension_numbers = #tpu.dot_dimension_numbers<[1], [0], [0], [1], [0, 0, 1, 1], [], []>} : vector<8x32xbf16>, vector<32x32xbf16>, vector<8x32xf32> -> vector<8x32xf32>
    %c0_187 = arith.constant 0 : index
    %c0_188 = arith.constant 0 : index
    %430 = vector.load %arg16[%c0_187, %c0_188] : memref<32x32xbf16, #tpu.memory_space<vmem>>, vector<32x32xbf16>
    %cst_189 = arith.constant dense<0.000000e+00> : vector<8x32xf32>
    %431 = tpu.matmul %427, %430, %cst_189 {dimension_numbers = #tpu.dot_dimension_numbers<[1], [0], [0], [1], [0, 0, 1, 1], [], []>} : vector<8x32xbf16>, vector<32x32xbf16>, vector<8x32xf32> -> vector<8x32xf32>
    %c0_190 = arith.constant 0 : index
    %c0_191 = arith.constant 0 : index
    %432 = vector.load %arg17[%c0_190, %c0_191] : memref<32x32xbf16, #tpu.memory_space<vmem>>, vector<32x32xbf16>
    %cst_192 = arith.constant dense<0.000000e+00> : vector<8x32xf32>
    %433 = tpu.matmul %427, %432, %cst_192 {dimension_numbers = #tpu.dot_dimension_numbers<[1], [0], [0], [1], [0, 0, 1, 1], [], []>} : vector<8x32xbf16>, vector<32x32xbf16>, vector<8x32xf32> -> vector<8x32xf32>
    %434 = vector.extract_strided_slice %429 {offsets = [0, 0], sizes = [8, 8], strides = [1, 1]} : vector<8x32xf32> to vector<8x8xf32>
    %435 = vector.extract_strided_slice %431 {offsets = [0, 0], sizes = [8, 8], strides = [1, 1]} : vector<8x32xf32> to vector<8x8xf32>
    %436 = vector.extract_strided_slice %433 {offsets = [0, 0], sizes = [8, 8], strides = [1, 1]} : vector<8x32xf32> to vector<8x8xf32>
    %437 = arith.truncf %434 : vector<8x8xf32> to vector<8x8xbf16>
    %438 = arith.truncf %435 : vector<8x8xf32> to vector<8x8xbf16>
    %cst_193 = arith.constant dense<0.000000e+00> : vector<8x8xf32>
    %439 = tpu.matmul %437, %438, %cst_193 {dimension_numbers = #tpu.dot_dimension_numbers<[1], [1], [0], [0], [0, 0, 1, 0], [], []>} : vector<8x8xbf16>, vector<8x8xbf16>, vector<8x8xf32> -> vector<8x8xf32>
    %cst_194 = arith.constant dense<0xFF800000> : vector<8xf32>
    %440 = vector.multi_reduction <maximumf>, %439, %cst_194 [1] : vector<8x8xf32> to vector<8xf32>
    %441 = vector.shape_cast %440 : vector<8xf32> to vector<8x1xf32>
    %442 = vector.broadcast %441 : vector<8x1xf32> to vector<8x8xf32>
    %443 = arith.subf %439, %442 : vector<8x8xf32>
    %444 = math.exp %443 : vector<8x8xf32>
    %cst_195 = arith.constant dense<0.000000e+00> : vector<8xf32>
    %445 = vector.multi_reduction <add>, %444, %cst_195 [1] : vector<8x8xf32> to vector<8xf32>
    %446 = vector.shape_cast %445 : vector<8xf32> to vector<8x1xf32>
    %447 = tpu.reciprocal %446 {approx = true} : vector<8x1xf32> -> vector<8x1xf32>
    %448 = vector.broadcast %447 : vector<8x1xf32> to vector<8x8xf32>
    %449 = arith.mulf %444, %448 : vector<8x8xf32>
    %450 = arith.truncf %449 : vector<8x8xf32> to vector<8x8xbf16>
    %451 = arith.truncf %436 : vector<8x8xf32> to vector<8x8xbf16>
    %cst_196 = arith.constant dense<0.000000e+00> : vector<8x8xf32>
    %452 = tpu.matmul %450, %451, %cst_196 {dimension_numbers = #tpu.dot_dimension_numbers<[1], [0], [0], [1], [0, 0, 1, 1], [], []>} : vector<8x8xbf16>, vector<8x8xbf16>, vector<8x8xf32> -> vector<8x8xf32>
    %453 = vector.extract_strided_slice %429 {offsets = [0, 8], sizes = [8, 8], strides = [1, 1]} : vector<8x32xf32> to vector<8x8xf32>
    %454 = vector.extract_strided_slice %431 {offsets = [0, 8], sizes = [8, 8], strides = [1, 1]} : vector<8x32xf32> to vector<8x8xf32>
    %455 = vector.extract_strided_slice %433 {offsets = [0, 8], sizes = [8, 8], strides = [1, 1]} : vector<8x32xf32> to vector<8x8xf32>
    %456 = arith.truncf %453 : vector<8x8xf32> to vector<8x8xbf16>
    %457 = arith.truncf %454 : vector<8x8xf32> to vector<8x8xbf16>
    %cst_197 = arith.constant dense<0.000000e+00> : vector<8x8xf32>
    %458 = tpu.matmul %456, %457, %cst_197 {dimension_numbers = #tpu.dot_dimension_numbers<[1], [1], [0], [0], [0, 0, 1, 0], [], []>} : vector<8x8xbf16>, vector<8x8xbf16>, vector<8x8xf32> -> vector<8x8xf32>
    %cst_198 = arith.constant dense<0xFF800000> : vector<8xf32>
    %459 = vector.multi_reduction <maximumf>, %458, %cst_198 [1] : vector<8x8xf32> to vector<8xf32>
    %460 = vector.shape_cast %459 : vector<8xf32> to vector<8x1xf32>
    %461 = vector.broadcast %460 : vector<8x1xf32> to vector<8x8xf32>
    %462 = arith.subf %458, %461 : vector<8x8xf32>
    %463 = math.exp %462 : vector<8x8xf32>
    %cst_199 = arith.constant dense<0.000000e+00> : vector<8xf32>
    %464 = vector.multi_reduction <add>, %463, %cst_199 [1] : vector<8x8xf32> to vector<8xf32>
    %465 = vector.shape_cast %464 : vector<8xf32> to vector<8x1xf32>
    %466 = tpu.reciprocal %465 {approx = true} : vector<8x1xf32> -> vector<8x1xf32>
    %467 = vector.broadcast %466 : vector<8x1xf32> to vector<8x8xf32>
    %468 = arith.mulf %463, %467 : vector<8x8xf32>
    %469 = arith.truncf %468 : vector<8x8xf32> to vector<8x8xbf16>
    %470 = arith.truncf %455 : vector<8x8xf32> to vector<8x8xbf16>
    %cst_200 = arith.constant dense<0.000000e+00> : vector<8x8xf32>
    %471 = tpu.matmul %469, %470, %cst_200 {dimension_numbers = #tpu.dot_dimension_numbers<[1], [0], [0], [1], [0, 0, 1, 1], [], []>} : vector<8x8xbf16>, vector<8x8xbf16>, vector<8x8xf32> -> vector<8x8xf32>
    %472 = vector.extract_strided_slice %429 {offsets = [0, 16], sizes = [8, 8], strides = [1, 1]} : vector<8x32xf32> to vector<8x8xf32>
    %473 = vector.extract_strided_slice %431 {offsets = [0, 16], sizes = [8, 8], strides = [1, 1]} : vector<8x32xf32> to vector<8x8xf32>
    %474 = vector.extract_strided_slice %433 {offsets = [0, 16], sizes = [8, 8], strides = [1, 1]} : vector<8x32xf32> to vector<8x8xf32>
    %475 = arith.truncf %472 : vector<8x8xf32> to vector<8x8xbf16>
    %476 = arith.truncf %473 : vector<8x8xf32> to vector<8x8xbf16>
    %cst_201 = arith.constant dense<0.000000e+00> : vector<8x8xf32>
    %477 = tpu.matmul %475, %476, %cst_201 {dimension_numbers = #tpu.dot_dimension_numbers<[1], [1], [0], [0], [0, 0, 1, 0], [], []>} : vector<8x8xbf16>, vector<8x8xbf16>, vector<8x8xf32> -> vector<8x8xf32>
    %cst_202 = arith.constant dense<0xFF800000> : vector<8xf32>
    %478 = vector.multi_reduction <maximumf>, %477, %cst_202 [1] : vector<8x8xf32> to vector<8xf32>
    %479 = vector.shape_cast %478 : vector<8xf32> to vector<8x1xf32>
    %480 = vector.broadcast %479 : vector<8x1xf32> to vector<8x8xf32>
    %481 = arith.subf %477, %480 : vector<8x8xf32>
    %482 = math.exp %481 : vector<8x8xf32>
    %cst_203 = arith.constant dense<0.000000e+00> : vector<8xf32>
    %483 = vector.multi_reduction <add>, %482, %cst_203 [1] : vector<8x8xf32> to vector<8xf32>
    %484 = vector.shape_cast %483 : vector<8xf32> to vector<8x1xf32>
    %485 = tpu.reciprocal %484 {approx = true} : vector<8x1xf32> -> vector<8x1xf32>
    %486 = vector.broadcast %485 : vector<8x1xf32> to vector<8x8xf32>
    %487 = arith.mulf %482, %486 : vector<8x8xf32>
    %488 = arith.truncf %487 : vector<8x8xf32> to vector<8x8xbf16>
    %489 = arith.truncf %474 : vector<8x8xf32> to vector<8x8xbf16>
    %cst_204 = arith.constant dense<0.000000e+00> : vector<8x8xf32>
    %490 = tpu.matmul %488, %489, %cst_204 {dimension_numbers = #tpu.dot_dimension_numbers<[1], [0], [0], [1], [0, 0, 1, 1], [], []>} : vector<8x8xbf16>, vector<8x8xbf16>, vector<8x8xf32> -> vector<8x8xf32>
    %491 = vector.extract_strided_slice %429 {offsets = [0, 24], sizes = [8, 8], strides = [1, 1]} : vector<8x32xf32> to vector<8x8xf32>
    %492 = vector.extract_strided_slice %431 {offsets = [0, 24], sizes = [8, 8], strides = [1, 1]} : vector<8x32xf32> to vector<8x8xf32>
    %493 = vector.extract_strided_slice %433 {offsets = [0, 24], sizes = [8, 8], strides = [1, 1]} : vector<8x32xf32> to vector<8x8xf32>
    %494 = arith.truncf %491 : vector<8x8xf32> to vector<8x8xbf16>
    %495 = arith.truncf %492 : vector<8x8xf32> to vector<8x8xbf16>
    %cst_205 = arith.constant dense<0.000000e+00> : vector<8x8xf32>
    %496 = tpu.matmul %494, %495, %cst_205 {dimension_numbers = #tpu.dot_dimension_numbers<[1], [1], [0], [0], [0, 0, 1, 0], [], []>} : vector<8x8xbf16>, vector<8x8xbf16>, vector<8x8xf32> -> vector<8x8xf32>
    %cst_206 = arith.constant dense<0xFF800000> : vector<8xf32>
    %497 = vector.multi_reduction <maximumf>, %496, %cst_206 [1] : vector<8x8xf32> to vector<8xf32>
    %498 = vector.shape_cast %497 : vector<8xf32> to vector<8x1xf32>
    %499 = vector.broadcast %498 : vector<8x1xf32> to vector<8x8xf32>
    %500 = arith.subf %496, %499 : vector<8x8xf32>
    %501 = math.exp %500 : vector<8x8xf32>
    %cst_207 = arith.constant dense<0.000000e+00> : vector<8xf32>
    %502 = vector.multi_reduction <add>, %501, %cst_207 [1] : vector<8x8xf32> to vector<8xf32>
    %503 = vector.shape_cast %502 : vector<8xf32> to vector<8x1xf32>
    %504 = tpu.reciprocal %503 {approx = true} : vector<8x1xf32> -> vector<8x1xf32>
    %505 = vector.broadcast %504 : vector<8x1xf32> to vector<8x8xf32>
    %506 = arith.mulf %501, %505 : vector<8x8xf32>
    %507 = arith.truncf %506 : vector<8x8xf32> to vector<8x8xbf16>
    %508 = arith.truncf %493 : vector<8x8xf32> to vector<8x8xbf16>
    %cst_208 = arith.constant dense<0.000000e+00> : vector<8x8xf32>
    %509 = tpu.matmul %507, %508, %cst_208 {dimension_numbers = #tpu.dot_dimension_numbers<[1], [0], [0], [1], [0, 0, 1, 1], [], []>} : vector<8x8xbf16>, vector<8x8xbf16>, vector<8x8xf32> -> vector<8x8xf32>
    %510 = tpu.concatenate %452, %471, %490, %509 in 1 : vector<8x8xf32>, vector<8x8xf32>, vector<8x8xf32>, vector<8x8xf32> -> vector<8x32xf32>
    %511 = arith.truncf %510 : vector<8x32xf32> to vector<8x32xbf16>
    %c0_209 = arith.constant 0 : index
    %c0_210 = arith.constant 0 : index
    %512 = vector.load %arg18[%c0_209, %c0_210] : memref<32x32xbf16, #tpu.memory_space<vmem>>, vector<32x32xbf16>
    %cst_211 = arith.constant dense<0.000000e+00> : vector<8x32xf32>
    %513 = tpu.matmul %511, %512, %cst_211 {dimension_numbers = #tpu.dot_dimension_numbers<[1], [0], [0], [1], [0, 0, 1, 1], [], []>} : vector<8x32xbf16>, vector<32x32xbf16>, vector<8x32xf32> -> vector<8x32xf32>
    %c0_212 = arith.constant 0 : index
    %c0_213 = arith.constant 0 : index
    %514 = vector.load %arg19[%c0_212, %c0_213] : memref<1x32xf32, #tpu.memory_space<vmem>>, vector<1x32xf32>
    %515 = vector.broadcast %514 : vector<1x32xf32> to vector<8x32xf32>
    %516 = arith.addf %513, %515 : vector<8x32xf32>
    %517 = arith.addf %516, %425 : vector<8x32xf32>
    %c0_214 = arith.constant 0 : index
    %c0_215 = arith.constant 0 : index
    %518 = vector.load %arg20[%c0_214, %c0_215] : memref<1x32xf32, #tpu.memory_space<vmem>>, vector<1x32xf32>
    %c0_216 = arith.constant 0 : index
    %c0_217 = arith.constant 0 : index
    %519 = vector.load %arg21[%c0_216, %c0_217] : memref<1x32xf32, #tpu.memory_space<vmem>>, vector<1x32xf32>
    %cst_218 = arith.constant dense<0.000000e+00> : vector<8xf32>
    %520 = vector.multi_reduction <add>, %517, %cst_218 [1] : vector<8x32xf32> to vector<8xf32>
    %521 = vector.shape_cast %520 : vector<8xf32> to vector<8x1xf32>
    %cst_219 = arith.constant 3.200000e+01 : f32
    %522 = vector.broadcast %cst_219 : f32 to vector<8x1xf32>
    %523 = arith.divf %521, %522 : vector<8x1xf32>
    %524 = vector.broadcast %523 : vector<8x1xf32> to vector<8x32xf32>
    %525 = arith.subf %517, %524 : vector<8x32xf32>
    %526 = arith.mulf %525, %525 : vector<8x32xf32>
    %cst_220 = arith.constant dense<0.000000e+00> : vector<8xf32>
    %527 = vector.multi_reduction <add>, %526, %cst_220 [1] : vector<8x32xf32> to vector<8xf32>
    %528 = vector.shape_cast %527 : vector<8xf32> to vector<8x1xf32>
    %cst_221 = arith.constant 3.200000e+01 : f32
    %529 = vector.broadcast %cst_221 : f32 to vector<8x1xf32>
    %530 = arith.divf %528, %529 : vector<8x1xf32>
    %531 = vector.broadcast %523 : vector<8x1xf32> to vector<8x32xf32>
    %532 = arith.subf %517, %531 : vector<8x32xf32>
    %cst_222 = arith.constant 9.99999996E-13 : f32
    %533 = vector.broadcast %cst_222 : f32 to vector<8x1xf32>
    %534 = arith.addf %530, %533 : vector<8x1xf32>
    %535 = math.rsqrt %534 : vector<8x1xf32>
    %536 = vector.broadcast %535 : vector<8x1xf32> to vector<8x32xf32>
    %537 = arith.mulf %532, %536 : vector<8x32xf32>
    %538 = vector.broadcast %518 : vector<1x32xf32> to vector<8x32xf32>
    %539 = arith.mulf %537, %538 : vector<8x32xf32>
    %540 = vector.broadcast %519 : vector<1x32xf32> to vector<8x32xf32>
    %541 = arith.addf %539, %540 : vector<8x32xf32>
    %542 = arith.truncf %541 : vector<8x32xf32> to vector<8x32xbf16>
    %c0_223 = arith.constant 0 : index
    %c0_224 = arith.constant 0 : index
    %543 = vector.load %arg22[%c0_223, %c0_224] : memref<32x64xbf16, #tpu.memory_space<vmem>>, vector<32x64xbf16>
    %cst_225 = arith.constant dense<0.000000e+00> : vector<8x64xf32>
    %544 = tpu.matmul %542, %543, %cst_225 {dimension_numbers = #tpu.dot_dimension_numbers<[1], [0], [0], [1], [0, 0, 1, 1], [], []>} : vector<8x32xbf16>, vector<32x64xbf16>, vector<8x64xf32> -> vector<8x64xf32>
    %c0_226 = arith.constant 0 : index
    %c0_227 = arith.constant 0 : index
    %545 = vector.load %arg23[%c0_226, %c0_227] : memref<1x64xf32, #tpu.memory_space<vmem>>, vector<1x64xf32>
    %546 = vector.broadcast %545 : vector<1x64xf32> to vector<8x64xf32>
    %547 = arith.addf %544, %546 : vector<8x64xf32>
    %548 = arith.mulf %547, %547 : vector<8x64xf32>
    %549 = arith.mulf %547, %548 : vector<8x64xf32>
    %cst_228 = arith.constant 4.471500e-02 : f32
    %550 = vector.broadcast %cst_228 : f32 to vector<8x64xf32>
    %551 = arith.mulf %550, %549 : vector<8x64xf32>
    %552 = arith.addf %547, %551 : vector<8x64xf32>
    %cst_229 = arith.constant 0.797884583 : f32
    %553 = vector.broadcast %cst_229 : f32 to vector<8x64xf32>
    %554 = arith.mulf %553, %552 : vector<8x64xf32>
    %555 = math.tanh %554 : vector<8x64xf32>
    %cst_230 = arith.constant 1.000000e+00 : f32
    %556 = vector.broadcast %cst_230 : f32 to vector<8x64xf32>
    %557 = arith.addf %556, %555 : vector<8x64xf32>
    %cst_231 = arith.constant 5.000000e-01 : f32
    %558 = vector.broadcast %cst_231 : f32 to vector<8x64xf32>
    %559 = arith.mulf %558, %557 : vector<8x64xf32>
    %560 = arith.mulf %547, %559 : vector<8x64xf32>
    %561 = arith.truncf %560 : vector<8x64xf32> to vector<8x64xbf16>
    %c0_232 = arith.constant 0 : index
    %c0_233 = arith.constant 0 : index
    %562 = vector.load %arg24[%c0_232, %c0_233] : memref<64x32xbf16, #tpu.memory_space<vmem>>, vector<64x32xbf16>
    %cst_234 = arith.constant dense<0.000000e+00> : vector<8x32xf32>
    %563 = tpu.matmul %561, %562, %cst_234 {dimension_numbers = #tpu.dot_dimension_numbers<[1], [0], [0], [1], [0, 0, 1, 1], [], []>} : vector<8x64xbf16>, vector<64x32xbf16>, vector<8x32xf32> -> vector<8x32xf32>
    %c0_235 = arith.constant 0 : index
    %c0_236 = arith.constant 0 : index
    %564 = vector.load %arg25[%c0_235, %c0_236] : memref<1x32xf32, #tpu.memory_space<vmem>>, vector<1x32xf32>
    %565 = vector.broadcast %564 : vector<1x32xf32> to vector<8x32xf32>
    %566 = arith.addf %563, %565 : vector<8x32xf32>
    %567 = arith.addf %566, %541 : vector<8x32xf32>
    %c0_237 = arith.constant 0 : index
    %c0_238 = arith.constant 0 : index
    %568 = vector.load %arg26[%c0_237, %c0_238] : memref<1x32xf32, #tpu.memory_space<vmem>>, vector<1x32xf32>
    %c0_239 = arith.constant 0 : index
    %c0_240 = arith.constant 0 : index
    %569 = vector.load %arg27[%c0_239, %c0_240] : memref<1x32xf32, #tpu.memory_space<vmem>>, vector<1x32xf32>
    %cst_241 = arith.constant dense<0.000000e+00> : vector<8xf32>
    %570 = vector.multi_reduction <add>, %567, %cst_241 [1] : vector<8x32xf32> to vector<8xf32>
    %571 = vector.shape_cast %570 : vector<8xf32> to vector<8x1xf32>
    %cst_242 = arith.constant 3.200000e+01 : f32
    %572 = vector.broadcast %cst_242 : f32 to vector<8x1xf32>
    %573 = arith.divf %571, %572 : vector<8x1xf32>
    %574 = vector.broadcast %573 : vector<8x1xf32> to vector<8x32xf32>
    %575 = arith.subf %567, %574 : vector<8x32xf32>
    %576 = arith.mulf %575, %575 : vector<8x32xf32>
    %cst_243 = arith.constant dense<0.000000e+00> : vector<8xf32>
    %577 = vector.multi_reduction <add>, %576, %cst_243 [1] : vector<8x32xf32> to vector<8xf32>
    %578 = vector.shape_cast %577 : vector<8xf32> to vector<8x1xf32>
    %cst_244 = arith.constant 3.200000e+01 : f32
    %579 = vector.broadcast %cst_244 : f32 to vector<8x1xf32>
    %580 = arith.divf %578, %579 : vector<8x1xf32>
    %581 = vector.broadcast %573 : vector<8x1xf32> to vector<8x32xf32>
    %582 = arith.subf %567, %581 : vector<8x32xf32>
    %cst_245 = arith.constant 9.99999996E-13 : f32
    %583 = vector.broadcast %cst_245 : f32 to vector<8x1xf32>
    %584 = arith.addf %580, %583 : vector<8x1xf32>
    %585 = math.rsqrt %584 : vector<8x1xf32>
    %586 = vector.broadcast %585 : vector<8x1xf32> to vector<8x32xf32>
    %587 = arith.mulf %582, %586 : vector<8x32xf32>
    %588 = vector.broadcast %568 : vector<1x32xf32> to vector<8x32xf32>
    %589 = arith.mulf %587, %588 : vector<8x32xf32>
    %590 = vector.broadcast %569 : vector<1x32xf32> to vector<8x32xf32>
    %591 = arith.addf %589, %590 : vector<8x32xf32>
    %592 = arith.truncf %591 : vector<8x32xf32> to vector<8x32xbf16>
    %c0_246 = arith.constant 0 : index
    %c0_247 = arith.constant 0 : index
    %593 = vector.load %arg4[%c0_246, %c0_247] : memref<32x64xbf16, #tpu.memory_space<vmem>>, vector<32x64xbf16>
    %cst_248 = arith.constant dense<0.000000e+00> : vector<8x64xf32>
    %594 = tpu.matmul %592, %593, %cst_248 {dimension_numbers = #tpu.dot_dimension_numbers<[1], [0], [0], [1], [0, 0, 1, 1], [], []>} : vector<8x32xbf16>, vector<32x64xbf16>, vector<8x64xf32> -> vector<8x64xf32>
    %c0_249 = arith.constant 0 : index
    %c0_250 = arith.constant 0 : index
    %595 = vector.load %arg28[%c0_249, %c0_250] : memref<1x64xf32, #tpu.memory_space<vmem>>, vector<1x64xf32>
    %596 = vector.broadcast %595 : vector<1x64xf32> to vector<8x64xf32>
    %597 = arith.addf %594, %596 : vector<8x64xf32>
    %c0_251 = arith.constant 0 : index
    %c0_252 = arith.constant 0 : index
    %c0_253 = arith.constant 0 : index
    %598 = vector.load %arg29[%c0_251, %c0_252, %c0_253] : memref<1x8x64xf32, #tpu.memory_space<vmem>>, vector<1x8x64xf32>
    %599 = vector.shape_cast %598 : vector<1x8x64xf32> to vector<8x64xf32>
    %600 = vector.shape_cast %597 : vector<8x64xf32> to vector<1x8x64xf32>
    tpu.vector_store %arg29[%c0_251, %c0_252, %c0_253], %600 {strides = array<i32>} : memref<1x8x64xf32, #tpu.memory_space<vmem>>, vector<1x8x64xf32>,
    return
  }
  func.func @transform_0(%arg0: i32, %arg1: memref<2x8xi32, #tpu.memory_space<smem>>, %arg2: memref<2x8xi32, #tpu.memory_space<smem>>) -> (i32, i32) {
    %c0_i32 = arith.constant 0 : i32
    %c0_i32_0 = arith.constant 0 : i32
    %c0_i32_1 = arith.constant 0 : i32
    return %c0_i32, %c0_i32_0 : i32, i32
  }
  func.func @transform_1(%arg0: i32, %arg1: memref<2x8xi32, #tpu.memory_space<smem>>, %arg2: memref<2x8xi32, #tpu.memory_space<smem>>) -> (i32, i32) {
    %c0_i32 = arith.constant 0 : i32
    %c0_i32_0 = arith.constant 0 : i32
    %c0_i32_1 = arith.constant 0 : i32
    return %c0_i32, %c0_i32_0 : i32, i32
  }
  func.func @transform_2(%arg0: i32, %arg1: memref<2x8xi32, #tpu.memory_space<smem>>, %arg2: memref<2x8xi32, #tpu.memory_space<smem>>) -> (i32, i32) {
    %c0_i32 = arith.constant 0 : i32
    %c0_i32_0 = arith.constant 0 : i32
    %c0_i32_1 = arith.constant 0 : i32
    return %c0_i32, %c0_i32_0 : i32, i32
  }
  func.func @transform_3(%arg0: i32, %arg1: memref<2x8xi32, #tpu.memory_space<smem>>, %arg2: memref<2x8xi32, #tpu.memory_space<smem>>) -> (i32, i32) {
    %c0_i32 = arith.constant 0 : i32
    %c0_i32_0 = arith.constant 0 : i32
    %c0_i32_1 = arith.constant 0 : i32
    return %c0_i32, %c0_i32_0 : i32, i32
  }
  func.func @transform_4(%arg0: i32, %arg1: memref<2x8xi32, #tpu.memory_space<smem>>, %arg2: memref<2x8xi32, #tpu.memory_space<smem>>) -> (i32, i32) {
    %c0_i32 = arith.constant 0 : i32
    %c0_i32_0 = arith.constant 0 : i32
    %c0_i32_1 = arith.constant 0 : i32
    return %c0_i32, %c0_i32_0 : i32, i32
  }
  func.func @transform_5(%arg0: i32, %arg1: memref<2x8xi32, #tpu.memory_space<smem>>, %arg2: memref<2x8xi32, #tpu.memory_space<smem>>) -> (i32, i32) {
    %c0_i32 = arith.constant 0 : i32
    %c0_i32_0 = arith.constant 0 : i32
    %c0_i32_1 = arith.constant 0 : i32
    return %c0_i32, %c0_i32_0 : i32, i32
  }
  func.func @transform_6(%arg0: i32, %arg1: memref<2x8xi32, #tpu.memory_space<smem>>, %arg2: memref<2x8xi32, #tpu.memory_space<smem>>) -> (i32, i32) {
    %c0_i32 = arith.constant 0 : i32
    %c0_i32_0 = arith.constant 0 : i32
    %c0_i32_1 = arith.constant 0 : i32
    return %c0_i32, %c0_i32_0 : i32, i32
  }
  func.func @transform_7(%arg0: i32, %arg1: memref<2x8xi32, #tpu.memory_space<smem>>, %arg2: memref<2x8xi32, #tpu.memory_space<smem>>) -> (i32, i32) {
    %c0_i32 = arith.constant 0 : i32
    %c0_i32_0 = arith.constant 0 : i32
    %c0_i32_1 = arith.constant 0 : i32
    return %c0_i32, %c0_i32_0 : i32, i32
  }
  func.func @transform_8(%arg0: i32, %arg1: memref<2x8xi32, #tpu.memory_space<smem>>, %arg2: memref<2x8xi32, #tpu.memory_space<smem>>) -> (i32, i32) {
    %c0_i32 = arith.constant 0 : i32
    %c0_i32_0 = arith.constant 0 : i32
    %c0_i32_1 = arith.constant 0 : i32
    return %c0_i32, %c0_i32_0 : i32, i32
  }
  func.func @transform_9(%arg0: i32, %arg1: memref<2x8xi32, #tpu.memory_space<smem>>, %arg2: memref<2x8xi32, #tpu.memory_space<smem>>) -> (i32, i32) {
    %c0_i32 = arith.constant 0 : i32
    %c0_i32_0 = arith.constant 0 : i32
    %c0_i32_1 = arith.constant 0 : i32
    return %c0_i32, %c0_i32_0 : i32, i32
  }
  func.func @transform_10(%arg0: i32, %arg1: memref<2x8xi32, #tpu.memory_space<smem>>, %arg2: memref<2x8xi32, #tpu.memory_space<smem>>) -> (i32, i32) {
    %c0_i32 = arith.constant 0 : i32
    %c0_i32_0 = arith.constant 0 : i32
    %c0_i32_1 = arith.constant 0 : i32
    return %c0_i32, %c0_i32_0 : i32, i32
  }
  func.func @transform_11(%arg0: i32, %arg1: memref<2x8xi32, #tpu.memory_space<smem>>, %arg2: memref<2x8xi32, #tpu.memory_space<smem>>) -> (i32, i32) {
    %c0_i32 = arith.constant 0 : i32
    %c0_i32_0 = arith.constant 0 : i32
    %c0_i32_1 = arith.constant 0 : i32
    return %c0_i32, %c0_i32_0 : i32, i32
  }
  func.func @transform_12(%arg0: i32, %arg1: memref<2x8xi32, #tpu.memory_space<smem>>, %arg2: memref<2x8xi32, #tpu.memory_space<smem>>) -> (i32, i32) {
    %c0_i32 = arith.constant 0 : i32
    %c0_i32_0 = arith.constant 0 : i32
    %c0_i32_1 = arith.constant 0 : i32
    return %c0_i32, %c0_i32_0 : i32, i32
  }
  func.func @transform_13(%arg0: i32, %arg1: memref<2x8xi32, #tpu.memory_space<smem>>, %arg2: memref<2x8xi32, #tpu.memory_space<smem>>) -> (i32, i32) {
    %c0_i32 = arith.constant 0 : i32
    %c0_i32_0 = arith.constant 0 : i32
    %c0_i32_1 = arith.constant 0 : i32
    return %c0_i32, %c0_i32_0 : i32, i32
  }
  func.func @transform_14(%arg0: i32, %arg1: memref<2x8xi32, #tpu.memory_space<smem>>, %arg2: memref<2x8xi32, #tpu.memory_space<smem>>) -> (i32, i32) {
    %c0_i32 = arith.constant 0 : i32
    %c0_i32_0 = arith.constant 0 : i32
    %c0_i32_1 = arith.constant 0 : i32
    return %c0_i32, %c0_i32_0 : i32, i32
  }
  func.func @transform_15(%arg0: i32, %arg1: memref<2x8xi32, #tpu.memory_space<smem>>, %arg2: memref<2x8xi32, #tpu.memory_space<smem>>) -> (i32, i32) {
    %c0_i32 = arith.constant 0 : i32
    %c0_i32_0 = arith.constant 0 : i32
    %c0_i32_1 = arith.constant 0 : i32
    return %c0_i32, %c0_i32_0 : i32, i32
  }
  func.func @transform_16(%arg0: i32, %arg1: memref<2x8xi32, #tpu.memory_space<smem>>, %arg2: memref<2x8xi32, #tpu.memory_space<smem>>) -> (i32, i32) {
    %c0_i32 = arith.constant 0 : i32
    %c0_i32_0 = arith.constant 0 : i32
    %c0_i32_1 = arith.constant 0 : i32
    return %c0_i32, %c0_i32_0 : i32, i32
  }
  func.func @transform_17(%arg0: i32, %arg1: memref<2x8xi32, #tpu.memory_space<smem>>, %arg2: memref<2x8xi32, #tpu.memory_space<smem>>) -> (i32, i32) {
    %c0_i32 = arith.constant 0 : i32
    %c0_i32_0 = arith.constant 0 : i32
    %c0_i32_1 = arith.constant 0 : i32
    return %c0_i32, %c0_i32_0 : i32, i32
  }
  func.func @transform_18(%arg0: i32, %arg1: memref<2x8xi32, #tpu.memory_space<smem>>, %arg2: memref<2x8xi32, #tpu.memory_space<smem>>) -> (i32, i32) {
    %c0_i32 = arith.constant 0 : i32
    %c0_i32_0 = arith.constant 0 : i32
    %c0_i32_1 = arith.constant 0 : i32
    return %c0_i32, %c0_i32_0 : i32, i32
  }
  func.func @transform_19(%arg0: i32, %arg1: memref<2x8xi32, #tpu.memory_space<smem>>, %arg2: memref<2x8xi32, #tpu.memory_space<smem>>) -> (i32, i32) {
    %c0_i32 = arith.constant 0 : i32
    %c0_i32_0 = arith.constant 0 : i32
    %c0_i32_1 = arith.constant 0 : i32
    return %c0_i32, %c0_i32_0 : i32, i32
  }
  func.func @transform_20(%arg0: i32, %arg1: memref<2x8xi32, #tpu.memory_space<smem>>, %arg2: memref<2x8xi32, #tpu.memory_space<smem>>) -> (i32, i32) {
    %c0_i32 = arith.constant 0 : i32
    %c0_i32_0 = arith.constant 0 : i32
    %c0_i32_1 = arith.constant 0 : i32
    return %c0_i32, %c0_i32_0 : i32, i32
  }
  func.func @transform_21(%arg0: i32, %arg1: memref<2x8xi32, #tpu.memory_space<smem>>, %arg2: memref<2x8xi32, #tpu.memory_space<smem>>) -> (i32, i32) {
    %c0_i32 = arith.constant 0 : i32
    %c0_i32_0 = arith.constant 0 : i32
    %c0_i32_1 = arith.constant 0 : i32
    return %c0_i32, %c0_i32_0 : i32, i32
  }
  func.func @transform_22(%arg0: i32, %arg1: memref<2x8xi32, #tpu.memory_space<smem>>, %arg2: memref<2x8xi32, #tpu.memory_space<smem>>) -> (i32, i32) {
    %c0_i32 = arith.constant 0 : i32
    %c0_i32_0 = arith.constant 0 : i32
    %c0_i32_1 = arith.constant 0 : i32
    return %c0_i32, %c0_i32_0 : i32, i32
  }
  func.func @transform_23(%arg0: i32, %arg1: memref<2x8xi32, #tpu.memory_space<smem>>, %arg2: memref<2x8xi32, #tpu.memory_space<smem>>) -> (i32, i32) {
    %c0_i32 = arith.constant 0 : i32
    %c0_i32_0 = arith.constant 0 : i32
    %c0_i32_1 = arith.constant 0 : i32
    return %c0_i32, %c0_i32_0 : i32, i32
  }
  func.func @transform_24(%arg0: i32, %arg1: memref<2x8xi32, #tpu.memory_space<smem>>, %arg2: memref<2x8xi32, #tpu.memory_space<smem>>) -> (i32, i32) {
    %c0_i32 = arith.constant 0 : i32
    %c0_i32_0 = arith.constant 0 : i32
    %c0_i32_1 = arith.constant 0 : i32
    return %c0_i32, %c0_i32_0 : i32, i32
  }
  func.func @transform_25(%arg0: i32, %arg1: memref<2x8xi32, #tpu.memory_space<smem>>, %arg2: memref<2x8xi32, #tpu.memory_space<smem>>) -> (i32, i32) {
    %c0_i32 = arith.constant 0 : i32
    %c0_i32_0 = arith.constant 0 : i32
    %c0_i32_1 = arith.constant 0 : i32
    return %c0_i32, %c0_i32_0 : i32, i32
  }
  func.func @transform_26(%arg0: i32, %arg1: memref<2x8xi32, #tpu.memory_space<smem>>, %arg2: memref<2x8xi32, #tpu.memory_space<smem>>) -> (i32, i32, i32) {
    %c0_i32 = arith.constant 0 : i32
    %c0_i32_0 = arith.constant 0 : i32
    %c0_i32_1 = arith.constant 0 : i32
    return %arg0, %c0_i32, %c0_i32_0 : i32, i32, i32
  }
}

</mosaic_0001>

<bundles_post_ra>
// kernel: tpu_custom_call.1
= control target key start
LH: loop header
LB: loop body
LE: loop exit
PB: predicated region body
PF: predicated region fallthrough
CT: control target
= control target key end

     0   :  { %s4934_s30 = smov [#allocation5]   ;;  %s5915_s0 = inlined_call_operand.hbm [shape: s32[2,8], index: 0, kind: input, shape index: {}]   ;;  %s5916_s2 = inlined_call_operand.vmem [shape: f32[64,32], index: 2, kind: input, shape index: {}]   ;;  %s5917_s3 = inlined_call_operand.vmem [shape: bf16[32,64], index: 3, kind: input, shape index: {}]   ;;  %s5918_s4 = inlined_call_operand.hbm [shape: f32[8,32], index: 4, kind: input, shape index: {}]   ;;  %s5919_s5 = inlined_call_operand.hbm [shape: f32[1,32], index: 5, kind: input, shape index: {}]   ;;  %s5920_s6 = inlined_call_operand.hbm [shape: f32[1,32], index: 6, kind: input, shape index: {}]   ;;  %s5921_s7 = inlined_call_operand.vmem [shape: bf16[32,32], index: 7, kind: input, shape index: {}]   ;;  %s5922_s8 = inlined_call_operand.vmem [shape: bf16[32,32], index: 8, kind: input, shape index: {}]   ;;  %s5923_s9 = inlined_call_operand.vmem [shape: bf16[32,32], index: 9, kind: input, shape index: {}]   ;;  %s5924_s10 = inlined_call_operand.vmem [shape: bf16[32,32], index: 10, kind: input, shape index: {}]   ;;  %s5925_s11 = inlined_call_operand.hbm [shape: f32[1,32], index: 11, kind: input, shape index: {}]   ;;  %s5926_s12 = inlined_call_operand.hbm [shape: f32[1,32], index: 12, kind: input, shape index: {}]   ;;  %s5927_s13 = inlined_call_operand.hbm [shape: f32[1,32], index: 13, kind: input, shape index: {}]   ;;  %s5928_s14 = inlined_call_operand.vmem [shape: bf16[32,32], index: 14, kind: input, shape index: {}]   ;;  %s5929_s15 = inlined_call_operand.vmem [shape: bf16[32,32], index: 15, kind: input, shape index: {}]   ;;  %s5930_s16 = inlined_call_operand.vmem [shape: bf16[32,32], index: 16, kind: input, shape index: {}]   ;;  %s5931_s17 = inlined_call_operand.hbm [shape: bf16[32,32], index: 17, kind: input, shape index: {}]   ;;  %s5932_s18 = inlined_call_operand.hbm [shape: f32[1,32], index: 18, kind: input, shape index: {}]   ;;  %s5933_s19 = inlined_call_operand.vmem [shape: f32[1,32], index: 19, kind: input, shape index: {}]   ;;  %s5934_s20 = inlined_call_operand.vmem [shape: f32[1,32], index: 20, kind: input, shape index: {}]   ;;  %s5935_s21 = inlined_call_operand.hbm [shape: bf16[32,64], index: 21, kind: input, shape index: {}]   ;;  %s5936_s22 = inlined_call_operand.vmem [shape: f32[1,64], index: 22, kind: input, shape index: {}]   ;;  %s5937_s23 = inlined_call_operand.vmem [shape: bf16[64,32], index: 23, kind: input, shape index: {}]   ;;  %s5938_s24 = inlined_call_operand.vmem [shape: f32[1,32], index: 24, kind: input, shape index: {}]   ;;  %s5939_s25 = inlined_call_operand.vmem [shape: f32[1,32], index: 25, kind: input, shape index: {}]   ;;  %s5940_s26 = inlined_call_operand.vmem [shape: f32[1,32], index: 26, kind: input, shape index: {}]   ;;  %s5941_s27 = inlined_call_operand.vmem [shape: f32[1,64], index: 27, kind: input, shape index: {}]   ;;  %s5942_s28 = inlined_call_operand.hbm [shape: f32[2,8,64], index: 28, kind: output, shape index: {}]   ;;  %s5943_s1 = inlined_call_operand.hbm [shape: s32[2,8], index: 1, kind: input, shape index: {}]  }
   0x1   :  { %5982 = sst [smem:[#allocation37_spill]] %s5915_s0 }
   0x2   :  { %5983 = sst [smem:[#allocation38_spill]] %s5916_s2 }
   0x3   :  { %5984 = sst [smem:[#allocation39_spill]] %s5917_s3 }
   0x4   :  { %5985 = sst [smem:[#allocation40_spill]] %s5918_s4 }
   0x5   :  { %5986 = sst [smem:[#allocation41_spill]] %s5919_s5 }
   0x6   :  { %5987 = sst [smem:[#allocation42_spill]] %s5920_s6 }
   0x7   :  { %5988 = sst [smem:[#allocation43_spill]] %s5921_s7 }
   0x8   :  { %5989 = sst [smem:[#allocation44_spill]] %s5922_s8 }
   0x9   :  { %5990 = sst [smem:[#allocation45_spill]] %s5923_s9  ;;  %s4933_s9 = smov [#allocation4]  }
   0xa   :  { %5991 = sst [smem:[#allocation46_spill]] %s5924_s10 }
   0xb   :  { %5992 = sst [smem:[#allocation47_spill]] %s5925_s11 }
   0xc   :  { %5993 = sst [smem:[#allocation48_spill]] %s5926_s12 }
   0xd   :  { %5994 = sst [smem:[#allocation49_spill]] %s5927_s13 }
   0xe   :  { %5995 = sst [smem:[#allocation50_spill]] %s5928_s14 }
   0xf   :  { %5996 = sst [smem:[#allocation51_spill]] %s5930_s16 }
  0x10   :  { %5997 = sst [smem:[#allocation52_spill]] %s5931_s17 }
  0x11   :  { %5998 = sst [smem:[#allocation53_spill]] %s5932_s18 }
  0x12   :  { %5999 = sst [smem:[#allocation54_spill]] %s5933_s19 }
  0x13   :  { %6000 = sst [smem:[#allocation55_spill]] %s5934_s20 }
  0x14   :  { %6001 = sst [smem:[#allocation56_spill]] %s5935_s21 }
  0x15   :  { %6002 = sst [smem:[#allocation57_spill]] %s5940_s26 }
  0x16   :  { %6003 = sst [smem:[#allocation58_spill]] %s5941_s27 }
  0x17   :  { %6004 = sst [smem:[#allocation59_spill]] %s5942_s28 }
  0x18   :  { %s6005_s20 = sld [smem:[#allocation37_spill]] }
  0x1e   :  { %34 = dma.hbm_to_smem %s6005_s20, 32, %s4933_s9, [#allocation3] }
  0x1f   :  { %36 = dma.hbm_to_smem %s5943_s1, 32, %s4934_s30, [#allocation3] }
  0x20   :  { %4891 = dma.done.wait [#allocation3], 64 }
  0x21   :  { %4892 = vsyncadd [#allocation3], 4294967232 }
  0x22   :  { %38 = sfence }
  0x23   :  { %39 = vsyncpa [#allocation7], 0 }
  0x24   :  { %40 = vsyncpa [#allocation10], 0 }
  0x25   :  { %41 = vsyncpa [#allocation13], 0 }
  0x26   :  { %42 = vsyncpa [#allocation16], 0 }
  0x27   :  { %43 = vsyncpa [#allocation19], 0 }
  0x28   :  { %44 = vsyncpa [#allocation8], 0 }
  0x29   :  { %46 = vsyncpa [#allocation8 + $0x1], 0  ;;  %s5107_s11 = smov 0   ;;  %s5109_s0 = smov 0  }
  0x2a   :  { %s5111_s20 = smov 0   ;;  %s5113_s12 = smov 0  }
  0x2b LB: > { %6006 = sst [smem:[#allocation29_spill]] %s4919_s11  ;;  %s5128_s1 = sadd.s32 4294967295, %s4931_s12   ;;  %s4931_s12 = sphi %s5113_s12, %s6074_s12   ;;  %s4927_s20 = sphi %s5111_s20, %s6077_s20   ;;  %s4923_s0 = sphi %s5109_s0, %s6076_s0   ;;  %s4919_s11 = sphi %s5107_s11, %s6075_s11  }
  0x2c   : > { %6007 = sst [smem:[#allocation30_spill]] %s4923_s0  ;;  %s3833_s29 = sadd.s32 4294967294, %s4931_s12  }
  0x2d   : > { %6008 = sst [smem:[#allocation31_spill]] %s4927_s20  ;;  %s5132_s3 = sadd.s32 1, %s4931_s12  }
  0x2e   : > { %6009 = sst [smem:[#allocation32_spill]] %s4931_s12  ;;  %s605_s8 = sadd.s32 1, %s4927_s20 }
  0x2f   : > { %6010 = sst [smem:[#allocation33_spill]] %s5132_s3  ;;  %s602_s13 = ssub.s32 %s4931_s12, %s5132_s3 }
  0x30   : > { %p615_p0 = scmp.ne.s32.totalorder %s4927_s20, %s4923_s0  ;;  %p603_p1 = scmp.eq.s32.totalorder %s602_s13, 0 }
  0x31   : > { %p616_p2 = scmp.eq.s32.totalorder %s5128_s1, 1  ;;  %p621_p3 = scmp.ne.s32.totalorder %s4923_s0, %s4919_s11 }
  0x32   : > { %p622_p4 = scmp.eq.s32.totalorder %s3833_s29, 1  ;;  %p3834_p7 = scmp.ge.s32.totalorder %s4931_s12, 1 }
  0x33   : > { %s5143_s2 = scalar_select %p603_p1, %s4927_s20, %s605_s8  }
  0x34   : > { %p5145_p5 = por %p616_p2, %p615_p0  ;;  %p5149_p6 = por %p622_p4, %p621_p3 }
  0x35   : > { %6011 = sst [smem:[#allocation34_spill]] %s5143_s2  ;;  %p629_p8 = scmp.lt.s32.totalorder %s4931_s12, 3 }
  0x36   : > { %s6012_s5 = scalar_select %p5145_p5, 1, 0 }
  0x37   : > { %s6014_s9 = scalar_select %p5149_p6, 1, 0 }
  0x38   : > { %6013 = sst [smem:[#allocation35_spill]] %s6012_s5  ;;  %p5954_p9 = scmp.eq.s32.totalorder %s5128_s1, 0 }
  0x39   : > { %6015 = sst [smem:[#allocation36_spill]] %s6014_s9  ;;  %p5156_p10 = pnand %p3834_p7, %p629_p8 }
  0x3a   : > { %s4935_s10 = smov [#allocation9]   ;;  %s4936_s4 = smov [#allocation12]  }
  0x3b   : > { %s6016_s6 = scalar_select %p5156_p10, 1, 0 }
  0x3c   : > { %s659_s30 = sshll.u32 %s4935_s10, 4  ;;  %p4390_p11 = pneg %p5156_p10  ;;  %s660_s30 = int_to_ptr.vmem [resolvable:$true] %s659_s30 }
  0x3d   : > { %s693_s7 = sshll.u32 %s4936_s4, 4  ;;  %s4937_s8 = smov [#allocation15]   ;;  %s694_s7 = int_to_ptr.vmem [resolvable:$true] %s693_s7 }
  0x3e   : > { %p5164_p12 = pnand %p5954_p9, %p4390_p11  ;;  %s715_s13 = sshll.u32 %s4937_s8, 4  ;;  %s5168_s13 = int_to_ptr.vmem [resolvable:$true] %s715_s13 }
  0x3f   : > { %s4626_s10 = scalar_lea.vmem %s660_s30, 16  ;;  %s4633_s4 = scalar_lea.vmem %s660_s30, 32 }
  0x40   : > { %p5172_p13 = pneg %p5164_p12  ;;  %p4627_p0 = scmp.ne.s32.totalorder %s660_s30, %s4626_s10 }
  0x41   : > { %p4634_p3 = scmp.lt.s32.totalorder %s660_s30, %s660_s30  ;;  %p4635_p4 = scmp.lt.s32.totalorder %s4633_s4, %s4626_s10 }
  0x42   : > { %p4629_p1 = pnand %p4627_p0, %p5172_p13 }
  0x43   : > { %p4636_p7 = por %p4635_p4, %p4634_p3 }
  0x44   : > { %p4630_p2 = pneg %p4629_p1 }
  0x46   : > { %p4637_p8 = pnand %p4636_p7, %p4630_p2 }
  0x48   : > { %4640 = shalt.err (!%p4637_p8)
}
  0x49   : > { %s6019_s3 = sld [smem:[#allocation41_spill]]  ;;  %s4652_s9 = scalar_lea.vmem %s694_s7, 16 }
  0x4a   : > { %p4653_p11 = scmp.ne.s32.totalorder %s694_s7, %s4652_s9  ;;  %s4659_s11 = scalar_lea.vmem %s694_s7, 32 }
  0x4b   : > { %p4660_p0 = scmp.lt.s32.totalorder %s694_s7, %s694_s7  ;;  %p4661_p1 = scmp.lt.s32.totalorder %s4659_s11, %s4652_s9 }
  0x4c   : > { %p4655_p9 = pnand %p4653_p11, %p5172_p13 }
  0x4d   : > { %p4662_p5 = por %p4661_p1, %p4660_p0 }
  0x4e   : > { %p4656_p6 = pneg %p4655_p9 }
  0x4f   : > { %4396 = dma.hbm_to_vmem [thread:$0]  (!%p5164_p12), %s6019_s3, 16, %s660_s30, [#allocation10]  }
  0x50   : > { %p4663_p10 = pnand %p4662_p5, %p4656_p6 }
  0x52   : > { %4666 = shalt.err (!%p4663_p10)
}
  0x53   : > { %s6020_s12 = sld [smem:[#allocation47_spill]]  ;;  %s4678_s20 = scalar_lea.vmem %s5168_s13, 16 }
  0x54   : > { %p4679_p2 = scmp.ne.s32.totalorder %s5168_s13, %s4678_s20  ;;  %s4685_s11 = scalar_lea.vmem %s5168_s13, 32 }
  0x55   : > { %p4686_p5 = scmp.lt.s32.totalorder %s5168_s13, %s5168_s13  ;;  %p4687_p6 = scmp.lt.s32.totalorder %s4685_s11, %s4678_s20 }
  0x56   : > { %p4681_p9 = pnand %p4679_p2, %p5172_p13 }
  0x57   : > { %p4688_p10 = por %p4687_p6, %p4686_p5 }
  0x58   : > { %p4682_p3 = pneg %p4681_p9 }
  0x59   : > { %4402 = dma.hbm_to_vmem [thread:$0]  (!%p5164_p12), %s6020_s12, 16, %s694_s7, [#allocation13]  }
  0x5a   : > { %p4689_p4 = pnand %p4688_p10, %p4682_p3 }
  0x5c   : > { %4692 = shalt.err (!%p4689_p4)
}
  0x5d   : > { %s6021_s30 = sld [smem:[#allocation49_spill]]  ;;  %s4938_s12 = smov [#allocation18]  }
  0x5e   : > { %s748_s7 = sshll.u32 %s4938_s12, 4  ;;  %s4939_s8 = smov [#allocation6]   ;;  %s749_s7 = int_to_ptr.vmem [resolvable:$true] %s748_s7 }
  0x5f   : > { %s648_s10 = sshll.u32 %s4939_s8, 4  ;;  %s4704_s4 = scalar_lea.vmem %s749_s7, 16  ;;  %s649_s10 = int_to_ptr.vmem [resolvable:$true] %s648_s10 }
  0x60   : > { %p4705_p7 = scmp.ne.s32.totalorder %s749_s7, %s4704_s4  ;;  %s4711_s20 = scalar_lea.vmem %s749_s7, 32 }
  0x61   : > { %p4712_p0 = scmp.lt.s32.totalorder %s749_s7, %s749_s7  ;;  %p4713_p1 = scmp.lt.s32.totalorder %s4711_s20, %s4704_s4 }
  0x62   : > { %p4707_p8 = pnand %p4705_p7, %p5172_p13 }
  0x63   : > { %4408 = dma.hbm_to_vmem [thread:$0]  (!%p5164_p12), %s6021_s30, 16, %s5168_s13, [#allocation16]  }
  0x64   : > { %p4708_p11 = pneg %p4707_p8  ;;  %p4714_p2 = por %p4713_p1, %p4712_p0 }
  0x66   : > { %p4715_p9 = pnand %p4714_p2, %p4708_p11 }
  0x68   : > { %4718 = shalt.err (!%p4715_p9)
}
  0x69   : > { %s6022_s18 = sld [smem:[#allocation53_spill]]  ;;  %s4730_s3 = scalar_lea.vmem %s649_s10, 128 }
  0x6a   : > { %p4731_p3 = scmp.ne.s32.totalorder %s649_s10, %s4730_s3  ;;  %p4738_p10 = scmp.lt.s32.totalorder %s649_s10, %s649_s10 }
  0x6b   : > { %p4739_p4 = scmp.lt.s32.totalorder %s4730_s3, %s4730_s3 }
  0x6c   : > { %p4733_p5 = pnand %p4731_p3, %p5172_p13 }
  0x6d   : > { %p4740_p7 = por %p4739_p4, %p4738_p10 }
  0x6e   : > { %p4734_p6 = pneg %p4733_p5 }
  0x6f   : > { %4414 = dma.hbm_to_vmem [thread:$0]  (!%p5164_p12), %s6022_s18, 16, %s749_s7, [#allocation19]  }
  0x70   : > { %p4741_p8 = pnand %p4740_p7, %p4734_p6 }
  0x72   : > { %4744 = shalt.err (!%p4741_p8)
}
  0x73   : > { %s6023_s12 = sld [smem:[#allocation40_spill]]  ;;  %s4940_s8 = smov [#allocation11]  }
  0x74   : > { %s670_s7 = sshll.u32 %s4940_s8, 4  ;;  %s4941_s4 = smov [#allocation14]   ;;  %s671_s7 = int_to_ptr.vmem [resolvable:$true] %s670_s7 }
  0x75   : > { %s704_s20 = sshll.u32 %s4941_s4, 4  ;;  %s4756_s11 = scalar_lea.vmem %s671_s7, 16  ;;  %s705_s20 = int_to_ptr.vmem [resolvable:$true] %s704_s20 }
  0x76   : > { %p4757_p11 = scmp.ne.s32.totalorder %s671_s7, %s4756_s11  ;;  %s4763_s13 = scalar_lea.vmem %s671_s7, 32 }
  0x77   : > { %p4764_p2 = scmp.lt.s32.totalorder %s671_s7, %s671_s7  ;;  %p4765_p9 = scmp.lt.s32.totalorder %s4763_s13, %s4756_s11 }
  0x78   : > { %p4759_p0 = pnand %p4757_p11, %p5172_p13 }
  0x79   : > { %4393 = dma.hbm_to_vmem [thread:$0]  (!%p5164_p12), %s6023_s12, 128, %s649_s10, [#allocation7]  }
  0x7a   : > { %p4760_p1 = pneg %p4759_p0  ;;  %p4766_p3 = por %p4765_p9, %p4764_p2 }
  0x7c   : > { %p4767_p5 = pnand %p4766_p3, %p4760_p1 }
  0x7e   : > { %4770 = shalt.err (!%p4767_p5)
}
  0x7f   : > { %s6024_s9 = sld [smem:[#allocation42_spill]]  ;;  %s4782_s30 = scalar_lea.vmem %s705_s20, 16 }
  0x80   : > { %p4783_p6 = scmp.ne.s32.totalorder %s705_s20, %s4782_s30  ;;  %s4789_s12 = scalar_lea.vmem %s705_s20, 32 }
  0x81   : > { %p4790_p7 = scmp.lt.s32.totalorder %s705_s20, %s705_s20  ;;  %p4791_p8 = scmp.lt.s32.totalorder %s4789_s12, %s4782_s30 }
  0x82   : > { %p4785_p10 = pnand %p4783_p6, %p5172_p13 }
  0x83   : > { %p4792_p11 = por %p4791_p8, %p4790_p7 }
  0x84   : > { %p4786_p4 = pneg %p4785_p10 }
  0x85   : > { %4399 = dma.hbm_to_vmem [thread:$0]  (!%p5164_p12), %s6024_s9, 16, %s671_s7, [#allocation10]  }
  0x86   : > { %p4793_p0 = pnand %p4792_p11, %p4786_p4 }
  0x88   : > { %4796 = shalt.err (!%p4793_p0)
}
  0x89   : > { %s6025_s11 = sld [smem:[#allocation48_spill]]  ;;  %s4942_s7 = smov [#allocation17]  }
  0x8a   : > { %s734_s13 = sshll.u32 %s4942_s7, 4  ;;  %s735_s13 = int_to_ptr.vmem [resolvable:$true] %s734_s13 }
  0x8b   : > { %s4808_s3 = scalar_lea.vmem %s735_s13, 256  ;;  %p4816_p3 = scmp.lt.s32.totalorder %s735_s13, %s735_s13 }
  0x8c   : > { %p4809_p1 = scmp.ne.s32.totalorder %s735_s13, %s4808_s3  ;;  %p4817_p5 = scmp.lt.s32.totalorder %s4808_s3, %s4808_s3 }
  0x8e   : > { %p4811_p2 = pnand %p4809_p1, %p5172_p13  ;;  %p4818_p6 = por %p4817_p5, %p4816_p3 }
  0x8f   : > { %4405 = dma.hbm_to_vmem [thread:$0]  (!%p5164_p12), %s6025_s11, 16, %s705_s20, [#allocation13]  }
  0x90   : > { %p4812_p9 = pneg %p4811_p2 }
  0x92   : > { %p4819_p10 = pnand %p4818_p6, %p4812_p9 }
  0x94   : > { %4822 = shalt.err (!%p4819_p10)
}
  0x95   : > { %s4943_s10 = smov 64   ;;  %s4944_s9 = smov 4  }
  0x96   : > { %s6026_s17 = sld [smem:[#allocation52_spill]]  ;;  %s4945_s12 = smov [#allocation20]  }
  0x97   : > { %s764_s8 = sshll.u32 %s4945_s12, 4  ;;  %s765_s8 = int_to_ptr.vmem [resolvable:$true] %s764_s8 }
  0x98   : > { %s4834_s4 = scalar_lea.vmem %s765_s8, 256  ;;  %p4842_p11 = scmp.lt.s32.totalorder %s765_s8, %s765_s8 }
  0x99   : > { %p4835_p4 = scmp.ne.s32.totalorder %s765_s8, %s4834_s4  ;;  %p4843_p0 = scmp.lt.s32.totalorder %s4834_s4, %s4834_s4 }
  0x9b   : > { %p4837_p7 = pnand %p4835_p4, %p5172_p13  ;;  %p4844_p1 = por %p4843_p0, %p4842_p11 }
  0x9c   : > { %4411 = dma.hbm_to_vmem [thread:$0]  (!%p5164_p12), %s6026_s17, 256, %s735_s13, [#allocation16], %s4943_s10, %s4943_s10, %s4944_s9  }
  0x9d   : > { %p4838_p8 = pneg %p4837_p7 }
  0x9f   : > { %p4845_p2 = pnand %p4844_p1, %p4838_p8 }
  0xa1   : > { %4848 = shalt.err (!%p4845_p2)
}
  0xa2   : > { %s6027_s21 = sld [smem:[#allocation56_spill]]  ;;  %p6028_p9 = scmp.ne.s32.totalorder %s6016_s6, 0 }
  0xa3   : > { %p6029_p3 = scmp.eq.s32.totalorder (!%p6028_p9), %s5128_s1, 0 }
  0xa4   : > { %798 = sbr.rel (%p6028_p9) target bundleno = 6560 (0x19a0), region = 124 }
  0xa8   : > { %4417 = dma.hbm_to_vmem [thread:$0]  (!%p5164_p12), %s6027_s21, 256, %s765_s8, [#allocation19], %s4943_s10, %s4943_s10, %s4944_s9  }
  0xa9   : > { %4894 = dma.done.wait (%p6029_p3), [#allocation7], 128   ;;  %p6030_p13 = pmov %p6029_p3 }
  0xaa   : > { %p6031_p5 = pmov %p6029_p3 }
  0xab   : > { %4896 = vsyncadd (%p6030_p13), [#allocation7], 4294967168 }
  0xac   : > { %4898 = dma.done.wait (%p6031_p5), [#allocation10], 32   ;;  %p6032_p6 = pmov %p6029_p3 }
  0xad   : > { %p6033_p10 = pmov %p6029_p3 }
  0xae   : > { %4900 = vsyncadd (%p6032_p6), [#allocation10], 4294967264 }
  0xaf   : > { %4902 = dma.done.wait (%p6033_p10), [#allocation13], 32   ;;  %p6034_p12 = pmov %p6029_p3 }
  0xb0   : > { %p6035_p4 = pmov %p6029_p3 }
  0xb1   : > { %4904 = vsyncadd (%p6034_p12), [#allocation13], 4294967264 }
  0xb2   : > { %4906 = dma.done.wait (%p6035_p4), [#allocation16], 272   ;;  %p6036_p7 = pmov %p6029_p3 }
  0xb3   : > { %p6037_p8 = pmov %p6029_p3 }
  0xb4   : > { %4908 = vsyncadd (%p6036_p7), [#allocation16], 4294967024 }
  0xb5   : > { %4910 = dma.done.wait (%p6037_p8), [#allocation19], 272   ;;  %p6038_p11 = pmov %p6029_p3 }
  0xb6   : > { %s5268_s2 = sshll.u32 %s5128_s1, 7  ;;  %vm900_vm0 = vcmask 253952   ;;  %s6039_s17 = sld [smem:[#allocation38_spill]]  ;;  %v5324_v8 = vld [vmem:[#allocation6] sm:$0xff]  ;;  %vm942_vm1 = vcmask 261120   ;;  %v4946_v19 = vmov 0.0  }
  0xb7   : > { %4912 = vsyncadd (%p6038_p11), [#allocation19], 4294967024  ;;  %s897_s6 = sld [smem:[#allocation4 + %s5268_s2]]  ;;  %s5959_s29 = sadd.s32 1, %s5268_s2  ;;  %4064 = vmatprep.subr.bf16.mxu0 %v4946_v19  ;;  %4072 = vmatprep.subr.bf16.mxu1 %v4946_v19  ;;  %vm4947_vm2 = vmmov 0   ;;  %vm1145_vm3 = vcmask 64512  }
  0xb8   : > { %s903_s13 = sld [smem:[#allocation4 + %s5959_s29]]  ;;  %s5960_s1 = sadd.s32 2, %s5268_s2  ;;  %4068 = vmatprep.mubr.msk.bf16.mxu0 %vm4947_vm2, %v4946_v19  ;;  %4076 = vmatprep.mubr.msk.bf16.mxu1 %vm4947_vm2, %v4946_v19  ;;  %v5351_v26 = vld [vmem:[#allocation9] ss:$0 sm:$0xff]  ;;  %v5353_v28 = vld [vmem:[#allocation11] ss:$0 sm:$0xff] }
  0xb9   : > { %s908_s3 = sld [smem:[#allocation4 + %s5960_s1]]  ;;  %s5962_s10 = sadd.s32 3, %s5268_s2  ;;  %vm1208_vm4 = vcmask 1043456   ;;  %vm1598_vm5 = vcmask 130048   ;;  %vm1600_vm6 = vcmask 195584   ;;  %vm1815_vm7 = vcmask 523264  }
  0xba   : > { %s913_s9 = sld [smem:[#allocation4 + %s5962_s10]]  ;;  %s5963_s30 = sadd.s32 4, %s5268_s2 }
  0xbb   : > { %s918_s20 = sld [smem:[#allocation4 + %s5963_s30]]  ;;  %s5964_s12 = sadd.s32 5, %s5268_s2 }
  0xbc   : > { %s923_s8 = sld [smem:[#allocation4 + %s5964_s12]]  ;;  %s5978_s4 = sadd.s32 6, %s5268_s2 }
  0xbd   : > { %s898_s18 = scalar_lea.vmem %s6039_s17, %s897_s6  ;;  %s928_s29 = sld [smem:[#allocation4 + %s5978_s4]] }
  0xbe   : > { %v899_v0 = vld [vmem:[%s898_s18] sm:$0x1]  ;;  %s904_s28 = scalar_lea.vmem %s6039_s17, %s903_s13  ;;  %s5977_s10 = sadd.s32 7, %s5268_s2 }
  0xbf   : > { %901 = vst.msk [vmem:[#allocation2] sm:$0x1] %vm900_vm0, %v899_v0  ;;  %v905_v1 = vld [vmem:[%s904_s28] sm:$0x1]  ;;  %s909_s12 = scalar_lea.vmem %s6039_s17, %s908_s3  ;;  %s933_s5 = sld [smem:[#allocation4 + %s5977_s10]] }
  0xc0   : > { %906 = vst.msk [vmem:[#allocation2 + $0x1] sm:$0x1] %vm900_vm0, %v905_v1  ;;  %v910_v2 = vld [vmem:[%s909_s12] sm:$0x1]  ;;  %s914_s18 = scalar_lea.vmem %s6039_s17, %s913_s9  ;;  %s6041_s21 = sld [smem:[#allocation44_spill]] }
  0xc1   : > { %911 = vst.msk [vmem:[#allocation2 + $0x2] sm:$0x1] %vm900_vm0, %v910_v2  ;;  %v915_v3 = vld [vmem:[%s914_s18] sm:$0x1]  ;;  %s919_s28 = scalar_lea.vmem %s6039_s17, %s918_s20  ;;  %s6042_s12 = sld [smem:[#allocation45_spill]] }
  0xc2   : > { %916 = vst.msk [vmem:[#allocation2 + $0x3] sm:$0x1] %vm900_vm0, %v915_v3  ;;  %v920_v4 = vld [vmem:[%s919_s28] sm:$0x1]  ;;  %s924_s3 = scalar_lea.vmem %s6039_s17, %s923_s8  ;;  %s6040_s8 = sld [smem:[#allocation43_spill]] }
  0xc3   : > { %921 = vst.msk [vmem:[#allocation2 + $0x4] sm:$0x1] %vm900_vm0, %v920_v4  ;;  %v925_v5 = vld [vmem:[%s924_s3] sm:$0x1]  ;;  %s929_s9 = scalar_lea.vmem %s6039_s17, %s928_s29  ;;  %s5969_s29 = smov 104  }
  0xc4   : > { %926 = vst.msk [vmem:[#allocation2 + $0x5] sm:$0x1] %vm900_vm0, %v925_v5  ;;  %v930_v6 = vld [vmem:[%s929_s9] sm:$0x1]  ;;  %s6044_s13 = sld [smem:[#allocation46_spill]]  ;;  %s5967_s28 = smov 8  }
  0xc5   : > { %931 = vst.msk [vmem:[#allocation2 + $0x6] sm:$0x1] %vm900_vm0, %v930_v6  ;;  %s934_s6 = scalar_lea.vmem %s6039_s17, %s933_s5  ;;  %s5975_s5 = smov 120  }
  0xc6   : > { %v935_v7 = vld [vmem:[%s934_s6] sm:$0x1]  ;;  %v4496_v18 = vld [vmem:[%s6041_s21 + $0x8] sm:$0xff]   ;;  %s5973_s6 = smov 112   ;;  %s5971_s27 = smov 16  }
  0xc7   : > { %936 = vst.msk [vmem:[#allocation2 + $0x7] sm:$0x1] %vm900_vm0, %v935_v7  ;;  %4073 = vmatpush3.bf16.msra.mxu1 %v4496_v18  ;;  %v4498_v21 = vld [vmem:[%s6041_s21] sm:$0xff]   ;;  %s6043_s9 = smov %s6042_s12  ;;  %v4499_v31 = vld [vmem:[%s6042_s12 + $0x8] sm:$0xff]   ;;  %s1889_s30 = sld [smem:[#allocation5 + %s5268_s2]] }
  0xc8   : > { %v4495_v17 = vld [vmem:[%s6040_s8 + $0x8] sm:$0xff]   ;;  %v4497_v20 = vld [vmem:[%s6040_s8] sm:$0xff]   ;;  %4074 = vmatprep.subr.bf16.mxu1 %v4946_v19  ;;  %s6045_s12 = sadd.s32 1, %s5268_s2  ;;  %s6046_s7 = sadd.s32 2, %s5268_s2 }
  0xc9   : > { %4065 = vmatpush3.bf16.msra.mxu0 %v4495_v17  ;;  %v4500_v33 = vld [vmem:[%s6043_s9] sm:$0xff]   ;;  %s1893_s20 = sld [smem:[#allocation5 + %s6045_s12]]  ;;  %s6047_s18 = sadd.s32 3, %s5268_s2 }
  0xca   : > { %4066 = vmatprep.subr.bf16.mxu0 %v4946_v19  ;;  %s1897_s11 = sld [smem:[#allocation5 + %s6046_s7]]  ;;  %s6050_s1 = sadd.s32 6, %s5268_s2 }
  0xcb   : > { %4075 = vmatpush3.bf16.msra.mxu1 %v4498_v21  ;;  %s1913_s3 = sld [smem:[#allocation5 + %s6050_s1]]  ;;  %s6051_s12 = sadd.s32 7, %s5268_s2 }
  0xcc   : > { %4088 = vmatprep.subr.bf16.mxu1 %v4946_v19  ;;  %s1917_s26 = sld [smem:[#allocation5 + %s6051_s12]] }
  0xcd   : > { %4067 = vmatpush3.bf16.msra.mxu0 %v4497_v20  ;;  %s1890_s0 = scalar_lea.vmem %s6039_s17, %s1889_s30  ;;  %s4953_s30 = smov 24  }
  0xce   : > { %v937_v9 = vld [vmem:[#allocation2] sm:$0xff]  ;;  %4080 = vmatprep.subr.bf16.mxu0 %v4946_v19  ;;  %s6060_s7 = sld [smem:[#allocation51_spill]] }
  0xcf   : > { %v939_v10 = vadd.f32 %v5324_v8, %v937_v9  ;;  %s1894_s14 = scalar_lea.vmem %s6039_s17, %s1893_s20  ;;  %s6066_s16 = sld [smem:[#allocation58_spill]] }
  0xd1   : > { %v943_v11 = vsel %vm942_vm1, %v939_v10, 0.0  ;;  %s1914_s12 = scalar_lea.vmem %s6039_s17, %s1913_s3 }
  0xd2   : > { %944 = vadd.xlane.f32.xlu0 %v943_v11 }
 0x15b   : > { %v945_v12 = vpop.xlane.xlu0 %944 }
 0x15c   : > { %v947_v13 = vmul.f32 0.03125, %v945_v12 }
 0x15e   : > { %v948_v14 = vsub.f32 %v939_v10, %v947_v13 }
 0x160   : > { %v949_v15 = vmul.f32 %v948_v14, %v948_v14 }
 0x162   : > { %v950_v16 = vsel %vm942_vm1, %v949_v15, 0.0 }
 0x163   : > { %951 = vadd.xlane.f32.xlu0 %v950_v16 }
 0x1ec   : > { %v952_v22 = vpop.xlane.xlu0 %951 }
 0x1ed   : > { %v953_v23 = vmul.f32 0.03125, %v952_v22 }
 0x1ef   : > { %v954_v24 = vadd.f32 1e-12, %v953_v23 }
 0x1f1   : > { %4533 = vrsqrt.f32 %v954_v24 }
 0x1fe   : > { %v4534_v25 = vpop.eup %4533 }
 0x1ff   : > { %v956_v27 = vmul.f32 %v4534_v25, %v948_v14 }
 0x201   : > { %v963_v29 = vmul.f32 %v5351_v26, %v956_v27 }
 0x203   : > { %v5357_v30 = vadd.f32 %v5353_v28, %v963_v29 }
 0x205   : > { %v971_v32 = vpack.c.bf16 %v5357_v30, %v5357_v30 }
 0x207   : > { %4069 = vmatmul.mubr.msk.bf16.vlgmr.msra.gmra.mxu0 %vm942_vm1, %v971_v32  ;;  %4077 = vmatmul.mubr.msk.bf16.vlgmr.msra.gmra.mxu1 %vm942_vm1, %v971_v32 }
 0x208   : > { %4081 = vmatpush3.bf16.msra.mxu0 %v4499_v31  ;;  %4084 = vmatprep.mubr.msk.bf16.mxu0 %vm4947_vm2, %v4946_v19 }
 0x209   : > { %4082 = vmatprep.subr.bf16.mxu0 %v4946_v19  ;;  %4090 = vmatprep.mubr.msk.bf16.mxu1 %vm4947_vm2, %v4946_v19 }
 0x20c   : > { %4083 = vmatpush3.bf16.msra.mxu0 %v4500_v33 }
 0x20d   : > { %4094 = vmatprep.subr.bf16.mxu0 %v4946_v19 }
 0x20f   : > { %4085 = vmatmul.mubr.msk.bf16.vlgmr.msra.gmra.mxu0 %vm942_vm1, %v971_v32 }
 0x210   : > { %4096 = vmatprep.mubr.msk.bf16.mxu0 %vm4947_vm2, %v4946_v19 }
 0x2c7   : > { %v1025_v34 = vpop.f32.mrf.mxu0  ;;  %v1081_v35 = vpop.f32.mrf.mxu1 }
 0x2c8   : > { %v1144_v36 = vpack.c.bf16 %v1081_v35, %v1081_v35  ;;  %v1143_v42 = vpack.c.bf16 %v1025_v34, %v1025_v34 }
 0x2c9   : > { %v4070_v37 = vpop.f32.mrf.mxu0  ;;  %v4078_v38 = vpop.f32.mrf.mxu1 }
 0x2ca   : > { %1367 = vrot.lane.b32.xlu0 %v1144_v36, %s5973_s6  ;;  %1256 = vrot.lane.b32.xlu1 %v1144_v36, %s5975_s5  ;;  %v1150_v39 = vsel %vm1145_vm3, %v1144_v36, 0 }
 0x2cb   : > { %v1028_v40 = vpop.f32.mrf.mxu0  ;;  %v1084_v41 = vpop.f32.mrf.mxu1  ;;  %4089 = vmatpush3.bf16.xpose.msra.mxu1 %v1150_v39 }
 0x2cc   : > { %4100 = vmatprep.subr.bf16.mxu1 %v4946_v19 }
 0x2cd   : > { %v4071_v43 = vpop.f32.mrf.mxu0  ;;  %v4079_v44 = vpop.f32.mrf.mxu1 }
 0x2ce   : > { %1253 = vrot.lane.b32.xlu1 %v1143_v42, %s5975_s5 }
 0x2cf   : > { %v1137_v45 = vpop.f32.mrf.mxu0 }
 0x2d0   : > { %v5383_v46 = vpack.c.bf16 %v1137_v45, %v1137_v45 }
 0x2d1   : > { %v4086_v47 = vpop.f32.mrf.mxu0 }
 0x2d2   : > { %1365 = vrot.lane.b32.xlu1 %v1143_v42, %s5973_s6  ;;  %4091 = vmatmul.mubr.msk.bf16.vlgmr.msra.gmra.mxu1 %vm1145_vm3, %v1143_v42  ;;  %v1210_v48 = vsel %vm1208_vm4, %v5383_v46, 0 }
 0x2d3   : > { %v1140_v49 = vpop.f32.mrf.mxu0  ;;  %4095 = vmatpush3.bf16.msra.mxu0 %v1210_v48  ;;  %4102 = vmatprep.mubr.msk.bf16.mxu1 %vm4947_vm2, %v4946_v19 }
 0x2d4   : > { %4106 = vmatprep.subr.bf16.mxu0 %v4946_v19 }
 0x2d5   : > { %v4087_v50 = vpop.f32.mrf.mxu0 }
 0x2d6   : > { %1477 = vrot.lane.b32.xlu1 %v1144_v36, %s5969_s29 }
 0x2da   : > { %1475 = vrot.lane.b32.xlu1 %v1143_v42, %s5969_s29 }
 0x33c   : > { %v1257_v51 = vpop.permute.xlu1 %1256  ;;  %v1368_v54 = vpop.permute.xlu0 %1367 }
 0x33d   : > { %v1262_v52 = vsel %vm1145_vm3, %v1257_v51, 0  ;;  %v1373_v56 = vsel %vm1145_vm3, %v1368_v54, 0 }
 0x33e   : > { %4101 = vmatpush3.bf16.xpose.msra.mxu1 %v1262_v52 }
 0x33f   : > { %4112 = vmatprep.subr.bf16.mxu1 %v4946_v19 }
 0x340   : > { %v1254_v53 = vpop.permute.xlu1 %1253 }
 0x344   : > { %v1366_v55 = vpop.permute.xlu1 %1365 }
 0x345   : > { %4103 = vmatmul.mubr.msk.bf16.vlgmr.msra.gmra.mxu1 %vm1145_vm3, %v1254_v53 }
 0x346   : > { %4113 = vmatpush3.bf16.xpose.msra.mxu1 %v1373_v56  ;;  %4114 = vmatprep.mubr.msk.bf16.mxu1 %vm4947_vm2, %v4946_v19 }
 0x347   : > { %4124 = vmatprep.subr.bf16.mxu1 %v4946_v19 }
 0x348   : > { %v1478_v57 = vpop.permute.xlu1 %1477 }
 0x349   : > { %v1483_v58 = vsel %vm1145_vm3, %v1478_v57, 0 }
 0x34c   : > { %v1476_v59 = vpop.permute.xlu1 %1475 }
 0x34d   : > { %4115 = vmatmul.mubr.msk.bf16.vlgmr.msra.gmra.mxu1 %vm1145_vm3, %v1366_v55 }
 0x34e   : > { %4125 = vmatpush3.bf16.xpose.msra.mxu1 %v1483_v58  ;;  %4126 = vmatprep.mubr.msk.bf16.mxu1 %vm4947_vm2, %v4946_v19 }
 0x34f   : > { %4136 = vmatprep.subr.bf16.mxu1 %v4946_v19 }
 0x355   : > { %4127 = vmatmul.mubr.msk.bf16.vlgmr.msra.gmra.mxu1 %vm1145_vm3, %v1476_v59 }
 0x356   : > { %4140 = vmatprep.mubr.msk.bf16.mxu1 %vm4947_vm2, %v4946_v19 }
 0x392   : > { %v1186_v60 = vpop.f32.mrf.mxu1 }
 0x393   : > { %v1192_v61 = vsel %vm1145_vm3, %v1186_v60, -inf }
 0x394   : > { %1193 = vmax.xlane.f32.xlu1 %v1192_v61  ;;  %v4092_v62 = vpop.f32.mrf.mxu1 }
 0x396   : > { %v1189_v63 = vpop.f32.mrf.mxu1 }
 0x398   : > { %v4093_v0 = vpop.f32.mrf.mxu1 }
 0x405   : > { %v1298_v1 = vpop.f32.mrf.mxu1 }
 0x406   : > { %v1304_v2 = vsel %vm1145_vm3, %v1298_v1, -inf }
 0x407   : > { %1305 = vmax.xlane.f32.xlu0 %v1304_v2  ;;  %v4104_v3 = vpop.f32.mrf.mxu1 }
 0x408   : > { %v4501_v3 = vld [vmem:[%s6044_s13 + $0x8] sm:$0xff]  }
 0x409   : > { %v1301_v4 = vpop.f32.mrf.mxu1  ;;  %4137 = vmatpush3.bf16.msra.mxu1 %v4501_v3 }
 0x40a   : > { %4138 = vmatprep.subr.bf16.mxu1 %v4946_v19 }
 0x40b   : > { %v4105_v5 = vpop.f32.mrf.mxu1 }
 0x40d   : > { %v1409_v6 = vpop.f32.mrf.mxu1 }
 0x40e   : > { %v1415_v7 = vsel %vm1145_vm3, %v1409_v6, -inf }
 0x40f   : > { %1416 = vmax.xlane.f32.xlu1 %v1415_v7  ;;  %v4116_v9 = vpop.f32.mrf.mxu1 }
 0x411   : > { %v1412_v10 = vpop.f32.mrf.mxu1 }
 0x413   : > { %v4117_v11 = vpop.f32.mrf.mxu1 }
 0x415   : > { %v1519_v12 = vpop.f32.mrf.mxu1 }
 0x416   : > { %v1525_v13 = vsel %vm1145_vm3, %v1519_v12, -inf }
 0x417   : > { %1526 = vmax.xlane.f32.xlu1 %v1525_v13  ;;  %v4128_v14 = vpop.f32.mrf.mxu1  ;;  %v4502_v13 = vld [vmem:[%s6044_s13] sm:$0xff]  }
 0x418   : > { %4139 = vmatpush3.bf16.msra.mxu1 %v4502_v13  ;;  %v1891_v14 = vld [vmem:[%s1890_s0] sm:$0x1] }
 0x419   : > { %v1522_v15 = vpop.f32.mrf.mxu1  ;;  %4152 = vmatprep.subr.bf16.mxu1 %v4946_v19  ;;  %1892 = vst.msk [vmem:[#allocation2] sm:$0x1] %vm900_vm0, %v1891_v14 }
 0x41a   : > { %v1895_v15 = vld [vmem:[%s1894_s14] sm:$0x1]  ;;  %s6055_s14 = smov 8  }
 0x41b   : > { %v4129_v16 = vpop.f32.mrf.mxu1  ;;  %1896 = vst.msk [vmem:[#allocation2 + $0x1] sm:$0x1] %vm900_vm0, %v1895_v15  ;;  %v4509_v15 = vld [vmem:[%s5937_s23 + $0x18] sm:$0xff]  }
 0x41d   : > { %v1194_v17 = vpop.xlane.xlu1 %1193 }
 0x41e   : > { %v1195_v18 = vsub.f32 %v1186_v60, %v1194_v17 }
 0x420   : > { %v1196_v20 = vmul.f32 1.442695, %v1195_v18 }
 0x422   : > { %4535 = vpow2.f32 %v1196_v20 }
 0x42f   : > { %v4536_v21 = vpop.eup %4535 }
 0x430   : > { %v1198_v22 = vsel %vm1145_vm3, %v4536_v21, 0.0 }
 0x431   : > { %1199 = vadd.xlane.f32.xlu0 %v1198_v22 }
 0x490   : > { %v1306_v23 = vpop.xlane.xlu0 %1305 }
 0x491   : > { %v1307_v24 = vsub.f32 %v1298_v1, %v1306_v23 }
 0x493   : > { %v1308_v25 = vmul.f32 1.442695, %v1307_v24  ;;  %v1915_v24 = vld [vmem:[%s1914_s12] sm:$0x1]  ;;  %s6067_s12 = sld [smem:[#allocation59_spill]] }
 0x494   : > { %1916 = vst.msk [vmem:[#allocation2 + $0x6] sm:$0x1] %vm900_vm0, %v1915_v24 }
 0x495   : > { %4537 = vpow2.f32 %v1308_v25 }
 0x498   : > { %v1417_v27 = vpop.xlane.xlu1 %1416 }
 0x499   : > { %v1418_v29 = vsub.f32 %v1409_v6, %v1417_v27  ;;  %s5873_s3 = scalar_lea.hbm %s6067_s12, %s5268_s2 }
 0x49b   : > { %v1419_v31 = vmul.f32 1.442695, %v1418_v29 }
 0x49d   : > { %4539 = vpow2.f32 %v1419_v31 }
 0x4a0   : > { %v1527_v37 = vpop.xlane.xlu1 %1526 }
 0x4a1   : > { %v1528_v38 = vsub.f32 %v1519_v12, %v1527_v37 }
 0x4a2   : > { %v4538_v32 = vpop.eup %4537 }
 0x4a3   : > { %v1310_v33 = vsel %vm1145_vm3, %v4538_v32, 0.0  ;;  %v1529_v39 = vmul.f32 1.442695, %v1528_v38 }
 0x4a4   : > { %1311 = vadd.xlane.f32.xlu1 %v1310_v33 }
 0x4aa   : > { %v4540_v34 = vpop.eup %4539 }
 0x4ab   : > { %v1421_v35 = vsel %vm1145_vm3, %v4540_v34, 0.0 }
 0x4ac   : > { %1422 = vadd.xlane.f32.xlu0 %v1421_v35 }
 0x4b5   : > { %1427 = vrot.lane.b32.xlu1 %v5383_v46, %s5973_s6  ;;  %s6049_s6 = sadd.s32 5, %s5268_s2 }
 0x4ba   : > { %v1200_v36 = vpop.xlane.xlu0 %1199 }
 0x4bb   : > { %4541 = vrcp.f32 %v1200_v36 }
 0x4bc   : > { %4543 = vpow2.f32 %v1529_v39 }
 0x4c2   : > { %1317 = vrot.lane.b32.xlu0 %v5383_v46, %s5975_s5  ;;  %s1909_s5 = sld [smem:[#allocation5 + %s6049_s6]]  ;;  %s1898_s6 = scalar_lea.vmem %s6039_s17, %s1897_s11 }
 0x4c3   : > { %v1899_v17 = vld [vmem:[%s1898_s6] sm:$0x1]  ;;  %s6058_s11 = sld [smem:[#allocation50_spill]] }
 0x4c4   : > { %1900 = vst.msk [vmem:[#allocation2 + $0x2] sm:$0x1] %vm900_vm0, %v1899_v17  ;;  %v4511_v17 = vld [vmem:[%s5937_s23 + $0x8] sm:$0xff]  }
 0x4c8   : > { %v4542_v40 = vpop.eup %4541 }
 0x4c9   : > { %v1202_v41 = vmul.f32 %v4542_v40, %v4536_v21  ;;  %v4544_v43 = vpop.eup %4543 }
 0x4ca   : > { %v1531_v44 = vsel %vm1145_vm3, %v4544_v43, 0.0 }
 0x4cb   : > { %v1203_v42 = vpack.c.bf16 %v1202_v41, %v1202_v41  ;;  %v5510_v41 = vld [vmem:[#allocation12] ss:$0 sm:$0xff] }
 0x4cd   : > { %4097 = vmatmul.mubr.msk.bf16.vlgmr.msra.gmra.mxu0 %vm1145_vm3, %v1203_v42 }
 0x4ce   : > { %4108 = vmatprep.mubr.msk.bf16.mxu0 %vm4947_vm2, %v4946_v19 }
 0x4d9   : > { %1532 = vadd.xlane.f32.xlu1 %v1531_v44 }
 0x4ea   : > { %1537 = vrot.lane.b32.xlu1 %v5383_v46, %s5969_s29  ;;  %s6048_s29 = sadd.s32 4, %s5268_s2 }
 0x52d   : > { %v1312_v45 = vpop.xlane.xlu1 %1311 }
 0x52e   : > { %4545 = vrcp.f32 %v1312_v45 }
 0x531   : > { %v1428_v52 = vpop.permute.xlu1 %1427 }
 0x532   : > { %v1433_v54 = vsel %vm1208_vm4, %v1428_v52, 0 }
 0x535   : > { %v1423_v47 = vpop.xlane.xlu0 %1422 }
 0x536   : > { %4547 = vrcp.f32 %v1423_v47 }
 0x539   : > { %v1318_v48 = vpop.permute.xlu0 %1317 }
 0x53a   : > { %v1323_v49 = vsel %vm1208_vm4, %v1318_v48, 0 }
 0x53b   : > { %v4546_v50 = vpop.eup %4545  ;;  %4107 = vmatpush3.bf16.msra.mxu0 %v1323_v49 }
 0x53c   : > { %4118 = vmatprep.subr.bf16.mxu0 %v4946_v19  ;;  %v1314_v51 = vmul.f32 %v4546_v50, %v4538_v32 }
 0x53e   : > { %v1315_v53 = vpack.c.bf16 %v1314_v51, %v1314_v51 }
 0x540   : > { %4109 = vmatmul.mubr.msk.bf16.vlgmr.msra.gmra.mxu0 %vm1145_vm3, %v1315_v53 }
 0x541   : > { %4119 = vmatpush3.bf16.msra.mxu0 %v1433_v54  ;;  %4120 = vmatprep.mubr.msk.bf16.mxu0 %vm4947_vm2, %v4946_v19 }
 0x542   : > { %4130 = vmatprep.subr.bf16.mxu0 %v4946_v19 }
 0x543   : > { %v4548_v46 = vpop.eup %4547 }
 0x544   : > { %v1425_v55 = vmul.f32 %v4548_v46, %v4540_v34 }
 0x546   : > { %v1426_v56 = vpack.c.bf16 %v1425_v55, %v1425_v55 }
 0x548   : > { %4121 = vmatmul.mubr.msk.bf16.vlgmr.msra.gmra.mxu0 %vm1145_vm3, %v1426_v56 }
 0x549   : > { %4132 = vmatprep.mubr.msk.bf16.mxu0 %vm4947_vm2, %v4946_v19 }
 0x562   : > { %v1533_v57 = vpop.xlane.xlu1 %1532 }
 0x563   : > { %4549 = vrcp.f32 %v1533_v57  ;;  %v4503_v57 = vld [vmem:[#allocation20 + $0x8] sm:$0xff]  }
 0x566   : > { %v1538_v58 = vpop.permute.xlu1 %1537 }
 0x567   : > { %v1543_v59 = vsel %vm1208_vm4, %v1538_v58, 0  ;;  %v4504_v58 = vld [vmem:[#allocation20] sm:$0xff]  }
 0x568   : > { %4131 = vmatpush3.bf16.msra.mxu0 %v1543_v59 }
 0x569   : > { %4144 = vmatprep.subr.bf16.mxu0 %v4946_v19 }
 0x570   : > { %v4550_v60 = vpop.eup %4549 }
 0x571   : > { %v1535_v61 = vmul.f32 %v4550_v60, %v4544_v43 }
 0x573   : > { %v1536_v62 = vpack.c.bf16 %v1535_v61, %v1535_v61 }
 0x575   : > { %4133 = vmatmul.mubr.msk.bf16.vlgmr.msra.gmra.mxu0 %vm1145_vm3, %v1536_v62 }
 0x576   : > { %4148 = vmatprep.mubr.msk.bf16.mxu0 %vm4947_vm2, %v4946_v19  ;;  %4145 = vmatpush3.bf16.msra.mxu0 %v4503_v57 }
 0x577   : > { %4146 = vmatprep.subr.bf16.mxu0 %v4946_v19 }
 0x57a   : > { %4147 = vmatpush3.bf16.msra.mxu0 %v4504_v58 }
 0x57b   : > { %4164 = vmatprep.subr.bf16.mxu0 %v4946_v19 }
 0x58d   : > { %v5441_v63 = vpop.f32.mrf.mxu0 }
 0x58f   : > { %v4098_v0 = vpop.f32.mrf.mxu0 }
 0x591   : > { %v1249_v1 = vpop.f32.mrf.mxu0 }
 0x593   : > { %v4099_v2 = vpop.f32.mrf.mxu0 }
 0x594   : > { %v5519_v2 = vld [vmem:[#allocation14] ss:$0 sm:$0xff] }
 0x600   : > { %v1359_v4 = vpop.f32.mrf.mxu0 }
 0x601   : > { %1586 = vrot.lane.b32.xlu0 %v1359_v4, %s5967_s28  ;;  %s1901_s28 = sld [smem:[#allocation5 + %s6047_s18]]  ;;  %s1910_s18 = scalar_lea.vmem %s6039_s17, %s1909_s5  ;;  %v5521_v4 = vld [vmem:[#allocation15] ss:$0 sm:$0xff] }
 0x602   : > { %v4110_v5 = vpop.f32.mrf.mxu0  ;;  %v1911_v22 = vld [vmem:[%s1910_s18] sm:$0x1]  ;;  %s6054_s5 = smov 104   ;;  %s6059_s18 = smov %s6058_s11 }
 0x603   : > { %1912 = vst.msk [vmem:[#allocation2 + $0x5] sm:$0x1] %vm900_vm0, %v1911_v22 }
 0x604   : > { %v1362_v6 = vpop.f32.mrf.mxu0 }
 0x606   : > { %v4111_v7 = vpop.f32.mrf.mxu0 }
 0x607   : > { %s1902_s0 = scalar_lea.vmem %s6039_s17, %s1901_s28 }
 0x608   : > { %v1469_v9 = vpop.f32.mrf.mxu0  ;;  %v1903_v18 = vld [vmem:[%s1902_s0] sm:$0x1]  ;;  %s6057_s0 = sld [smem:[#allocation57_spill]] }
 0x609   : > { %1590 = vrot.lane.b32.xlu1 %v1469_v9, %s5971_s27  ;;  %s1905_s27 = sld [smem:[#allocation5 + %s6048_s29]]  ;;  %1904 = vst.msk [vmem:[#allocation2 + $0x3] sm:$0x1] %vm900_vm0, %v1903_v18  ;;  %s1918_s29 = scalar_lea.vmem %s6039_s17, %s1917_s26  ;;  %v4505_v9 = vld [vmem:[%s6040_s8 + $0x8] sm:$0xff]   ;;  %v4512_v18 = vld [vmem:[%s5937_s23] sm:$0xff]  }
 0x60a   : > { %v4122_v10 = vpop.f32.mrf.mxu0  ;;  %v1919_v25 = vld [vmem:[%s1918_s29] sm:$0x1]  ;;  %s6052_s29 = smov 120   ;;  %s6053_s26 = smov 112  }
 0x60b   : > { %1920 = vst.msk [vmem:[#allocation2 + $0x7] sm:$0x1] %vm900_vm0, %v1919_v25 }
 0x60c   : > { %v1472_v11 = vpop.f32.mrf.mxu0 }
 0x60e   : > { %v4123_v12 = vpop.f32.mrf.mxu0 }
 0x60f   : > { %s1906_s19 = scalar_lea.vmem %s6039_s17, %s1905_s27  ;;  %v4506_v12 = vld [vmem:[%s6040_s8] sm:$0xff]   ;;  %s6068_s27 = smov %s6067_s12 }
 0x610   : > { %v1907_v21 = vld [vmem:[%s1906_s19] sm:$0x1]  ;;  %s6056_s19 = smov 16  }
 0x611   : > { %1908 = vst.msk [vmem:[#allocation2 + $0x4] sm:$0x1] %vm900_vm0, %v1907_v21 }
 0x618   : > { %v1921_v29 = vld [vmem:[#allocation2] sm:$0xff] }
 0x619   : > { %v1923_v31 = vadd.f32 %v1921_v29, %v5324_v8 }
 0x61b   : > { %v1926_v32 = vsel %vm942_vm1, %v1923_v31, 0.0 }
 0x635   : > { %v1579_v16 = vpop.f32.mrf.mxu0 }
 0x636   : > { %1594 = vrot.lane.b32.xlu0 %v1579_v16, %s4953_s30  ;;  %v4510_v16 = vld [vmem:[%s5937_s23 + $0x10] sm:$0xff]  }
 0x637   : > { %v4134_v20 = vpop.f32.mrf.mxu0 }
 0x638   : > { %v3881_v20 = vld [vmem:[%s5936_s22] ss:$0 sm:$0xff] }
 0x639   : > { %v1582_v23 = vpop.f32.mrf.mxu0 }
 0x63b   : > { %v4135_v27 = vpop.f32.mrf.mxu0 }
 0x655   : > { %1927 = vadd.xlane.f32.xlu0 %v1926_v32 }
 0x673   : > { %v1587_v33 = vpop.permute.xlu0 %1586 }
 0x674   : > { %v1597_v35 = vsel %vm1145_vm3, %v5441_v63, %v1587_v33 }
 0x67b   : > { %v1591_v34 = vpop.permute.xlu1 %1590 }
 0x67c   : > { %v1599_v36 = vsel %vm1598_vm5, %v1597_v35, %v1591_v34 }
 0x6a8   : > { %v1595_v37 = vpop.permute.xlu0 %1594 }
 0x6a9   : > { %v1601_v38 = vsel %vm1600_vm6, %v1599_v36, %v1595_v37 }
 0x6aa   : > { %v1602_v39 = vpack.c.bf16 %v1601_v38, %v1601_v38 }
 0x6ac   : > { %4141 = vmatmul.mubr.msk.bf16.vlgmr.msra.gmra.mxu1 %vm942_vm1, %v1602_v39 }
 0x6ad   : > { %4160 = vmatprep.mubr.msk.bf16.mxu1 %vm4947_vm2, %v4946_v19  ;;  %4153 = vmatpush3.bf16.msra.mxu1 %v4509_v15 }
 0x6ae   : > { %4154 = vmatprep.subr.bf16.mxu1 %v4946_v19 }
 0x6b1   : > { %4155 = vmatpush3.bf16.msra.mxu1 %v4510_v16 }
 0x6b2   : > { %4156 = vmatprep.subr.bf16.mxu1 %v4946_v19 }
 0x6b5   : > { %4157 = vmatpush3.bf16.msra.mxu1 %v4511_v17 }
 0x6b6   : > { %4158 = vmatprep.subr.bf16.mxu1 %v4946_v19 }
 0x6b9   : > { %4159 = vmatpush3.bf16.msra.mxu1 %v4512_v18 }
 0x6ba   : > { %4180 = vmatprep.subr.bf16.mxu1 %v4946_v19 }
 0x6de   : > { %v1928_v8 = vpop.xlane.xlu0 %1927 }
 0x6df   : > { %v1929_v40 = vmul.f32 0.03125, %v1928_v8 }
 0x6e1   : > { %v1930_v42 = vsub.f32 %v1923_v31, %v1929_v40 }
 0x6e3   : > { %v1931_v48 = vmul.f32 %v1930_v42, %v1930_v42 }
 0x6e5   : > { %v1932_v52 = vsel %vm942_vm1, %v1931_v48, 0.0 }
 0x76c   : > { %v1663_v43 = vpop.f32.mrf.mxu1 }
 0x76d   : > { %v1664_v44 = vadd.f32 %v5510_v41, %v1663_v43 }
 0x76e   : > { %v4142_v45 = vpop.f32.mrf.mxu1 }
 0x76f   : > { %v1669_v47 = vadd.f32 %v1664_v44, %v5357_v30 }
 0x770   : > { %v1666_v49 = vpop.f32.mrf.mxu1 }
 0x771   : > { %v1672_v50 = vsel %vm942_vm1, %v1669_v47, 0.0 }
 0x772   : > { %1673 = vadd.xlane.f32.xlu1 %v1672_v50  ;;  %v4143_v51 = vpop.f32.mrf.mxu1  ;;  %v4513_v50 = vld [vmem:[%s6043_s9 + $0x8] sm:$0xff]  }
 0x776   : > { %1933 = vadd.xlane.f32.xlu1 %v1932_v52  ;;  %v4514_v52 = vld [vmem:[%s6043_s9] sm:$0xff]  }
 0x7fb   : > { %v1674_v53 = vpop.xlane.xlu1 %1673 }
 0x7fc   : > { %v1675_v54 = vmul.f32 0.03125, %v1674_v53 }
 0x7fe   : > { %v1676_v46 = vsub.f32 %v1669_v47, %v1675_v54 }
 0x7ff   : > { %v1934_v30 = vpop.xlane.xlu1 %1933 }
 0x800   : > { %v1677_v55 = vmul.f32 %v1676_v46, %v1676_v46  ;;  %v1935_v59 = vmul.f32 0.03125, %v1934_v30 }
 0x802   : > { %v1678_v56 = vsel %vm942_vm1, %v1677_v55, 0.0  ;;  %v1936_v60 = vadd.f32 1e-12, %v1935_v59 }
 0x803   : > { %1679 = vadd.xlane.f32.xlu0 %v1678_v56 }
 0x804   : > { %4551 = vrsqrt.f32 %v1936_v60  ;;  %v2125_v60 = vlaneseq }
 0x811   : > { %v4552_v0 = vpop.eup %4551 }
 0x812   : > { %v1938_v5 = vmul.f32 %v4552_v0, %v1930_v42 }
 0x814   : > { %v1945_v11 = vmul.f32 %v5351_v26, %v1938_v5  ;;  %v4507_v26 = vld [vmem:[%s6041_s21 + $0x8] sm:$0xff]  }
 0x816   : > { %v5541_v13 = vadd.f32 %v5353_v28, %v1945_v11  ;;  %v4508_v28 = vld [vmem:[%s6041_s21] sm:$0xff]  }
 0x818   : > { %v5548_v14 = vpack.c.bf16 %v5541_v13, %v5541_v13 }
 0x88c   : > { %v1680_v61 = vpop.xlane.xlu0 %1679 }
 0x88d   : > { %v1681_v62 = vmul.f32 0.03125, %v1680_v61  ;;  %v2126_v61 = vshrl.u32 %v2125_v60, 7 }
 0x88f   : > { %v1682_v63 = vadd.f32 1e-12, %v1681_v62  ;;  %v2128_v62 = vand.u32 127, %v2125_v60 }
 0x891   : > { %4553 = vrsqrt.f32 %v1682_v63  ;;  %vm2129_vm8 = vcmp.le.s32.totalorder %v2128_v62, %v2126_v61  ;;  %v4954_v63 = vmov -1e+30  }
 0x892   : > { %v2130_v0 = vsel %vm2129_vm8, 0.0, %v4954_v63 }
 0x89e   : > { %v4554_v1 = vpop.eup %4553 }
 0x89f   : > { %v1684_v3 = vmul.f32 %v4554_v1, %v1676_v46 }
 0x8a1   : > { %v1691_v6 = vmul.f32 %v5519_v2, %v1684_v3 }
 0x8a3   : > { %v5525_v7 = vadd.f32 %v5521_v4, %v1691_v6 }
 0x8a5   : > { %v1699_v10 = vpack.c.bf16 %v5525_v7, %v5525_v7 }
 0x8a7   : > { %4149 = vmatmul.mubr.msk.bf16.vlgmr.msra.gmra.mxu0 %vm942_vm1, %v1699_v10 }
 0x8a8   : > { %4165 = vmatpush3.bf16.msra.mxu0 %v4505_v9  ;;  %4168 = vmatprep.mubr.msk.bf16.mxu0 %vm4947_vm2, %v4946_v19 }
 0x8a9   : > { %4166 = vmatprep.subr.bf16.mxu0 %v4946_v19 }
 0x8ac   : > { %4167 = vmatpush3.bf16.msra.mxu0 %v4506_v12 }
 0x8ad   : > { %4172 = vmatprep.subr.bf16.mxu0 %v4946_v19 }
 0x8af   : > { %4169 = vmatmul.mubr.msk.bf16.vlgmr.msra.gmra.mxu0 %vm942_vm1, %v5548_v14 }
 0x8b0   : > { %4173 = vmatpush3.bf16.msra.mxu0 %v4507_v26  ;;  %4176 = vmatprep.mubr.msk.bf16.mxu0 %vm4947_vm2, %v4946_v19 }
 0x8b1   : > { %4174 = vmatprep.subr.bf16.mxu0 %v4946_v19 }
 0x8b4   : > { %4175 = vmatpush3.bf16.msra.mxu0 %v4508_v28 }
 0x8b5   : > { %4188 = vmatprep.subr.bf16.mxu0 %v4946_v19 }
 0x8b7   : > { %4177 = vmatmul.mubr.msk.bf16.vlgmr.msra.gmra.mxu0 %vm942_vm1, %v5548_v14 }
 0x8b8   : > { %4190 = vmatprep.mubr.msk.bf16.mxu0 %vm4947_vm2, %v4946_v19 }
 0x967   : > { %v1760_v21 = vpop.f32.mrf.mxu0 }
 0x968   : > { %v1761_v22 = vadd.f32 %v3881_v20, %v1760_v21 }
 0x969   : > { %v4150_v23 = vpop.f32.mrf.mxu0 }
 0x96a   : > { %v1766_v24 = vmul.f32 %v1761_v22, %v1761_v22 }
 0x96b   : > { %v1763_v25 = vpop.f32.mrf.mxu0 }
 0x96c   : > { %v1767_v27 = vmul.f32 %v1766_v24, %v1761_v22 }
 0x96d   : > { %v4151_v29 = vpop.f32.mrf.mxu0 }
 0x96e   : > { %v1768_v31 = vmul.f32 0.044715, %v1767_v27 }
 0x96f   : > { %v2007_v32 = vpop.f32.mrf.mxu0 }
 0x970   : > { %v1769_v33 = vadd.f32 %v1768_v31, %v1761_v22  ;;  %v2131_v34 = vpack.c.bf16 %v2007_v32, %v2007_v32 }
 0x971   : > { %v4170_v35 = vpop.f32.mrf.mxu0 }
 0x972   : > { %v1770_v36 = vmul.f32 0.7978846, %v1769_v33  ;;  %2239 = vrot.lane.b32.xlu1 %v2131_v34, %s6052_s29 }
 0x973   : > { %v2010_v37 = vpop.f32.mrf.mxu0 }
 0x974   : > { %4555 = vtanh.f32 %v1770_v36 }
 0x975   : > { %v4171_v38 = vpop.f32.mrf.mxu0 }
 0x977   : > { %v2063_v39 = vpop.f32.mrf.mxu0 }
 0x978   : > { %v2132_v8 = vpack.c.bf16 %v2063_v39, %v2063_v39 }
 0x979   : > { %v4178_v40 = vpop.f32.mrf.mxu0 }
 0x97a   : > { %2353 = vrot.lane.b32.xlu1 %v2132_v8, %s6053_s26  ;;  %2242 = vrot.lane.b32.xlu0 %v2132_v8, %s6052_s29  ;;  %v2137_v42 = vsel %vm1145_vm3, %v2132_v8, 0 }
 0x97b   : > { %v2066_v43 = vpop.f32.mrf.mxu0  ;;  %4189 = vmatpush3.bf16.xpose.msra.mxu0 %v2137_v42 }
 0x97c   : > { %4200 = vmatprep.subr.bf16.mxu0 %v4946_v19 }
 0x97d   : > { %v4179_v44 = vpop.f32.mrf.mxu0 }
 0x97e   : > { %2463 = vrot.lane.b32.xlu1 %v2132_v8, %s6054_s5  ;;  %2351 = vrot.lane.b32.xlu0 %v2131_v34, %s6053_s26 }
 0x981   : > { %v4556_v45 = vpop.eup %4555 }
 0x982   : > { %v1772_v47 = vadd.f32 1.0, %v4556_v45  ;;  %2461 = vrot.lane.b32.xlu0 %v2131_v34, %s6054_s5  ;;  %4191 = vmatmul.mubr.msk.bf16.vlgmr.msra.gmra.mxu0 %vm1145_vm3, %v2131_v34 }
 0x983   : > { %4202 = vmatprep.mubr.msk.bf16.mxu0 %vm4947_vm2, %v4946_v19 }
 0x984   : > { %v1773_v48 = vmul.f32 0.5, %v1772_v47 }
 0x986   : > { %v1774_v49 = vmul.f32 %v1773_v48, %v1761_v22 }
 0x988   : > { %v1775_v51 = vpack.c.bf16 %v1774_v49, %v1774_v49 }
 0x98a   : > { %4161 = vmatmul.mubr.msk.bf16.vlgmr.msra.gmra.mxu1 %vm1815_vm7, %v1775_v51 }
 0x98b   : > { %4181 = vmatpush3.bf16.msra.mxu1 %v4513_v50  ;;  %4184 = vmatprep.mubr.msk.bf16.mxu1 %vm4947_vm2, %v4946_v19 }
 0x98c   : > { %4182 = vmatprep.subr.bf16.mxu1 %v4946_v19 }
 0x98f   : > { %4183 = vmatpush3.bf16.msra.mxu1 %v4514_v52 }
 0x990   : > { %4194 = vmatprep.subr.bf16.mxu1 %v4946_v19 }
 0x992   : > { %4185 = vmatmul.mubr.msk.bf16.vlgmr.msra.gmra.mxu1 %vm942_vm1, %v5548_v14 }
 0x993   : > { %4196 = vmatprep.mubr.msk.bf16.mxu1 %vm4947_vm2, %v4946_v19 }
 0x9e4   : > { %v2240_v46 = vpop.permute.xlu1 %2239 }
 0x9ec   : > { %v2243_v53 = vpop.permute.xlu0 %2242  ;;  %v2354_v55 = vpop.permute.xlu1 %2353 }
 0x9ed   : > { %v2248_v54 = vsel %vm1145_vm3, %v2243_v53, 0  ;;  %v2359_v56 = vsel %vm1145_vm3, %v2354_v55, 0 }
 0x9ee   : > { %4201 = vmatpush3.bf16.xpose.msra.mxu0 %v2248_v54 }
 0x9ef   : > { %4212 = vmatprep.subr.bf16.mxu0 %v4946_v19 }
 0x9f0   : > { %v2464_v57 = vpop.permute.xlu1 %2463  ;;  %v2352_v58 = vpop.permute.xlu0 %2351 }
 0x9f1   : > { %v2469_v30 = vsel %vm1145_vm3, %v2464_v57, 0 }
 0x9f4   : > { %v2462_v59 = vpop.permute.xlu0 %2461 }
 0x9f5   : > { %4203 = vmatmul.mubr.msk.bf16.vlgmr.msra.gmra.mxu0 %vm1145_vm3, %v2240_v46 }
 0x9f6   : > { %4213 = vmatpush3.bf16.xpose.msra.mxu0 %v2359_v56  ;;  %4214 = vmatprep.mubr.msk.bf16.mxu0 %vm4947_vm2, %v4946_v19 }
 0x9f7   : > { %4224 = vmatprep.subr.bf16.mxu0 %v4946_v19 }
 0x9fd   : > { %4215 = vmatmul.mubr.msk.bf16.vlgmr.msra.gmra.mxu0 %vm1145_vm3, %v2352_v58 }
 0x9fe   : > { %4225 = vmatpush3.bf16.xpose.msra.mxu0 %v2469_v30  ;;  %4226 = vmatprep.mubr.msk.bf16.mxu0 %vm4947_vm2, %v4946_v19 }
 0x9ff   : > { %4236 = vmatprep.subr.bf16.mxu0 %v4946_v19 }
 0xa05   : > { %4227 = vmatmul.mubr.msk.bf16.vlgmr.msra.gmra.mxu0 %vm1145_vm3, %v2462_v59 }
 0xa06   : > { %4240 = vmatprep.mubr.msk.bf16.mxu0 %vm4947_vm2, %v4946_v19 }
 0xa42   : > { %v2173_v1 = vpop.f32.mrf.mxu0 }
 0xa43   : > { %v2174_v3 = vadd.f32 %v2173_v1, %v2130_v0 }
 0xa44   : > { %v4192_v5 = vpop.f32.mrf.mxu0 }
 0xa45   : > { %v2179_v6 = vsel %vm1145_vm3, %v2174_v3, -inf }
 0xa46   : > { %2180 = vmax.xlane.f32.xlu1 %v2179_v6  ;;  %v2176_v9 = vpop.f32.mrf.mxu0 }
 0xa48   : > { %v4193_v10 = vpop.f32.mrf.mxu0 }
 0xa4a   : > { %v5625_v11 = vpop.f32.mrf.mxu1 }
 0xa4c   : > { %v4162_v12 = vpop.f32.mrf.mxu1 }
 0xa4e   : > { %v1856_v26 = vpop.f32.mrf.mxu1 }
 0xa50   : > { %v4163_v14 = vpop.f32.mrf.mxu1 }
 0xa52   : > { %v2119_v28 = vpop.f32.mrf.mxu1 }
 0xa53   : > { %v5627_v15 = vpack.c.bf16 %v2119_v28, %v2119_v28 }
 0xa54   : > { %v4186_v16 = vpop.f32.mrf.mxu1 }
 0xa55   : > { %v2196_v17 = vsel %vm1208_vm4, %v5627_v15, 0 }
 0xa56   : > { %v2122_v18 = vpop.f32.mrf.mxu1  ;;  %4195 = vmatpush3.bf16.msra.mxu1 %v2196_v17 }
 0xa57   : > { %4206 = vmatprep.subr.bf16.mxu1 %v4946_v19 }
 0xa58   : > { %v4187_v20 = vpop.f32.mrf.mxu1 }
 0xab5   : > { %v2284_v21 = vpop.f32.mrf.mxu0 }
 0xab6   : > { %v2285_v22 = vadd.f32 %v2284_v21, %v2130_v0 }
 0xab7   : > { %v4204_v23 = vpop.f32.mrf.mxu0 }
 0xab8   : > { %v2290_v24 = vsel %vm1145_vm3, %v2285_v22, -inf }
 0xab9   : > { %2291 = vmax.xlane.f32.xlu0 %v2290_v24  ;;  %v2287_v25 = vpop.f32.mrf.mxu0 }
 0xabb   : > { %v4205_v27 = vpop.f32.mrf.mxu0 }
 0xabd   : > { %v2395_v29 = vpop.f32.mrf.mxu0 }
 0xabe   : > { %v2396_v31 = vadd.f32 %v2395_v29, %v2130_v0 }
 0xabf   : > { %v4216_v32 = vpop.f32.mrf.mxu0 }
 0xac0   : > { %v2401_v33 = vsel %vm1145_vm3, %v2396_v31, -inf }
 0xac1   : > { %2402 = vmax.xlane.f32.xlu0 %v2401_v33  ;;  %v2398_v34 = vpop.f32.mrf.mxu0 }
 0xac3   : > { %v4217_v35 = vpop.f32.mrf.mxu0 }
 0xac5   : > { %v2505_v36 = vpop.f32.mrf.mxu0 }
 0xac6   : > { %v2506_v37 = vadd.f32 %v2505_v36, %v2130_v0 }
 0xac7   : > { %v4228_v38 = vpop.f32.mrf.mxu0 }
 0xac8   : > { %v2511_v39 = vsel %vm1145_vm3, %v2506_v37, -inf }
 0xac9   : > { %2512 = vmax.xlane.f32.xlu1 %v2511_v39  ;;  %v2508_v8 = vpop.f32.mrf.mxu0 }
 0xaca   : > { %v5672_v8 = vld [vmem:[%s5938_s24] ss:$0 sm:$0xff] }
 0xacb   : > { %v4229_v40 = vpop.f32.mrf.mxu0 }
 0xacc   : > { %v1854_v40 = vadd.f32 %v5672_v8, %v5625_v11 }
 0xacf   : > { %v2181_v42 = vpop.xlane.xlu1 %2180 }
 0xad0   : > { %v2182_v43 = vsub.f32 %v2174_v3, %v2181_v42  ;;  %v1859_v42 = vadd.f32 %v1854_v40, %v5525_v7 }
 0xad2   : > { %v2183_v44 = vmul.f32 1.442695, %v2182_v43  ;;  %v4516_v43 = vld [vmem:[%s6044_s13] sm:$0xff]  }
 0xad4   : > { %4557 = vpow2.f32 %v2183_v44  ;;  %v1862_v44 = vsel %vm942_vm1, %v1859_v42, 0.0 }
 0xae1   : > { %v4558_v45 = vpop.eup %4557 }
 0xae2   : > { %v2185_v47 = vsel %vm1145_vm3, %v4558_v45, 0.0 }
 0xae3   : > { %2186 = vadd.xlane.f32.xlu0 %v2185_v47 }
 0xb42   : > { %v2292_v48 = vpop.xlane.xlu0 %2291 }
 0xb43   : > { %v2293_v49 = vsub.f32 %v2285_v22, %v2292_v48 }
 0xb45   : > { %v2294_v50 = vmul.f32 1.442695, %v2293_v49 }
 0xb47   : > { %4559 = vpow2.f32 %v2294_v50 }
 0xb4a   : > { %v2403_v51 = vpop.xlane.xlu0 %2402 }
 0xb4b   : > { %v2404_v52 = vsub.f32 %v2396_v31, %v2403_v51  ;;  %v4515_v31 = vld [vmem:[%s6044_s13 + $0x8] sm:$0xff]  }
 0xb4c   : > { %4237 = vmatpush3.bf16.msra.mxu0 %v4515_v31 }
 0xb4d   : > { %v2405_v53 = vmul.f32 1.442695, %v2404_v52  ;;  %4238 = vmatprep.subr.bf16.mxu0 %v4946_v19 }
 0xb4f   : > { %4561 = vpow2.f32 %v2405_v53 }
 0xb50   : > { %4239 = vmatpush3.bf16.msra.mxu0 %v4516_v43 }
 0xb51   : > { %4252 = vmatprep.subr.bf16.mxu0 %v4946_v19 }
 0xb52   : > { %v2513_v58 = vpop.xlane.xlu1 %2512 }
 0xb53   : > { %v2514_v30 = vsub.f32 %v2506_v37, %v2513_v58 }
 0xb54   : > { %v4560_v54 = vpop.eup %4559 }
 0xb55   : > { %v2296_v46 = vsel %vm1145_vm3, %v4560_v54, 0.0  ;;  %v2515_v59 = vmul.f32 1.442695, %v2514_v30 }
 0xb56   : > { %2297 = vadd.xlane.f32.xlu1 %v2296_v46 }
 0xb5c   : > { %v4562_v55 = vpop.eup %4561 }
 0xb5d   : > { %v2407_v56 = vsel %vm1145_vm3, %v4562_v55, 0.0 }
 0xb5e   : > { %2408 = vadd.xlane.f32.xlu0 %v2407_v56 }
 0xb67   : > { %2413 = vrot.lane.b32.xlu1 %v5627_v15, %s6053_s26 }
 0xb6c   : > { %v2187_v57 = vpop.xlane.xlu0 %2186 }
 0xb6d   : > { %4563 = vrcp.f32 %v2187_v57 }
 0xb6e   : > { %4565 = vpow2.f32 %v2515_v59 }
 0xb74   : > { %2303 = vrot.lane.b32.xlu0 %v5627_v15, %s6052_s29 }
 0xb7a   : > { %v4564_v60 = vpop.eup %4563 }
 0xb7b   : > { %v2189_v61 = vmul.f32 %v4564_v60, %v4558_v45  ;;  %v4566_v63 = vpop.eup %4565 }
 0xb7c   : > { %v2517_v0 = vsel %vm1145_vm3, %v4566_v63, 0.0 }
 0xb7d   : > { %v2190_v62 = vpack.c.bf16 %v2189_v61, %v2189_v61 }
 0xb7f   : > { %4197 = vmatmul.mubr.msk.bf16.vlgmr.msra.gmra.mxu1 %vm1145_vm3, %v2190_v62 }
 0xb80   : > { %4208 = vmatprep.mubr.msk.bf16.mxu1 %vm4947_vm2, %v4946_v19 }
 0xb8b   : > { %2518 = vadd.xlane.f32.xlu1 %v2517_v0 }
 0xb9c   : > { %2523 = vrot.lane.b32.xlu1 %v5627_v15, %s6054_s5 }
 0xbdf   : > { %v2298_v1 = vpop.xlane.xlu1 %2297 }
 0xbe0   : > { %4567 = vrcp.f32 %v2298_v1  ;;  %v4517_v1 = vld [vmem:[%s5929_s15 + $0x8] sm:$0xff]  }
 0xbe3   : > { %v2414_v12 = vpop.permute.xlu1 %2413 }
 0xbe4   : > { %v2419_v14 = vsel %vm1208_vm4, %v2414_v12, 0 }
 0xbe7   : > { %v2409_v3 = vpop.xlane.xlu0 %2408 }
 0xbe8   : > { %4569 = vrcp.f32 %v2409_v3 }
 0xbeb   : > { %v2304_v5 = vpop.permute.xlu0 %2303 }
 0xbec   : > { %v2309_v6 = vsel %vm1208_vm4, %v2304_v5, 0 }
 0xbed   : > { %v4568_v9 = vpop.eup %4567  ;;  %4207 = vmatpush3.bf16.msra.mxu1 %v2309_v6 }
 0xbee   : > { %4218 = vmatprep.subr.bf16.mxu1 %v4946_v19  ;;  %v2300_v10 = vmul.f32 %v4568_v9, %v4560_v54 }
 0xbf0   : > { %v2301_v26 = vpack.c.bf16 %v2300_v10, %v2300_v10 }
 0xbf2   : > { %4209 = vmatmul.mubr.msk.bf16.vlgmr.msra.gmra.mxu1 %vm1145_vm3, %v2301_v26 }
 0xbf3   : > { %4219 = vmatpush3.bf16.msra.mxu1 %v2419_v14  ;;  %4220 = vmatprep.mubr.msk.bf16.mxu1 %vm4947_vm2, %v4946_v19 }
 0xbf4   : > { %4230 = vmatprep.subr.bf16.mxu1 %v4946_v19 }
 0xbf5   : > { %v4570_v28 = vpop.eup %4569 }
 0xbf6   : > { %v2411_v15 = vmul.f32 %v4570_v28, %v4562_v55  ;;  %v5705_v28 = vld [vmem:[%s5939_s25] ss:$0 sm:$0xff] }
 0xbf8   : > { %v2412_v16 = vpack.c.bf16 %v2411_v15, %v2411_v15 }
 0xbfa   : > { %4221 = vmatmul.mubr.msk.bf16.vlgmr.msra.gmra.mxu1 %vm1145_vm3, %v2412_v16  ;;  %v5710_v16 = vld [vmem:[%s6057_s0] ss:$0 sm:$0xff] }
 0xbfb   : > { %4232 = vmatprep.mubr.msk.bf16.mxu1 %vm4947_vm2, %v4946_v19 }
 0xc14   : > { %v2519_v17 = vpop.xlane.xlu1 %2518 }
 0xc15   : > { %4571 = vrcp.f32 %v2519_v17 }
 0xc18   : > { %v2524_v18 = vpop.permute.xlu1 %2523 }
 0xc19   : > { %v2529_v20 = vsel %vm1208_vm4, %v2524_v18, 0 }
 0xc1a   : > { %4231 = vmatpush3.bf16.msra.mxu1 %v2529_v20 }
 0xc1b   : > { %4244 = vmatprep.subr.bf16.mxu1 %v4946_v19 }
 0xc22   : > { %v4572_v21 = vpop.eup %4571 }
 0xc23   : > { %v2521_v22 = vmul.f32 %v4572_v21, %v4566_v63  ;;  %v4519_v21 = vld [vmem:[%s6058_s11 + $0x8] sm:$0xff]  }
 0xc25   : > { %v2522_v23 = vpack.c.bf16 %v2521_v22, %v2521_v22  ;;  %v4520_v22 = vld [vmem:[%s6059_s18] sm:$0xff]  }
 0xc27   : > { %4233 = vmatmul.mubr.msk.bf16.vlgmr.msra.gmra.mxu1 %vm1145_vm3, %v2522_v23 }
 0xc28   : > { %4248 = vmatprep.mubr.msk.bf16.mxu1 %vm4947_vm2, %v4946_v19  ;;  %4245 = vmatpush3.bf16.msra.mxu1 %v4519_v21 }
 0xc29   : > { %4246 = vmatprep.subr.bf16.mxu1 %v4946_v19 }
 0xc2c   : > { %4247 = vmatpush3.bf16.msra.mxu1 %v4520_v22 }
 0xc2d   : > { %4260 = vmatprep.subr.bf16.mxu1 %v4946_v19 }
 0xc3f   : > { %v2232_v24 = vpop.f32.mrf.mxu1 }
 0xc41   : > { %v4198_v25 = vpop.f32.mrf.mxu1 }
 0xc43   : > { %v2235_v27 = vpop.f32.mrf.mxu1 }
 0xc45   : > { %v4199_v29 = vpop.f32.mrf.mxu1 }
 0xcb2   : > { %v2345_v32 = vpop.f32.mrf.mxu1 }
 0xcb3   : > { %2572 = vrot.lane.b32.xlu0 %v2345_v32, %s6055_s14 }
 0xcb4   : > { %v4210_v33 = vpop.f32.mrf.mxu1 }
 0xcb5   : > { %v4521_v33 = vld [vmem:[%s6060_s7 + $0x8] sm:$0xff]  }
 0xcb6   : > { %v2348_v34 = vpop.f32.mrf.mxu1 }
 0xcb8   : > { %v4211_v35 = vpop.f32.mrf.mxu1 }
 0xcb9   : > { %v4522_v35 = vld [vmem:[%s6060_s7] sm:$0xff]  }
 0xcba   : > { %v2455_v36 = vpop.f32.mrf.mxu1 }
 0xcbb   : > { %2576 = vrot.lane.b32.xlu1 %v2455_v36, %s6056_s19 }
 0xcbc   : > { %v4222_v37 = vpop.f32.mrf.mxu1 }
 0xcbe   : > { %v2458_v38 = vpop.f32.mrf.mxu1 }
 0xcc0   : > { %v4223_v39 = vpop.f32.mrf.mxu1 }
 0xcdf   : > { %1863 = vadd.xlane.f32.xlu1 %v1862_v44 }
 0xce7   : > { %v2565_v45 = vpop.f32.mrf.mxu1 }
 0xce8   : > { %2580 = vrot.lane.b32.xlu0 %v2565_v45, %s4953_s30 }
 0xce9   : > { %v4234_v47 = vpop.f32.mrf.mxu1 }
 0xceb   : > { %v2568_v48 = vpop.f32.mrf.mxu1 }
 0xced   : > { %v4235_v49 = vpop.f32.mrf.mxu1 }
 0xd25   : > { %v2573_v50 = vpop.permute.xlu0 %2572 }
 0xd26   : > { %v2583_v7 = vsel %vm1145_vm3, %v2232_v24, %v2573_v50 }
 0xd2d   : > { %v2577_v11 = vpop.permute.xlu1 %2576 }
 0xd2e   : > { %v2584_v51 = vsel %vm1598_vm5, %v2583_v7, %v2577_v11 }
 0xd5a   : > { %v2581_v52 = vpop.permute.xlu0 %2580 }
 0xd5b   : > { %v2585_v53 = vsel %vm1600_vm6, %v2584_v51, %v2581_v52 }
 0xd5c   : > { %v2586_v54 = vpack.c.bf16 %v2585_v53, %v2585_v53 }
 0xd5e   : > { %4241 = vmatmul.mubr.msk.bf16.vlgmr.msra.gmra.mxu0 %vm942_vm1, %v2586_v54 }
 0xd5f   : > { %4256 = vmatprep.mubr.msk.bf16.mxu0 %vm4947_vm2, %v4946_v19  ;;  %4253 = vmatpush3.bf16.msra.mxu0 %v4517_v1 }
 0xd60   : > { %4254 = vmatprep.subr.bf16.mxu0 %v4946_v19 }
 0xd68   : > { %v1864_v46 = vpop.xlane.xlu1 %1863 }
 0xd69   : > { %v1865_v55 = vmul.f32 0.03125, %v1864_v46 }
 0xd6b   : > { %v1866_v57 = vsub.f32 %v1859_v42, %v1865_v55 }
 0xd6d   : > { %v1867_v62 = vmul.f32 %v1866_v57, %v1866_v57 }
 0xd6f   : > { %v1868_v0 = vsel %vm942_vm1, %v1867_v62, 0.0 }
 0xe1e   : > { %v2647_v56 = vpop.f32.mrf.mxu0 }
 0xe1f   : > { %v2648_v58 = vadd.f32 %v5510_v41, %v2647_v56  ;;  %v4518_v41 = vld [vmem:[%s5929_s15] sm:$0xff]  }
 0xe20   : > { %v4242_v30 = vpop.f32.mrf.mxu0  ;;  %4255 = vmatpush3.bf16.msra.mxu0 %v4518_v41 }
 0xe21   : > { %v2653_v59 = vadd.f32 %v2648_v58, %v5541_v13  ;;  %4268 = vmatprep.subr.bf16.mxu0 %v4946_v19 }
 0xe22   : > { %v2650_v60 = vpop.f32.mrf.mxu0 }
 0xe23   : > { %v2656_v61 = vsel %vm942_vm1, %v2653_v59, 0.0 }
 0xe24   : > { %2657 = vadd.xlane.f32.xlu0 %v2656_v61  ;;  %v4243_v63 = vpop.f32.mrf.mxu0 }
 0xe28   : > { %1869 = vadd.xlane.f32.xlu0 %v1868_v0 }
 0xead   : > { %v2658_v13 = vpop.xlane.xlu0 %2657 }
 0xeae   : > { %v2659_v3 = vmul.f32 0.03125, %v2658_v13 }
 0xeb0   : > { %v2660_v5 = vsub.f32 %v2653_v59, %v2659_v3 }
 0xeb1   : > { %v1870_v6 = vpop.xlane.xlu0 %1869 }
 0xeb2   : > { %v1871_v9 = vmul.f32 0.03125, %v1870_v6  ;;  %v2661_v10 = vmul.f32 %v2660_v5, %v2660_v5 }
 0xeb4   : > { %v1872_v12 = vadd.f32 1e-12, %v1871_v9  ;;  %v2662_v26 = vsel %vm942_vm1, %v2661_v10, 0.0 }
 0xeb5   : > { %2663 = vadd.xlane.f32.xlu1 %v2662_v26 }
 0xeb6   : > { %4573 = vrsqrt.f32 %v1872_v12 }
 0xec3   : > { %v4574_v14 = vpop.eup %4573 }
 0xec4   : > { %v1874_v15 = vmul.f32 %v4574_v14, %v1866_v57 }
 0xec6   : > { %v1881_v17 = vmul.f32 %v5705_v28, %v1874_v15 }
 0xec8   : > { %v1888_v18 = vadd.f32 %v5710_v16, %v1881_v17 }
 0xeca   : > { %v2684_v20 = vpack.c.bf16 %v1888_v18, %v1888_v18 }
 0xecc   : > { %4257 = vmatmul.mubr.msk.bf16.vlgmr.msra.gmra.mxu0 %vm942_vm1, %v2684_v20 }
 0xecd   : > { %4270 = vmatprep.mubr.msk.bf16.mxu0 %vm4947_vm2, %v4946_v19 }
 0xf3e   : > { %v2664_v23 = vpop.xlane.xlu1 %2663 }
 0xf3f   : > { %v2665_v24 = vmul.f32 0.03125, %v2664_v23 }
 0xf41   : > { %v2666_v25 = vadd.f32 1e-12, %v2665_v24 }
 0xf43   : > { %4575 = vrsqrt.f32 %v2666_v25 }
 0xf50   : > { %v4576_v27 = vpop.eup %4575 }
 0xf51   : > { %v2668_v29 = vmul.f32 %v4576_v27, %v2660_v5 }
 0xf53   : > { %v2675_v31 = vmul.f32 %v5519_v2, %v2668_v29 }
 0xf55   : > { %v5727_v32 = vadd.f32 %v5521_v4, %v2675_v31 }
 0xf57   : > { %v2683_v34 = vpack.c.bf16 %v5727_v32, %v5727_v32 }
 0xf59   : > { %4249 = vmatmul.mubr.msk.bf16.vlgmr.msra.gmra.mxu1 %vm942_vm1, %v2683_v34 }
 0xf5a   : > { %4261 = vmatpush3.bf16.msra.mxu1 %v4521_v33  ;;  %4264 = vmatprep.mubr.msk.bf16.mxu1 %vm4947_vm2, %v4946_v19 }
 0xf5b   : > { %4262 = vmatprep.subr.bf16.mxu1 %v4946_v19 }
 0xf5e   : > { %4263 = vmatpush3.bf16.msra.mxu1 %v4522_v35 }
 0xf5f   : > { %4274 = vmatprep.subr.bf16.mxu1 %v4946_v19 }
 0xf61   : > { %4265 = vmatmul.mubr.msk.bf16.vlgmr.msra.gmra.mxu1 %vm942_vm1, %v2684_v20 }
 0xf62   : > { %4276 = vmatprep.mubr.msk.bf16.mxu1 %vm4947_vm2, %v4946_v19 }
 0xf8c   : > { %v2797_v2 = vpop.f32.mrf.mxu0 }
 0xf8d   : > { %v2860_v4 = vpack.c.bf16 %v2797_v2, %v2797_v2 }
 0xf8e   : > { %v4258_v36 = vpop.f32.mrf.mxu0 }
 0xf8f   : > { %2970 = vrot.lane.b32.xlu0 %v2860_v4, %s6052_s29  ;;  %v2865_v37 = vsel %vm1145_vm3, %v2860_v4, 0 }
 0xf90   : > { %v2800_v38 = vpop.f32.mrf.mxu0  ;;  %4269 = vmatpush3.bf16.xpose.msra.mxu0 %v2865_v37 }
 0xf91   : > { %4280 = vmatprep.subr.bf16.mxu0 %v4946_v19 }
 0xf92   : > { %v4259_v39 = vpop.f32.mrf.mxu0 }
0x1001   : > { %v2971_v42 = vpop.permute.xlu0 %2970 }
0x1002   : > { %v2976_v45 = vsel %vm1145_vm3, %v2971_v42, 0 }
0x1019   : > { %v2738_v40 = vpop.f32.mrf.mxu1 }
0x101a   : > { %v2859_v43 = vpack.c.bf16 %v2738_v40, %v2738_v40 }
0x101b   : > { %v4250_v44 = vpop.f32.mrf.mxu1 }
0x101c   : > { %2967 = vrot.lane.b32.xlu1 %v2859_v43, %s6052_s29  ;;  %3079 = vrot.lane.b32.xlu0 %v2859_v43, %s6053_s26 }
0x101d   : > { %4271 = vmatmul.mubr.msk.bf16.vlgmr.msra.gmra.mxu0 %vm1145_vm3, %v2859_v43  ;;  %v2741_v47 = vpop.f32.mrf.mxu1 }
0x101e   : > { %4281 = vmatpush3.bf16.xpose.msra.mxu0 %v2976_v45  ;;  %4282 = vmatprep.mubr.msk.bf16.mxu0 %vm4947_vm2, %v4946_v19 }
0x101f   : > { %v4251_v48 = vpop.f32.mrf.mxu1  ;;  %4292 = vmatprep.subr.bf16.mxu0 %v4946_v19 }
0x1020   : > { %3081 = vrot.lane.b32.xlu1 %v2860_v4, %s6053_s26  ;;  %3189 = vrot.lane.b32.xlu0 %v2859_v43, %s6054_s5 }
0x1021   : > { %v2853_v49 = vpop.f32.mrf.mxu1 }
0x1022   : > { %v5757_v50 = vpack.c.bf16 %v2853_v49, %v2853_v49 }
0x1023   : > { %v4266_v11 = vpop.f32.mrf.mxu1 }
0x1024   : > { %3191 = vrot.lane.b32.xlu1 %v2860_v4, %s6054_s5  ;;  %v2924_v7 = vsel %vm1208_vm4, %v5757_v50, 0 }
0x1025   : > { %v2856_v51 = vpop.f32.mrf.mxu1  ;;  %4275 = vmatpush3.bf16.msra.mxu1 %v2924_v7 }
0x1026   : > { %4286 = vmatprep.subr.bf16.mxu1 %v4946_v19 }
0x1027   : > { %v4267_v52 = vpop.f32.mrf.mxu1 }
0x108e   : > { %v2968_v53 = vpop.permute.xlu1 %2967  ;;  %v3080_v56 = vpop.permute.xlu0 %3079 }
0x108f   : > { %4283 = vmatmul.mubr.msk.bf16.vlgmr.msra.gmra.mxu0 %vm1145_vm3, %v2968_v53 }
0x1090   : > { %4294 = vmatprep.mubr.msk.bf16.mxu0 %vm4947_vm2, %v4946_v19 }
0x1092   : > { %v3082_v54 = vpop.permute.xlu1 %3081  ;;  %v3190_v58 = vpop.permute.xlu0 %3189 }
0x1093   : > { %v3087_v46 = vsel %vm1145_vm3, %v3082_v54, 0 }
0x1094   : > { %4293 = vmatpush3.bf16.xpose.msra.mxu0 %v3087_v46 }
0x1095   : > { %4304 = vmatprep.subr.bf16.mxu0 %v4946_v19 }
0x1096   : > { %v3192_v55 = vpop.permute.xlu1 %3191 }
0x1097   : > { %v3197_v57 = vsel %vm1145_vm3, %v3192_v55, 0 }
0x109b   : > { %4295 = vmatmul.mubr.msk.bf16.vlgmr.msra.gmra.mxu0 %vm1145_vm3, %v3080_v56 }
0x109c   : > { %4305 = vmatpush3.bf16.xpose.msra.mxu0 %v3197_v57  ;;  %4306 = vmatprep.mubr.msk.bf16.mxu0 %vm4947_vm2, %v4946_v19 }
0x109d   : > { %4316 = vmatprep.subr.bf16.mxu0 %v4946_v19 }
0x10a3   : > { %4307 = vmatmul.mubr.msk.bf16.vlgmr.msra.gmra.mxu0 %vm1145_vm3, %v3190_v58 }
0x10a4   : > { %4320 = vmatprep.mubr.msk.bf16.mxu0 %vm4947_vm2, %v4946_v19 }
0x10dd   : > { %v2901_v30 = vpop.f32.mrf.mxu0 }
0x10de   : > { %v2907_v59 = vsel %vm1145_vm3, %v2901_v30, -inf }
0x10df   : > { %2908 = vmax.xlane.f32.xlu1 %v2907_v59  ;;  %v4272_v60 = vpop.f32.mrf.mxu0 }
0x10e1   : > { %v2904_v61 = vpop.f32.mrf.mxu0 }
0x10e3   : > { %v4273_v62 = vpop.f32.mrf.mxu0 }
0x114f   : > { %v3012_v63 = vpop.f32.mrf.mxu0 }
0x1150   : > { %v3018_v0 = vsel %vm1145_vm3, %v3012_v63, -inf }
0x1151   : > { %3019 = vmax.xlane.f32.xlu0 %v3018_v0  ;;  %v4284_v1 = vpop.f32.mrf.mxu0 }
0x1152   : > { %v4523_v1 = vld [vmem:[#allocation17 + $0x8] sm:$0xff]  }
0x1153   : > { %v3015_v41 = vpop.f32.mrf.mxu0  ;;  %4317 = vmatpush3.bf16.msra.mxu0 %v4523_v1 }
0x1154   : > { %4318 = vmatprep.subr.bf16.mxu0 %v4946_v19 }
0x1155   : > { %v4285_v13 = vpop.f32.mrf.mxu0 }
0x115b   : > { %v3123_v3 = vpop.f32.mrf.mxu0 }
0x115c   : > { %v3129_v5 = vsel %vm1145_vm3, %v3123_v3, -inf }
0x115d   : > { %3130 = vmax.xlane.f32.xlu0 %v3129_v5  ;;  %v4296_v6 = vpop.f32.mrf.mxu0 }
0x115f   : > { %v3126_v9 = vpop.f32.mrf.mxu0 }
0x1161   : > { %v4297_v10 = vpop.f32.mrf.mxu0 }
0x1163   : > { %v3233_v12 = vpop.f32.mrf.mxu0 }
0x1164   : > { %v3239_v26 = vsel %vm1145_vm3, %v3233_v12, -inf }
0x1165   : > { %3240 = vmax.xlane.f32.xlu1 %v3239_v26  ;;  %v4308_v14 = vpop.f32.mrf.mxu0  ;;  %v4524_v26 = vld [vmem:[#allocation17] sm:$0xff]  }
0x1166   : > { %4319 = vmatpush3.bf16.msra.mxu0 %v4524_v26 }
0x1167   : > { %v3236_v15 = vpop.f32.mrf.mxu0  ;;  %4332 = vmatprep.subr.bf16.mxu0 %v4946_v19 }
0x1168   : > { %v2909_v17 = vpop.xlane.xlu1 %2908 }
0x1169   : > { %v2910_v18 = vsub.f32 %v2901_v30, %v2909_v17  ;;  %v4309_v20 = vpop.f32.mrf.mxu0 }
0x116b   : > { %v2911_v21 = vmul.f32 1.442695, %v2910_v18 }
0x116d   : > { %4577 = vpow2.f32 %v2911_v21 }
0x117a   : > { %v4578_v22 = vpop.eup %4577 }
0x117b   : > { %v2913_v23 = vsel %vm1145_vm3, %v4578_v22, 0.0 }
0x117c   : > { %2914 = vadd.xlane.f32.xlu0 %v2913_v23 }
0x11da   : > { %v3020_v24 = vpop.xlane.xlu0 %3019 }
0x11db   : > { %v3021_v25 = vsub.f32 %v3012_v63, %v3020_v24 }
0x11dd   : > { %v3022_v27 = vmul.f32 1.442695, %v3021_v25 }
0x11df   : > { %4579 = vpow2.f32 %v3022_v27 }
0x11e6   : > { %v3131_v29 = vpop.xlane.xlu0 %3130 }
0x11e7   : > { %v3132_v31 = vsub.f32 %v3123_v3, %v3131_v29  ;;  %v3935_v29 = vld [vmem:[#allocation18] ss:$0 sm:$0xff] }
0x11e9   : > { %v3133_v33 = vmul.f32 1.442695, %v3132_v31 }
0x11eb   : > { %4581 = vpow2.f32 %v3133_v33 }
0x11ec   : > { %v4580_v34 = vpop.eup %4579 }
0x11ed   : > { %v3024_v35 = vsel %vm1145_vm3, %v4580_v34, 0.0 }
0x11ee   : > { %3025 = vadd.xlane.f32.xlu1 %v3024_v35  ;;  %v3241_v37 = vpop.xlane.xlu1 %3240 }
0x11ef   : > { %v3242_v38 = vsub.f32 %v3233_v12, %v3241_v37 }
0x11f1   : > { %v3243_v39 = vmul.f32 1.442695, %v3242_v38 }
0x11f8   : > { %v4582_v2 = vpop.eup %4581 }
0x11f9   : > { %v3135_v4 = vsel %vm1145_vm3, %v4582_v2, 0.0 }
0x11fa   : > { %3136 = vadd.xlane.f32.xlu0 %v3135_v4 }
0x11ff   : > { %3141 = vrot.lane.b32.xlu1 %v5757_v50, %s6053_s26  ;;  %s6061_s26 = sld [smem:[#allocation54_spill]] }
0x1205   : > { %v2915_v36 = vpop.xlane.xlu0 %2914 }
0x1206   : > { %4583 = vrcp.f32 %v2915_v36 }
0x1207   : > { %4585 = vpow2.f32 %v3243_v39 }
0x1210   : > { %3031 = vrot.lane.b32.xlu0 %v5757_v50, %s6052_s29  ;;  %s6064_s29 = sld [smem:[#allocation30_spill]] }
0x1213   : > { %v4584_v40 = vpop.eup %4583 }
0x1214   : > { %v2917_v42 = vmul.f32 %v4584_v40, %v4578_v22  ;;  %v4586_v44 = vpop.eup %4585 }
0x1215   : > { %v3245_v45 = vsel %vm1145_vm3, %v4586_v44, 0.0 }
0x1216   : > { %v2918_v43 = vpack.c.bf16 %v2917_v42, %v2917_v42 }
0x1218   : > { %4277 = vmatmul.mubr.msk.bf16.vlgmr.msra.gmra.mxu1 %vm1145_vm3, %v2918_v43  ;;  %v4525_v43 = vld [vmem:[#allocation20 + $0x8] sm:$0xff]  }
0x1219   : > { %4288 = vmatprep.mubr.msk.bf16.mxu1 %vm4947_vm2, %v4946_v19 }
0x1223   : > { %3246 = vadd.xlane.f32.xlu1 %v3245_v45 }
0x1234   : > { %3251 = vrot.lane.b32.xlu1 %v5757_v50, %s6054_s5 }
0x1277   : > { %v3026_v47 = vpop.xlane.xlu1 %3025 }
0x1278   : > { %4587 = vrcp.f32 %v3026_v47 }
0x127b   : > { %v3142_v52 = vpop.permute.xlu1 %3141 }
0x127c   : > { %v3147_v54 = vsel %vm1208_vm4, %v3142_v52, 0 }
0x1283   : > { %v3137_v48 = vpop.xlane.xlu0 %3136 }
0x1284   : > { %4589 = vrcp.f32 %v3137_v48 }
0x1285   : > { %v4588_v49 = vpop.eup %4587 }
0x1286   : > { %v3028_v11 = vmul.f32 %v4588_v49, %v4580_v34  ;;  %v3939_v49 = vld [vmem:[%s6061_s26] ss:$0 sm:$0xff]  ;;  %s4955_s26 = smov [#allocation21]  }
0x1287   : > { %v3032_v7 = vpop.permute.xlu0 %3031  ;;  %s4853_s5 = sshll.u32 %s4955_s26, 4  ;;  %s4854_s5 = int_to_ptr.vmem [resolvable:$false] %s4853_s5 }
0x1288   : > { %v3037_v51 = vsel %vm1208_vm4, %v3032_v7, 0  ;;  %v3029_v53 = vpack.c.bf16 %v3028_v11, %v3028_v11  ;;  %s4855_s2 = scalar_lea.vmem %s4854_s5, 256 }
0x1289   : > { %4287 = vmatpush3.bf16.msra.mxu1 %v3037_v51 }
0x128a   : > { %4298 = vmatprep.subr.bf16.mxu1 %v4946_v19 }
0x128c   : > { %4289 = vmatmul.mubr.msk.bf16.vlgmr.msra.gmra.mxu1 %vm1145_vm3, %v3029_v53 }
0x128d   : > { %4299 = vmatpush3.bf16.msra.mxu1 %v3147_v54  ;;  %4300 = vmatprep.mubr.msk.bf16.mxu1 %vm4947_vm2, %v4946_v19  ;;  %v4527_v54 = vld [vmem:[%s5937_s23 + $0x18] sm:$0xff]  }
0x128e   : > { %4310 = vmatprep.subr.bf16.mxu1 %v4946_v19 }
0x1291   : > { %v4590_v50 = vpop.eup %4589 }
0x1292   : > { %v3139_v46 = vmul.f32 %v4590_v50, %v4582_v2  ;;  %v4528_v50 = vld [vmem:[%s5937_s23 + $0x10] sm:$0xff]  }
0x1294   : > { %v3140_v55 = vpack.c.bf16 %v3139_v46, %v3139_v46  ;;  %v4529_v46 = vld [vmem:[%s5937_s23 + $0x8] sm:$0xff]  }
0x1296   : > { %4301 = vmatmul.mubr.msk.bf16.vlgmr.msra.gmra.mxu1 %vm1145_vm3, %v3140_v55  ;;  %v4530_v55 = vld [vmem:[%s5937_s23] sm:$0xff]  }
0x1297   : > { %4312 = vmatprep.mubr.msk.bf16.mxu1 %vm4947_vm2, %v4946_v19 }
0x12ac   : > { %v3247_v56 = vpop.xlane.xlu1 %3246 }
0x12ad   : > { %4591 = vrcp.f32 %v3247_v56  ;;  %v3941_v56 = vld [vmem:[%s5936_s22] ss:$0 sm:$0xff] }
0x12b0   : > { %v3252_v57 = vpop.permute.xlu1 %3251 }
0x12b1   : > { %v3257_v58 = vsel %vm1208_vm4, %v3252_v57, 0 }
0x12b2   : > { %4311 = vmatpush3.bf16.msra.mxu1 %v3257_v58 }
0x12b3   : > { %4324 = vmatprep.subr.bf16.mxu1 %v4946_v19 }
0x12ba   : > { %v4592_v30 = vpop.eup %4591 }
0x12bb   : > { %v3249_v59 = vmul.f32 %v4592_v30, %v4586_v44  ;;  %v4526_v44 = vld [vmem:[#allocation20] sm:$0xff]  }
0x12bd   : > { %v3250_v60 = vpack.c.bf16 %v3249_v59, %v3249_v59 }
0x12bf   : > { %4313 = vmatmul.mubr.msk.bf16.vlgmr.msra.gmra.mxu1 %vm1145_vm3, %v3250_v60 }
0x12c0   : > { %4328 = vmatprep.mubr.msk.bf16.mxu1 %vm4947_vm2, %v4946_v19  ;;  %4325 = vmatpush3.bf16.msra.mxu1 %v4525_v43 }
0x12c1   : > { %4326 = vmatprep.subr.bf16.mxu1 %v4946_v19 }
0x12c4   : > { %4327 = vmatpush3.bf16.msra.mxu1 %v4526_v44 }
0x12c5   : > { %4344 = vmatprep.subr.bf16.mxu1 %v4946_v19 }
0x12d8   : > { %v2960_v61 = vpop.f32.mrf.mxu1 }
0x12da   : > { %v4278_v62 = vpop.f32.mrf.mxu1 }
0x12dc   : > { %v2963_v63 = vpop.f32.mrf.mxu1 }
0x12de   : > { %v4279_v0 = vpop.f32.mrf.mxu1 }
0x134c   : > { %v3073_v41 = vpop.f32.mrf.mxu1 }
0x134d   : > { %3300 = vrot.lane.b32.xlu0 %v3073_v41, %s6055_s14  ;;  %s6065_s14 = sld [smem:[#allocation35_spill]] }
0x134e   : > { %v4290_v13 = vpop.f32.mrf.mxu1 }
0x1350   : > { %v3076_v3 = vpop.f32.mrf.mxu1 }
0x1352   : > { %v4291_v5 = vpop.f32.mrf.mxu1 }
0x1353   : > { %p6069_p1 = scmp.ne.s32.totalorder %s6065_s14, 0 }
0x1356   : > { %v3183_v6 = vpop.f32.mrf.mxu1 }
0x1357   : > { %3304 = vrot.lane.b32.xlu1 %v3183_v6, %s6056_s19  ;;  %s6062_s19 = sld [smem:[#allocation55_spill]] }
0x1358   : > { %v4302_v9 = vpop.f32.mrf.mxu1 }
0x135a   : > { %v3186_v10 = vpop.f32.mrf.mxu1 }
0x135c   : > { %v4303_v12 = vpop.f32.mrf.mxu1 }
0x135d   : > { %v3940_v7 = vld [vmem:[%s6062_s19] ss:$0 sm:$0xff]  ;;  %s892_s19 = sand.u32 1, %s6064_s29  }
0x135e   : > { %s3854_s10 = sshll.u32 %s892_s19, 3  ;;  %s3669_s6 = scalar_lea.sflag [#allocation8], %s892_s19 }
0x135f   : > { %s894_s20 = scalar_lea.vmem [#allocation21], %s3854_s10 }
0x1360   : > { %s3682_s11 = sshll.u32 %s894_s20, 4  ;;  %s5875_s11 = int_to_ptr.vmem [resolvable:$true] %s3682_s11 }
0x1361   : > { %s4849_s29 = scalar_lea.vmem %s5875_s11, 128  ;;  %p4856_p3 = scmp.lt.s32.totalorder %s5875_s11, %s4854_s5 }
0x1362   : > { %p4850_p0 = scmp.ne.s32.totalorder %s5875_s11, %s4849_s29  ;;  %p4857_p13 = scmp.lt.s32.totalorder %s4855_s2, %s4849_s29 }
0x1364   : > { %p4851_p2 = pnand %p4850_p0, %p6069_p1  ;;  %p4858_p5 = por %p4857_p13, %p4856_p3 }
0x1366   : > { %p4852_p9 = pneg %p4851_p2 }
0x1368   : > { %p4859_p6 = pnand %p4858_p5, %p4852_p9 }
0x137f   : > { %v3293_v14 = vpop.f32.mrf.mxu1 }
0x1380   : > { %3308 = vrot.lane.b32.xlu0 %v3293_v14, %s4953_s30  ;;  %s6063_s30 = sld [smem:[#allocation39_spill]] }
0x1381   : > { %v4314_v15 = vpop.f32.mrf.mxu1 }
0x1383   : > { %v3296_v17 = vpop.f32.mrf.mxu1 }
0x1385   : > { %v4315_v18 = vpop.f32.mrf.mxu1 }
0x13bf   : > { %v3301_v20 = vpop.permute.xlu0 %3300 }
0x13c0   : > { %v3311_v22 = vsel %vm1145_vm3, %v2960_v61, %v3301_v20 }
0x13c9   : > { %v3305_v21 = vpop.permute.xlu1 %3304 }
0x13ca   : > { %v3312_v23 = vsel %vm1598_vm5, %v3311_v22, %v3305_v21 }
0x13f2   : > { %v3309_v24 = vpop.permute.xlu0 %3308 }
0x13f3   : > { %v3313_v25 = vsel %vm1600_vm6, %v3312_v23, %v3309_v24  ;;  %v4531_v24 = vld [vmem:[%s6063_s30 + $0x8] sm:$0xff]  }
0x13f4   : > { %v3314_v27 = vpack.c.bf16 %v3313_v25, %v3313_v25 }
0x13f6   : > { %4321 = vmatmul.mubr.msk.bf16.vlgmr.msra.gmra.mxu0 %vm942_vm1, %v3314_v27 }
0x13f7   : > { %4340 = vmatprep.mubr.msk.bf16.mxu0 %vm4947_vm2, %v4946_v19  ;;  %4333 = vmatpush3.bf16.msra.mxu0 %v4527_v54 }
0x13f8   : > { %4334 = vmatprep.subr.bf16.mxu0 %v4946_v19 }
0x13fb   : > { %4335 = vmatpush3.bf16.msra.mxu0 %v4528_v50 }
0x13fc   : > { %4336 = vmatprep.subr.bf16.mxu0 %v4946_v19 }
0x13ff   : > { %4337 = vmatpush3.bf16.msra.mxu0 %v4529_v46 }
0x1400   : > { %4338 = vmatprep.subr.bf16.mxu0 %v4946_v19 }
0x1403   : > { %4339 = vmatpush3.bf16.msra.mxu0 %v4530_v55 }
0x14b6   : > { %v3375_v31 = vpop.f32.mrf.mxu0 }
0x14b7   : > { %v3376_v33 = vadd.f32 %v3935_v29, %v3375_v31 }
0x14b8   : > { %v4322_v34 = vpop.f32.mrf.mxu0 }
0x14b9   : > { %v3381_v35 = vadd.f32 %v3376_v33, %v5727_v32 }
0x14ba   : > { %v3378_v2 = vpop.f32.mrf.mxu0 }
0x14bb   : > { %v3384_v4 = vsel %vm942_vm1, %v3381_v35, 0.0 }
0x14bc   : > { %3385 = vadd.xlane.f32.xlu1 %v3384_v4  ;;  %v4323_v36 = vpop.f32.mrf.mxu0 }
0x1545   : > { %v3386_v37 = vpop.xlane.xlu1 %3385 }
0x1546   : > { %v3387_v38 = vmul.f32 0.03125, %v3386_v37 }
0x1548   : > { %v3388_v39 = vsub.f32 %v3381_v35, %v3387_v38 }
0x154a   : > { %v3389_v40 = vmul.f32 %v3388_v39, %v3388_v39 }
0x154c   : > { %v3390_v42 = vsel %vm942_vm1, %v3389_v40, 0.0 }
0x154d   : > { %3391 = vadd.xlane.f32.xlu0 %v3390_v42 }
0x15d6   : > { %v3392_v32 = vpop.xlane.xlu0 %3391 }
0x15d7   : > { %v3393_v45 = vmul.f32 0.03125, %v3392_v32 }
0x15d9   : > { %v3394_v47 = vadd.f32 1e-12, %v3393_v45 }
0x15db   : > { %4593 = vrsqrt.f32 %v3394_v47 }
0x15e8   : > { %v4594_v48 = vpop.eup %4593 }
0x15e9   : > { %v3396_v11 = vmul.f32 %v4594_v48, %v3388_v39 }
0x15eb   : > { %v3403_v51 = vmul.f32 %v3939_v49, %v3396_v11 }
0x15ed   : > { %v3410_v52 = vadd.f32 %v3940_v7, %v3403_v51 }
0x15ef   : > { %v3411_v53 = vpack.c.bf16 %v3410_v52, %v3410_v52 }
0x15f1   : > { %4329 = vmatmul.mubr.msk.bf16.vlgmr.msra.gmra.mxu1 %vm942_vm1, %v3411_v53 }
0x15f2   : > { %4348 = vmatprep.mubr.msk.bf16.mxu1 %vm4947_vm2, %v4946_v19  ;;  %4345 = vmatpush3.bf16.msra.mxu1 %v4531_v24 }
0x15f3   : > { %4346 = vmatprep.subr.bf16.mxu1 %v4946_v19  ;;  %v3953_v19 = vld [vmem:[%s6066_s16] ss:$0 sm:$0xff] }
0x16b1   : > { %v3472_v57 = vpop.f32.mrf.mxu1 }
0x16b2   : > { %v3473_v58 = vadd.f32 %v3941_v56, %v3472_v57 }
0x16b3   : > { %v4330_v30 = vpop.f32.mrf.mxu1 }
0x16b4   : > { %v3478_v59 = vmul.f32 %v3473_v58, %v3473_v58 }
0x16b5   : > { %v3475_v60 = vpop.f32.mrf.mxu1 }
0x16b6   : > { %v3479_v61 = vmul.f32 %v3478_v59, %v3473_v58 }
0x16b7   : > { %v4331_v62 = vpop.f32.mrf.mxu1 }
0x16b8   : > { %v3480_v63 = vmul.f32 0.044715, %v3479_v61 }
0x16ba   : > { %v3481_v0 = vadd.f32 %v3480_v63, %v3473_v58 }
0x16bc   : > { %v3482_v1 = vmul.f32 0.7978846, %v3481_v0 }
0x16be   : > { %4595 = vtanh.f32 %v3482_v1 }
0x16cb   : > { %v4596_v41 = vpop.eup %4595 }
0x16cc   : > { %v3484_v13 = vadd.f32 1.0, %v4596_v41 }
0x16ce   : > { %v3485_v3 = vmul.f32 0.5, %v3484_v13 }
0x16d0   : > { %v3486_v5 = vmul.f32 %v3485_v3, %v3473_v58 }
0x16d2   : > { %v3487_v6 = vpack.c.bf16 %v3486_v5, %v3486_v5 }
0x16d4   : > { %4341 = vmatmul.mubr.msk.bf16.vlgmr.msra.gmra.mxu0 %vm1815_vm7, %v3487_v6 }
0x1794   : > { %v3564_v9 = vpop.f32.mrf.mxu0 }
0x1795   : > { %v3565_v10 = vadd.f32 %v5672_v8, %v3564_v9  ;;  %v4532_v8 = vld [vmem:[%s6063_s30] sm:$0xff]  }
0x1796   : > { %v4342_v12 = vpop.f32.mrf.mxu0  ;;  %4347 = vmatpush3.bf16.msra.mxu1 %v4532_v8 }
0x1797   : > { %v3570_v26 = vadd.f32 %v3565_v10, %v3410_v52 }
0x1798   : > { %v3567_v14 = vpop.f32.mrf.mxu0 }
0x1799   : > { %v3573_v15 = vsel %vm942_vm1, %v3570_v26, 0.0 }
0x179a   : > { %3574 = vadd.xlane.f32.xlu0 %v3573_v15  ;;  %v4343_v17 = vpop.f32.mrf.mxu0 }
0x1823   : > { %v3575_v18 = vpop.xlane.xlu0 %3574 }
0x1824   : > { %v3576_v20 = vmul.f32 0.03125, %v3575_v18 }
0x1826   : > { %v3577_v21 = vsub.f32 %v3570_v26, %v3576_v20 }
0x1828   : > { %v3578_v22 = vmul.f32 %v3577_v21, %v3577_v21 }
0x182a   : > { %v3579_v23 = vsel %vm942_vm1, %v3578_v22, 0.0 }
0x182b   : > { %3580 = vadd.xlane.f32.xlu1 %v3579_v23 }
0x18b4   : > { %v3581_v25 = vpop.xlane.xlu1 %3580 }
0x18b5   : > { %v3582_v27 = vmul.f32 0.03125, %v3581_v25 }
0x18b7   : > { %v3583_v29 = vadd.f32 1e-12, %v3582_v27 }
0x18b9   : > { %4597 = vrsqrt.f32 %v3583_v29 }
0x18c6   : > { %v4598_v31 = vpop.eup %4597 }
0x18c7   : > { %v3585_v33 = vmul.f32 %v4598_v31, %v3577_v21 }
0x18c9   : > { %v3592_v34 = vmul.f32 %v5705_v28, %v3585_v33 }
0x18cb   : > { %v3599_v35 = vadd.f32 %v5710_v16, %v3592_v34 }
0x18cd   : > { %v3600_v2 = vpack.c.bf16 %v3599_v35, %v3599_v35 }
0x18cf   : > { %4349 = vmatmul.mubr.msk.bf16.vlgmr.msra.gmra.mxu1 %vm942_vm1, %v3600_v2 }
0x198f   : > { %v3661_v4 = vpop.f32.mrf.mxu1 }
0x1990   : > { %v3662_v36 = vadd.f32 %v3953_v19, %v3661_v4 }
0x1991   : > { %v4350_v28 = vpop.f32.mrf.mxu1 }
0x1992   : > { %3667 = vst.msk [vmem:[%s894_s20] sm:$0xff] %vm1815_vm7, %v3662_v36 }
0x1993   : > { %v3664_v16 = vpop.f32.mrf.mxu1 }
0x1994   : > { %4862 = shalt.err (!%p4859_p6)
}
0x1995   : > { %s4863_s10 = scalar_lea.hbm %s5873_s3, 128  ;;  %s4867_s0 = scalar_lea.hbm %s6068_s27, 256 }
0x1996   : > { %p4864_p10 = scmp.ne.s32.totalorder %s5873_s3, %s4863_s10  ;;  %p4868_p7 = scmp.lt.s32.totalorder %s5873_s3, %s6068_s27 }
0x1997   : > { %p4869_p8 = scmp.lt.s32.totalorder %s4867_s0, %s4863_s10 }
0x1998   : > { %p4865_p12 = pnand %p4864_p10, %p6069_p1 }
0x1999   : > { %p4870_p11 = por %p4869_p8, %p4868_p7 }
0x199a   : > { %p4866_p4 = pneg %p4865_p12 }
0x199c   : > { %p4871_p0 = pnand %p4870_p11, %p4866_p4 }
0x199e   : > { %4874 = shalt.err (!%p4871_p0)
}
0x199f   : > { %4388 = dma.vmem_to_hbm [thread:$0]  (%p6069_p1), %s5875_s11, 128, %s5873_s3, %s3669_s6   ;;  %v4351_v37 = vpop.f32.mrf.mxu1 }
0x19a0 PF: > { %s6070_s28 = sld [smem:[#allocation32_spill]] }
0x19a1   : > { %s6071_s1 = sld [smem:[#allocation29_spill]] }
0x19a2   : > { %s6072_s12 = sld [smem:[#allocation36_spill]] }
0x19a6   : > { %p4440_p2 = scmp.ge.s32.totalorder %s6070_s28, 2 }
0x19a7   : > { %s3694_s29 = sand.u32 1, %s6071_s1  }
0x19a8   : > { %p6073_p9 = scmp.ne.s32.totalorder %s6072_s12, 0  ;;  %s3695_s26 = scalar_lea.sflag [#allocation8], %s3694_s29 }
0x19aa   : > { %p4419_p3 = pnand %p4440_p2, %p6073_p9 }
0x19ac   : > { %p4420_p13 = pneg %p4419_p3 }
0x19ae   : > { %4914 = dma.done.wait (%p4420_p13), %s3695_s26, 128  }
0x19af   : > { %4916 = vsyncadd (%p4420_p13), %s3695_s26, 4294967168  ;;  %s6074_s12 = sld [smem:[#allocation33_spill]] }
0x19b0   : > { %s6075_s11 = sld [smem:[#allocation30_spill]] }
0x19b1   : > { %s6076_s0 = sld [smem:[#allocation31_spill]] }
0x19b2   : > { %s6077_s20 = sld [smem:[#allocation34_spill]] }
0x19b5   : > { %p49_p5 = scmp.ge.s32.totalorder %s6074_s12, 4  }
0x19b7   :  { %51 = sbr.rel (!%p49_p5) target bundleno = 43 (0x2b), region = 209 }
0x19bc   :  { %3700 = vsyncpa [#allocation7], 1 }
0x19bd   :  { %3702 = vsyncpa [#allocation7 + $0x1], 1 }
0x19be   :  { %3703 = vsyncpa [#allocation10], 1 }
0x19bf   :  { %3704 = vsyncpa [#allocation13], 1 }
0x19c0   :  { %3705 = vsyncpa [#allocation16], 1 }
0x19c1   :  { %3706 = vsyncpa [#allocation19], 1 }
0x19c2   :  { %3707 = vsyncpa [#allocation8], 1 }
0x19c3   :  { %3709 = vsyncpa [#allocation8 + $0x1], 1 }

</bundles_post_ra>
